<compile_context>
chip_gen: v7x
topology: tpu7x:2x2x1
jax: 0.10.0
libtpu: 0.0.40
codegen_flags: <defaults>
</compile_context>

<pallas_src>
import functools

import jax
import jax.numpy as jnp
from jax import lax
from jax.experimental import pallas as pl
from jax.experimental.pallas import tpu as pltpu


def _graph_max_pool_kernel(feat_ref, idx_ref, out_ref, *, k, nb):
    # feat_ref: (nb, I, D), idx_ref: (nb, I, 1) i32, out_ref: (nb, k, D)
    I = feat_ref.shape[1]
    D = feat_ref.shape[2]
    neg = jnp.finfo(feat_ref.dtype).min  # masked-max filler (not used for empty detection)

    def one_cloud(b, carry):
        feat = feat_ref[b]                          # (I, D)
        idx = idx_ref[b]                            # (I, 1)
        # Hoist the lane-broadcast of the index out of the k loop (JAX does not CSE
        # broadcast_in_dim; re-broadcasting per cluster was the main XLU pressure).
        idx_b = jnp.broadcast_to(idx, (I, D))       # (I, D) int32, built once per cloud
        rows = []
        seen = []
        for c in range(k):                          # k is small & static -> fully unrolled
            mask = idx_b == c                       # full-vreg VPU compare, no per-iter broadcast
            rows.append(jnp.max(jnp.where(mask, feat, neg), axis=0, keepdims=True))  # (1, D)
            # Exact "cluster seen" bit from the narrow (I, 1) index column (no sentinel
            # aliasing if a genuine max equals finfo.min).
            seen.append(jnp.max((idx == c).astype(jnp.int32), axis=0, keepdims=True))  # (1, 1)
        block = jnp.concatenate(rows, axis=0)       # (k, D) lane-dense tile
        seen_col = jnp.concatenate(seen, axis=0)    # (k, 1)
        # Single full-tile empty-cluster cleanup (torch_scatter>=2.x fills empty slots with 0).
        out_ref[b] = jnp.where(seen_col > 0, block, jnp.zeros_like(block)).astype(out_ref.dtype)
        return carry

    lax.fori_loop(0, nb, one_cloud, 0, unroll=min(nb, 4))


def graph_max_pool_stack(feature_matrix_batch, cluster_index, k, block_clouds=None):
    """Pallas implementation of GraphMaxPoolStack.forward."""
    S, N, I, D = feature_matrix_batch.shape
    B = S * N
    dtype = feature_matrix_batch.dtype
    # Flatten stack/batch so one grid step processes many point clouds.
    # Keep the input dtype (e.g. bf16 stays bf16 -> half the HBM traffic).
    feat = feature_matrix_batch.reshape(B, I, D)
    idx = cluster_index.astype(jnp.int32).reshape(B, I, 1)

    if block_clouds is None:
        # VMEM budget: 2x (double buffering) * (feat + idx + out) per block must stay well
        # under the default scoped VMEM on every generation (v5e 16 MiB, v6e/v7x 32 MiB).
        bytes_per_cloud = I * D * dtype.itemsize + I * 4 + k * D * dtype.itemsize
        vmem_budget = 8 * 1024 * 1024
        block_clouds = max(1, vmem_budget // (2 * bytes_per_cloud))
        block_clouds = min(block_clouds, 128)
        # Keep at least 2 grid steps when possible so v7x's 2 TensorCores both get work.
        block_clouds = min(block_clouds, max(1, pl.cdiv(B, 2)))
    nb = int(block_clouds)

    n_blocks = pl.cdiv(B, nb)
    B_pad = n_blocks * nb
    if B_pad != B:
        feat = jnp.pad(feat, ((0, B_pad - B), (0, 0), (0, 0)))
        idx = jnp.pad(idx, ((0, B_pad - B), (0, 0), (0, 0)))

    kernel = functools.partial(_graph_max_pool_kernel, k=k, nb=nb)
    out = pl.pallas_call(
        kernel,
        out_shape=jax.ShapeDtypeStruct((B_pad, k, D), dtype),
        grid=(n_blocks,),
        in_specs=[
            pl.BlockSpec((nb, I, D), lambda i: (i, 0, 0)),
            pl.BlockSpec((nb, I, 1), lambda i: (i, 0, 0)),
        ],
        out_specs=pl.BlockSpec((nb, k, D), lambda i: (i, 0, 0)),
        compiler_params=pltpu.CompilerParams(
            dimension_semantics=("parallel",),
            vmem_limit_bytes=32 * 1024 * 1024),
    )(feat, idx)
    return out[:B].reshape(S, N, k, D)


def _reference(feat, idx, k):
    # Pure-JAX reference of per-(stack, batch) scatter_max with empty clusters filled with 0.
    onehot = idx[..., None] == jnp.arange(k)[None, None, None, :]          # (S,N,I,k)
    neg = jnp.finfo(feat.dtype).min
    vals = jnp.where(onehot[..., None], feat[:, :, :, None, :], neg)       # (S,N,I,k,D)
    out = jnp.max(vals, axis=2)                                            # (S,N,k,D)
    seen = jnp.any(onehot, axis=2)[..., None]                              # (S,N,k,1)
    return jnp.where(seen, out, jnp.zeros_like(out))


if __name__ == "__main__":
    # GraphMaxPool has no learnable parameters, so there is nothing to initialize.
    S, N, I, D, K = 3, 2, 64, 128, 8

    key = jax.random.PRNGKey(0)
    kf, ki = jax.random.split(key)
    feature_matrix_batch = jax.random.normal(kf, (S, N, I, D), dtype=jnp.float32)
    cluster_index = jax.random.randint(ki, (S, N, I), 0, K, dtype=jnp.int32)

    out = graph_max_pool_stack(feature_matrix_batch, cluster_index, K)
    out = jax.block_until_ready(out)

    ref = _reference(feature_matrix_batch, cluster_index, K)
    assert out.shape == (S, N, K, D), out.shape
    assert jnp.allclose(out, ref, atol=1e-6, rtol=1e-6), "mismatch vs reference"

    # TODO(synk): empty-cluster fill follows torch_scatter>=2.x (fill 0); older
    # torch_scatter versions used a configurable fill_value instead.
    print("KERNEL_OK")
</pallas_src>

<mosaic_0001>
module attributes {stable_mosaic.version = 11 : i64} {
  func.func @_graph_max_pool_kernel(%arg0: i32, %arg1: memref<3x64x128xf32, #tpu.memory_space<vmem>>, %arg2: memref<3x64x1xi32, #tpu.memory_space<vmem>>, %arg3: memref<3x8x128xf32, #tpu.memory_space<vmem>>) attributes {dimension_semantics = [#tpu.dimension_semantics<parallel>], iteration_bounds = array<i64: 2>, scalar_prefetch = 0 : i64, scratch_operands = 0 : i64, tpu.core_type = #tpu.core_type<tc>, window_params = [{transform_indices = @transform_0, window_bounds = array<i64: 3, 64, 128>}, {transform_indices = @transform_1, window_bounds = array<i64: 3, 64, 1>}, {transform_indices = @transform_2, window_bounds = array<i64: 3, 8, 128>}]} {
    %c0_i32 = arith.constant 0 : i32
    %0 = arith.index_cast %c0_i32 : i32 to index
    %c0 = arith.constant 0 : index
    %c0_0 = arith.constant 0 : index
    %1 = vector.load %arg1[%0, %c0, %c0_0] : memref<3x64x128xf32, #tpu.memory_space<vmem>>, vector<1x64x128xf32>
    %2 = vector.shape_cast %1 : vector<1x64x128xf32> to vector<64x128xf32>
    %3 = arith.index_cast %c0_i32 : i32 to index
    %c0_1 = arith.constant 0 : index
    %c0_2 = arith.constant 0 : index
    %4 = vector.load %arg2[%3, %c0_1, %c0_2] : memref<3x64x1xi32, #tpu.memory_space<vmem>>, vector<1x64x1xi32>
    %5 = vector.shape_cast %4 : vector<1x64x1xi32> to vector<64x1xi32>
    %6 = vector.shape_cast %5 : vector<64x1xi32> to vector<64x1xi32>
    %7 = vector.broadcast %6 : vector<64x1xi32> to vector<64x128xi32>
    %c0_i32_3 = arith.constant 0 : i32
    %8 = vector.broadcast %c0_i32_3 : i32 to vector<64x128xi32>
    %9 = arith.cmpi eq, %7, %8 : vector<64x128xi32>
    %cst = arith.constant -3.40282347E+38 : f32
    %10 = vector.broadcast %cst : f32 to vector<64x128xf32>
    %11 = arith.select %9, %2, %10 : vector<64x128xi1>, vector<64x128xf32>
    %cst_4 = arith.constant dense<0xFF800000> : vector<128xf32>
    %12 = vector.multi_reduction <maximumf>, %11, %cst_4 [0] : vector<64x128xf32> to vector<128xf32>
    %13 = vector.shape_cast %12 : vector<128xf32> to vector<1x128xf32>
    %c0_i32_5 = arith.constant 0 : i32
    %14 = vector.broadcast %c0_i32_5 : i32 to vector<64x1xi32>
    %15 = arith.cmpi eq, %5, %14 : vector<64x1xi32>
    %16 = arith.extui %15 : vector<64x1xi1> to vector<64x1xi32>
    %cst_6 = arith.constant dense<-2147483648> : vector<1xi32>
    %17 = vector.multi_reduction <maxsi>, %16, %cst_6 [0] : vector<64x1xi32> to vector<1xi32>
    %18 = vector.shape_cast %17 : vector<1xi32> to vector<1x1xi32>
    %c1_i32 = arith.constant 1 : i32
    %19 = vector.broadcast %c1_i32 : i32 to vector<64x128xi32>
    %20 = arith.cmpi eq, %7, %19 : vector<64x128xi32>
    %cst_7 = arith.constant -3.40282347E+38 : f32
    %21 = vector.broadcast %cst_7 : f32 to vector<64x128xf32>
    %22 = arith.select %20, %2, %21 : vector<64x128xi1>, vector<64x128xf32>
    %cst_8 = arith.constant dense<0xFF800000> : vector<128xf32>
    %23 = vector.multi_reduction <maximumf>, %22, %cst_8 [0] : vector<64x128xf32> to vector<128xf32>
    %24 = vector.shape_cast %23 : vector<128xf32> to vector<1x128xf32>
    %c1_i32_9 = arith.constant 1 : i32
    %25 = vector.broadcast %c1_i32_9 : i32 to vector<64x1xi32>
    %26 = arith.cmpi eq, %5, %25 : vector<64x1xi32>
    %27 = arith.extui %26 : vector<64x1xi1> to vector<64x1xi32>
    %cst_10 = arith.constant dense<-2147483648> : vector<1xi32>
    %28 = vector.multi_reduction <maxsi>, %27, %cst_10 [0] : vector<64x1xi32> to vector<1xi32>
    %29 = vector.shape_cast %28 : vector<1xi32> to vector<1x1xi32>
    %c2_i32 = arith.constant 2 : i32
    %30 = vector.broadcast %c2_i32 : i32 to vector<64x128xi32>
    %31 = arith.cmpi eq, %7, %30 : vector<64x128xi32>
    %cst_11 = arith.constant -3.40282347E+38 : f32
    %32 = vector.broadcast %cst_11 : f32 to vector<64x128xf32>
    %33 = arith.select %31, %2, %32 : vector<64x128xi1>, vector<64x128xf32>
    %cst_12 = arith.constant dense<0xFF800000> : vector<128xf32>
    %34 = vector.multi_reduction <maximumf>, %33, %cst_12 [0] : vector<64x128xf32> to vector<128xf32>
    %35 = vector.shape_cast %34 : vector<128xf32> to vector<1x128xf32>
    %c2_i32_13 = arith.constant 2 : i32
    %36 = vector.broadcast %c2_i32_13 : i32 to vector<64x1xi32>
    %37 = arith.cmpi eq, %5, %36 : vector<64x1xi32>
    %38 = arith.extui %37 : vector<64x1xi1> to vector<64x1xi32>
    %cst_14 = arith.constant dense<-2147483648> : vector<1xi32>
    %39 = vector.multi_reduction <maxsi>, %38, %cst_14 [0] : vector<64x1xi32> to vector<1xi32>
    %40 = vector.shape_cast %39 : vector<1xi32> to vector<1x1xi32>
    %c3_i32 = arith.constant 3 : i32
    %41 = vector.broadcast %c3_i32 : i32 to vector<64x128xi32>
    %42 = arith.cmpi eq, %7, %41 : vector<64x128xi32>
    %cst_15 = arith.constant -3.40282347E+38 : f32
    %43 = vector.broadcast %cst_15 : f32 to vector<64x128xf32>
    %44 = arith.select %42, %2, %43 : vector<64x128xi1>, vector<64x128xf32>
    %cst_16 = arith.constant dense<0xFF800000> : vector<128xf32>
    %45 = vector.multi_reduction <maximumf>, %44, %cst_16 [0] : vector<64x128xf32> to vector<128xf32>
    %46 = vector.shape_cast %45 : vector<128xf32> to vector<1x128xf32>
    %c3_i32_17 = arith.constant 3 : i32
    %47 = vector.broadcast %c3_i32_17 : i32 to vector<64x1xi32>
    %48 = arith.cmpi eq, %5, %47 : vector<64x1xi32>
    %49 = arith.extui %48 : vector<64x1xi1> to vector<64x1xi32>
    %cst_18 = arith.constant dense<-2147483648> : vector<1xi32>
    %50 = vector.multi_reduction <maxsi>, %49, %cst_18 [0] : vector<64x1xi32> to vector<1xi32>
    %51 = vector.shape_cast %50 : vector<1xi32> to vector<1x1xi32>
    %c4_i32 = arith.constant 4 : i32
    %52 = vector.broadcast %c4_i32 : i32 to vector<64x128xi32>
    %53 = arith.cmpi eq, %7, %52 : vector<64x128xi32>
    %cst_19 = arith.constant -3.40282347E+38 : f32
    %54 = vector.broadcast %cst_19 : f32 to vector<64x128xf32>
    %55 = arith.select %53, %2, %54 : vector<64x128xi1>, vector<64x128xf32>
    %cst_20 = arith.constant dense<0xFF800000> : vector<128xf32>
    %56 = vector.multi_reduction <maximumf>, %55, %cst_20 [0] : vector<64x128xf32> to vector<128xf32>
    %57 = vector.shape_cast %56 : vector<128xf32> to vector<1x128xf32>
    %c4_i32_21 = arith.constant 4 : i32
    %58 = vector.broadcast %c4_i32_21 : i32 to vector<64x1xi32>
    %59 = arith.cmpi eq, %5, %58 : vector<64x1xi32>
    %60 = arith.extui %59 : vector<64x1xi1> to vector<64x1xi32>
    %cst_22 = arith.constant dense<-2147483648> : vector<1xi32>
    %61 = vector.multi_reduction <maxsi>, %60, %cst_22 [0] : vector<64x1xi32> to vector<1xi32>
    %62 = vector.shape_cast %61 : vector<1xi32> to vector<1x1xi32>
    %c5_i32 = arith.constant 5 : i32
    %63 = vector.broadcast %c5_i32 : i32 to vector<64x128xi32>
    %64 = arith.cmpi eq, %7, %63 : vector<64x128xi32>
    %cst_23 = arith.constant -3.40282347E+38 : f32
    %65 = vector.broadcast %cst_23 : f32 to vector<64x128xf32>
    %66 = arith.select %64, %2, %65 : vector<64x128xi1>, vector<64x128xf32>
    %cst_24 = arith.constant dense<0xFF800000> : vector<128xf32>
    %67 = vector.multi_reduction <maximumf>, %66, %cst_24 [0] : vector<64x128xf32> to vector<128xf32>
    %68 = vector.shape_cast %67 : vector<128xf32> to vector<1x128xf32>
    %c5_i32_25 = arith.constant 5 : i32
    %69 = vector.broadcast %c5_i32_25 : i32 to vector<64x1xi32>
    %70 = arith.cmpi eq, %5, %69 : vector<64x1xi32>
    %71 = arith.extui %70 : vector<64x1xi1> to vector<64x1xi32>
    %cst_26 = arith.constant dense<-2147483648> : vector<1xi32>
    %72 = vector.multi_reduction <maxsi>, %71, %cst_26 [0] : vector<64x1xi32> to vector<1xi32>
    %73 = vector.shape_cast %72 : vector<1xi32> to vector<1x1xi32>
    %c6_i32 = arith.constant 6 : i32
    %74 = vector.broadcast %c6_i32 : i32 to vector<64x128xi32>
    %75 = arith.cmpi eq, %7, %74 : vector<64x128xi32>
    %cst_27 = arith.constant -3.40282347E+38 : f32
    %76 = vector.broadcast %cst_27 : f32 to vector<64x128xf32>
    %77 = arith.select %75, %2, %76 : vector<64x128xi1>, vector<64x128xf32>
    %cst_28 = arith.constant dense<0xFF800000> : vector<128xf32>
    %78 = vector.multi_reduction <maximumf>, %77, %cst_28 [0] : vector<64x128xf32> to vector<128xf32>
    %79 = vector.shape_cast %78 : vector<128xf32> to vector<1x128xf32>
    %c6_i32_29 = arith.constant 6 : i32
    %80 = vector.broadcast %c6_i32_29 : i32 to vector<64x1xi32>
    %81 = arith.cmpi eq, %5, %80 : vector<64x1xi32>
    %82 = arith.extui %81 : vector<64x1xi1> to vector<64x1xi32>
    %cst_30 = arith.constant dense<-2147483648> : vector<1xi32>
    %83 = vector.multi_reduction <maxsi>, %82, %cst_30 [0] : vector<64x1xi32> to vector<1xi32>
    %84 = vector.shape_cast %83 : vector<1xi32> to vector<1x1xi32>
    %c7_i32 = arith.constant 7 : i32
    %85 = vector.broadcast %c7_i32 : i32 to vector<64x128xi32>
    %86 = arith.cmpi eq, %7, %85 : vector<64x128xi32>
    %cst_31 = arith.constant -3.40282347E+38 : f32
    %87 = vector.broadcast %cst_31 : f32 to vector<64x128xf32>
    %88 = arith.select %86, %2, %87 : vector<64x128xi1>, vector<64x128xf32>
    %cst_32 = arith.constant dense<0xFF800000> : vector<128xf32>
    %89 = vector.multi_reduction <maximumf>, %88, %cst_32 [0] : vector<64x128xf32> to vector<128xf32>
    %90 = vector.shape_cast %89 : vector<128xf32> to vector<1x128xf32>
    %c7_i32_33 = arith.constant 7 : i32
    %91 = vector.broadcast %c7_i32_33 : i32 to vector<64x1xi32>
    %92 = arith.cmpi eq, %5, %91 : vector<64x1xi32>
    %93 = arith.extui %92 : vector<64x1xi1> to vector<64x1xi32>
    %cst_34 = arith.constant dense<-2147483648> : vector<1xi32>
    %94 = vector.multi_reduction <maxsi>, %93, %cst_34 [0] : vector<64x1xi32> to vector<1xi32>
    %95 = vector.shape_cast %94 : vector<1xi32> to vector<1x1xi32>
    %96 = tpu.concatenate %13, %24, %35, %46, %57, %68, %79, %90 in 0 : vector<1x128xf32>, vector<1x128xf32>, vector<1x128xf32>, vector<1x128xf32>, vector<1x128xf32>, vector<1x128xf32>, vector<1x128xf32>, vector<1x128xf32> -> vector<8x128xf32>
    %97 = tpu.concatenate %18, %29, %40, %51, %62, %73, %84, %95 in 0 : vector<1x1xi32>, vector<1x1xi32>, vector<1x1xi32>, vector<1x1xi32>, vector<1x1xi32>, vector<1x1xi32>, vector<1x1xi32>, vector<1x1xi32> -> vector<8x1xi32>
    %c0_i32_35 = arith.constant 0 : i32
    %98 = vector.broadcast %c0_i32_35 : i32 to vector<8x1xi32>
    %99 = arith.cmpi sgt, %97, %98 : vector<8x1xi32>
    %cst_36 = arith.constant 0.000000e+00 : f32
    %100 = vector.broadcast %cst_36 : f32 to vector<8x128xf32>
    %101 = vector.shape_cast %99 : vector<8x1xi1> to vector<8x1xi1>
    %102 = vector.broadcast %101 : vector<8x1xi1> to vector<8x128xi1>
    %103 = arith.select %102, %96, %100 : vector<8x128xi1>, vector<8x128xf32>
    %104 = arith.index_cast %c0_i32 : i32 to index
    %c0_37 = arith.constant 0 : index
    %c0_38 = arith.constant 0 : index
    %105 = vector.load %arg3[%104, %c0_37, %c0_38] : memref<3x8x128xf32, #tpu.memory_space<vmem>>, vector<1x8x128xf32>
    %106 = vector.shape_cast %105 : vector<1x8x128xf32> to vector<8x128xf32>
    %107 = vector.shape_cast %103 : vector<8x128xf32> to vector<1x8x128xf32>
    tpu.vector_store %arg3[%104, %c0_37, %c0_38], %107 {strides = array<i32>} : memref<3x8x128xf32, #tpu.memory_space<vmem>>, vector<1x8x128xf32>,
    %c1_i32_39 = arith.constant 1 : i32
    %108 = arith.index_cast %c1_i32_39 : i32 to index
    %c0_40 = arith.constant 0 : index
    %c0_41 = arith.constant 0 : index
    %109 = vector.load %arg1[%108, %c0_40, %c0_41] : memref<3x64x128xf32, #tpu.memory_space<vmem>>, vector<1x64x128xf32>
    %110 = vector.shape_cast %109 : vector<1x64x128xf32> to vector<64x128xf32>
    %111 = arith.index_cast %c1_i32_39 : i32 to index
    %c0_42 = arith.constant 0 : index
    %c0_43 = arith.constant 0 : index
    %112 = vector.load %arg2[%111, %c0_42, %c0_43] : memref<3x64x1xi32, #tpu.memory_space<vmem>>, vector<1x64x1xi32>
    %113 = vector.shape_cast %112 : vector<1x64x1xi32> to vector<64x1xi32>
    %114 = vector.shape_cast %113 : vector<64x1xi32> to vector<64x1xi32>
    %115 = vector.broadcast %114 : vector<64x1xi32> to vector<64x128xi32>
    %c0_i32_44 = arith.constant 0 : i32
    %116 = vector.broadcast %c0_i32_44 : i32 to vector<64x128xi32>
    %117 = arith.cmpi eq, %115, %116 : vector<64x128xi32>
    %cst_45 = arith.constant -3.40282347E+38 : f32
    %118 = vector.broadcast %cst_45 : f32 to vector<64x128xf32>
    %119 = arith.select %117, %110, %118 : vector<64x128xi1>, vector<64x128xf32>
    %cst_46 = arith.constant dense<0xFF800000> : vector<128xf32>
    %120 = vector.multi_reduction <maximumf>, %119, %cst_46 [0] : vector<64x128xf32> to vector<128xf32>
    %121 = vector.shape_cast %120 : vector<128xf32> to vector<1x128xf32>
    %c0_i32_47 = arith.constant 0 : i32
    %122 = vector.broadcast %c0_i32_47 : i32 to vector<64x1xi32>
    %123 = arith.cmpi eq, %113, %122 : vector<64x1xi32>
    %124 = arith.extui %123 : vector<64x1xi1> to vector<64x1xi32>
    %cst_48 = arith.constant dense<-2147483648> : vector<1xi32>
    %125 = vector.multi_reduction <maxsi>, %124, %cst_48 [0] : vector<64x1xi32> to vector<1xi32>
    %126 = vector.shape_cast %125 : vector<1xi32> to vector<1x1xi32>
    %c1_i32_49 = arith.constant 1 : i32
    %127 = vector.broadcast %c1_i32_49 : i32 to vector<64x128xi32>
    %128 = arith.cmpi eq, %115, %127 : vector<64x128xi32>
    %cst_50 = arith.constant -3.40282347E+38 : f32
    %129 = vector.broadcast %cst_50 : f32 to vector<64x128xf32>
    %130 = arith.select %128, %110, %129 : vector<64x128xi1>, vector<64x128xf32>
    %cst_51 = arith.constant dense<0xFF800000> : vector<128xf32>
    %131 = vector.multi_reduction <maximumf>, %130, %cst_51 [0] : vector<64x128xf32> to vector<128xf32>
    %132 = vector.shape_cast %131 : vector<128xf32> to vector<1x128xf32>
    %c1_i32_52 = arith.constant 1 : i32
    %133 = vector.broadcast %c1_i32_52 : i32 to vector<64x1xi32>
    %134 = arith.cmpi eq, %113, %133 : vector<64x1xi32>
    %135 = arith.extui %134 : vector<64x1xi1> to vector<64x1xi32>
    %cst_53 = arith.constant dense<-2147483648> : vector<1xi32>
    %136 = vector.multi_reduction <maxsi>, %135, %cst_53 [0] : vector<64x1xi32> to vector<1xi32>
    %137 = vector.shape_cast %136 : vector<1xi32> to vector<1x1xi32>
    %c2_i32_54 = arith.constant 2 : i32
    %138 = vector.broadcast %c2_i32_54 : i32 to vector<64x128xi32>
    %139 = arith.cmpi eq, %115, %138 : vector<64x128xi32>
    %cst_55 = arith.constant -3.40282347E+38 : f32
    %140 = vector.broadcast %cst_55 : f32 to vector<64x128xf32>
    %141 = arith.select %139, %110, %140 : vector<64x128xi1>, vector<64x128xf32>
    %cst_56 = arith.constant dense<0xFF800000> : vector<128xf32>
    %142 = vector.multi_reduction <maximumf>, %141, %cst_56 [0] : vector<64x128xf32> to vector<128xf32>
    %143 = vector.shape_cast %142 : vector<128xf32> to vector<1x128xf32>
    %c2_i32_57 = arith.constant 2 : i32
    %144 = vector.broadcast %c2_i32_57 : i32 to vector<64x1xi32>
    %145 = arith.cmpi eq, %113, %144 : vector<64x1xi32>
    %146 = arith.extui %145 : vector<64x1xi1> to vector<64x1xi32>
    %cst_58 = arith.constant dense<-2147483648> : vector<1xi32>
    %147 = vector.multi_reduction <maxsi>, %146, %cst_58 [0] : vector<64x1xi32> to vector<1xi32>
    %148 = vector.shape_cast %147 : vector<1xi32> to vector<1x1xi32>
    %c3_i32_59 = arith.constant 3 : i32
    %149 = vector.broadcast %c3_i32_59 : i32 to vector<64x128xi32>
    %150 = arith.cmpi eq, %115, %149 : vector<64x128xi32>
    %cst_60 = arith.constant -3.40282347E+38 : f32
    %151 = vector.broadcast %cst_60 : f32 to vector<64x128xf32>
    %152 = arith.select %150, %110, %151 : vector<64x128xi1>, vector<64x128xf32>
    %cst_61 = arith.constant dense<0xFF800000> : vector<128xf32>
    %153 = vector.multi_reduction <maximumf>, %152, %cst_61 [0] : vector<64x128xf32> to vector<128xf32>
    %154 = vector.shape_cast %153 : vector<128xf32> to vector<1x128xf32>
    %c3_i32_62 = arith.constant 3 : i32
    %155 = vector.broadcast %c3_i32_62 : i32 to vector<64x1xi32>
    %156 = arith.cmpi eq, %113, %155 : vector<64x1xi32>
    %157 = arith.extui %156 : vector<64x1xi1> to vector<64x1xi32>
    %cst_63 = arith.constant dense<-2147483648> : vector<1xi32>
    %158 = vector.multi_reduction <maxsi>, %157, %cst_63 [0] : vector<64x1xi32> to vector<1xi32>
    %159 = vector.shape_cast %158 : vector<1xi32> to vector<1x1xi32>
    %c4_i32_64 = arith.constant 4 : i32
    %160 = vector.broadcast %c4_i32_64 : i32 to vector<64x128xi32>
    %161 = arith.cmpi eq, %115, %160 : vector<64x128xi32>
    %cst_65 = arith.constant -3.40282347E+38 : f32
    %162 = vector.broadcast %cst_65 : f32 to vector<64x128xf32>
    %163 = arith.select %161, %110, %162 : vector<64x128xi1>, vector<64x128xf32>
    %cst_66 = arith.constant dense<0xFF800000> : vector<128xf32>
    %164 = vector.multi_reduction <maximumf>, %163, %cst_66 [0] : vector<64x128xf32> to vector<128xf32>
    %165 = vector.shape_cast %164 : vector<128xf32> to vector<1x128xf32>
    %c4_i32_67 = arith.constant 4 : i32
    %166 = vector.broadcast %c4_i32_67 : i32 to vector<64x1xi32>
    %167 = arith.cmpi eq, %113, %166 : vector<64x1xi32>
    %168 = arith.extui %167 : vector<64x1xi1> to vector<64x1xi32>
    %cst_68 = arith.constant dense<-2147483648> : vector<1xi32>
    %169 = vector.multi_reduction <maxsi>, %168, %cst_68 [0] : vector<64x1xi32> to vector<1xi32>
    %170 = vector.shape_cast %169 : vector<1xi32> to vector<1x1xi32>
    %c5_i32_69 = arith.constant 5 : i32
    %171 = vector.broadcast %c5_i32_69 : i32 to vector<64x128xi32>
    %172 = arith.cmpi eq, %115, %171 : vector<64x128xi32>
    %cst_70 = arith.constant -3.40282347E+38 : f32
    %173 = vector.broadcast %cst_70 : f32 to vector<64x128xf32>
    %174 = arith.select %172, %110, %173 : vector<64x128xi1>, vector<64x128xf32>
    %cst_71 = arith.constant dense<0xFF800000> : vector<128xf32>
    %175 = vector.multi_reduction <maximumf>, %174, %cst_71 [0] : vector<64x128xf32> to vector<128xf32>
    %176 = vector.shape_cast %175 : vector<128xf32> to vector<1x128xf32>
    %c5_i32_72 = arith.constant 5 : i32
    %177 = vector.broadcast %c5_i32_72 : i32 to vector<64x1xi32>
    %178 = arith.cmpi eq, %113, %177 : vector<64x1xi32>
    %179 = arith.extui %178 : vector<64x1xi1> to vector<64x1xi32>
    %cst_73 = arith.constant dense<-2147483648> : vector<1xi32>
    %180 = vector.multi_reduction <maxsi>, %179, %cst_73 [0] : vector<64x1xi32> to vector<1xi32>
    %181 = vector.shape_cast %180 : vector<1xi32> to vector<1x1xi32>
    %c6_i32_74 = arith.constant 6 : i32
    %182 = vector.broadcast %c6_i32_74 : i32 to vector<64x128xi32>
    %183 = arith.cmpi eq, %115, %182 : vector<64x128xi32>
    %cst_75 = arith.constant -3.40282347E+38 : f32
    %184 = vector.broadcast %cst_75 : f32 to vector<64x128xf32>
    %185 = arith.select %183, %110, %184 : vector<64x128xi1>, vector<64x128xf32>
    %cst_76 = arith.constant dense<0xFF800000> : vector<128xf32>
    %186 = vector.multi_reduction <maximumf>, %185, %cst_76 [0] : vector<64x128xf32> to vector<128xf32>
    %187 = vector.shape_cast %186 : vector<128xf32> to vector<1x128xf32>
    %c6_i32_77 = arith.constant 6 : i32
    %188 = vector.broadcast %c6_i32_77 : i32 to vector<64x1xi32>
    %189 = arith.cmpi eq, %113, %188 : vector<64x1xi32>
    %190 = arith.extui %189 : vector<64x1xi1> to vector<64x1xi32>
    %cst_78 = arith.constant dense<-2147483648> : vector<1xi32>
    %191 = vector.multi_reduction <maxsi>, %190, %cst_78 [0] : vector<64x1xi32> to vector<1xi32>
    %192 = vector.shape_cast %191 : vector<1xi32> to vector<1x1xi32>
    %c7_i32_79 = arith.constant 7 : i32
    %193 = vector.broadcast %c7_i32_79 : i32 to vector<64x128xi32>
    %194 = arith.cmpi eq, %115, %193 : vector<64x128xi32>
    %cst_80 = arith.constant -3.40282347E+38 : f32
    %195 = vector.broadcast %cst_80 : f32 to vector<64x128xf32>
    %196 = arith.select %194, %110, %195 : vector<64x128xi1>, vector<64x128xf32>
    %cst_81 = arith.constant dense<0xFF800000> : vector<128xf32>
    %197 = vector.multi_reduction <maximumf>, %196, %cst_81 [0] : vector<64x128xf32> to vector<128xf32>
    %198 = vector.shape_cast %197 : vector<128xf32> to vector<1x128xf32>
    %c7_i32_82 = arith.constant 7 : i32
    %199 = vector.broadcast %c7_i32_82 : i32 to vector<64x1xi32>
    %200 = arith.cmpi eq, %113, %199 : vector<64x1xi32>
    %201 = arith.extui %200 : vector<64x1xi1> to vector<64x1xi32>
    %cst_83 = arith.constant dense<-2147483648> : vector<1xi32>
    %202 = vector.multi_reduction <maxsi>, %201, %cst_83 [0] : vector<64x1xi32> to vector<1xi32>
    %203 = vector.shape_cast %202 : vector<1xi32> to vector<1x1xi32>
    %204 = tpu.concatenate %121, %132, %143, %154, %165, %176, %187, %198 in 0 : vector<1x128xf32>, vector<1x128xf32>, vector<1x128xf32>, vector<1x128xf32>, vector<1x128xf32>, vector<1x128xf32>, vector<1x128xf32>, vector<1x128xf32> -> vector<8x128xf32>
    %205 = tpu.concatenate %126, %137, %148, %159, %170, %181, %192, %203 in 0 : vector<1x1xi32>, vector<1x1xi32>, vector<1x1xi32>, vector<1x1xi32>, vector<1x1xi32>, vector<1x1xi32>, vector<1x1xi32>, vector<1x1xi32> -> vector<8x1xi32>
    %c0_i32_84 = arith.constant 0 : i32
    %206 = vector.broadcast %c0_i32_84 : i32 to vector<8x1xi32>
    %207 = arith.cmpi sgt, %205, %206 : vector<8x1xi32>
    %cst_85 = arith.constant 0.000000e+00 : f32
    %208 = vector.broadcast %cst_85 : f32 to vector<8x128xf32>
    %209 = vector.shape_cast %207 : vector<8x1xi1> to vector<8x1xi1>
    %210 = vector.broadcast %209 : vector<8x1xi1> to vector<8x128xi1>
    %211 = arith.select %210, %204, %208 : vector<8x128xi1>, vector<8x128xf32>
    %212 = arith.index_cast %c1_i32_39 : i32 to index
    %c0_86 = arith.constant 0 : index
    %c0_87 = arith.constant 0 : index
    %213 = vector.load %arg3[%212, %c0_86, %c0_87] : memref<3x8x128xf32, #tpu.memory_space<vmem>>, vector<1x8x128xf32>
    %214 = vector.shape_cast %213 : vector<1x8x128xf32> to vector<8x128xf32>
    %215 = vector.shape_cast %211 : vector<8x128xf32> to vector<1x8x128xf32>
    tpu.vector_store %arg3[%212, %c0_86, %c0_87], %215 {strides = array<i32>} : memref<3x8x128xf32, #tpu.memory_space<vmem>>, vector<1x8x128xf32>,
    %c2_i32_88 = arith.constant 2 : i32
    %216 = arith.index_cast %c2_i32_88 : i32 to index
    %c0_89 = arith.constant 0 : index
    %c0_90 = arith.constant 0 : index
    %217 = vector.load %arg1[%216, %c0_89, %c0_90] : memref<3x64x128xf32, #tpu.memory_space<vmem>>, vector<1x64x128xf32>
    %218 = vector.shape_cast %217 : vector<1x64x128xf32> to vector<64x128xf32>
    %219 = arith.index_cast %c2_i32_88 : i32 to index
    %c0_91 = arith.constant 0 : index
    %c0_92 = arith.constant 0 : index
    %220 = vector.load %arg2[%219, %c0_91, %c0_92] : memref<3x64x1xi32, #tpu.memory_space<vmem>>, vector<1x64x1xi32>
    %221 = vector.shape_cast %220 : vector<1x64x1xi32> to vector<64x1xi32>
    %222 = vector.shape_cast %221 : vector<64x1xi32> to vector<64x1xi32>
    %223 = vector.broadcast %222 : vector<64x1xi32> to vector<64x128xi32>
    %c0_i32_93 = arith.constant 0 : i32
    %224 = vector.broadcast %c0_i32_93 : i32 to vector<64x128xi32>
    %225 = arith.cmpi eq, %223, %224 : vector<64x128xi32>
    %cst_94 = arith.constant -3.40282347E+38 : f32
    %226 = vector.broadcast %cst_94 : f32 to vector<64x128xf32>
    %227 = arith.select %225, %218, %226 : vector<64x128xi1>, vector<64x128xf32>
    %cst_95 = arith.constant dense<0xFF800000> : vector<128xf32>
    %228 = vector.multi_reduction <maximumf>, %227, %cst_95 [0] : vector<64x128xf32> to vector<128xf32>
    %229 = vector.shape_cast %228 : vector<128xf32> to vector<1x128xf32>
    %c0_i32_96 = arith.constant 0 : i32
    %230 = vector.broadcast %c0_i32_96 : i32 to vector<64x1xi32>
    %231 = arith.cmpi eq, %221, %230 : vector<64x1xi32>
    %232 = arith.extui %231 : vector<64x1xi1> to vector<64x1xi32>
    %cst_97 = arith.constant dense<-2147483648> : vector<1xi32>
    %233 = vector.multi_reduction <maxsi>, %232, %cst_97 [0] : vector<64x1xi32> to vector<1xi32>
    %234 = vector.shape_cast %233 : vector<1xi32> to vector<1x1xi32>
    %c1_i32_98 = arith.constant 1 : i32
    %235 = vector.broadcast %c1_i32_98 : i32 to vector<64x128xi32>
    %236 = arith.cmpi eq, %223, %235 : vector<64x128xi32>
    %cst_99 = arith.constant -3.40282347E+38 : f32
    %237 = vector.broadcast %cst_99 : f32 to vector<64x128xf32>
    %238 = arith.select %236, %218, %237 : vector<64x128xi1>, vector<64x128xf32>
    %cst_100 = arith.constant dense<0xFF800000> : vector<128xf32>
    %239 = vector.multi_reduction <maximumf>, %238, %cst_100 [0] : vector<64x128xf32> to vector<128xf32>
    %240 = vector.shape_cast %239 : vector<128xf32> to vector<1x128xf32>
    %c1_i32_101 = arith.constant 1 : i32
    %241 = vector.broadcast %c1_i32_101 : i32 to vector<64x1xi32>
    %242 = arith.cmpi eq, %221, %241 : vector<64x1xi32>
    %243 = arith.extui %242 : vector<64x1xi1> to vector<64x1xi32>
    %cst_102 = arith.constant dense<-2147483648> : vector<1xi32>
    %244 = vector.multi_reduction <maxsi>, %243, %cst_102 [0] : vector<64x1xi32> to vector<1xi32>
    %245 = vector.shape_cast %244 : vector<1xi32> to vector<1x1xi32>
    %c2_i32_103 = arith.constant 2 : i32
    %246 = vector.broadcast %c2_i32_103 : i32 to vector<64x128xi32>
    %247 = arith.cmpi eq, %223, %246 : vector<64x128xi32>
    %cst_104 = arith.constant -3.40282347E+38 : f32
    %248 = vector.broadcast %cst_104 : f32 to vector<64x128xf32>
    %249 = arith.select %247, %218, %248 : vector<64x128xi1>, vector<64x128xf32>
    %cst_105 = arith.constant dense<0xFF800000> : vector<128xf32>
    %250 = vector.multi_reduction <maximumf>, %249, %cst_105 [0] : vector<64x128xf32> to vector<128xf32>
    %251 = vector.shape_cast %250 : vector<128xf32> to vector<1x128xf32>
    %c2_i32_106 = arith.constant 2 : i32
    %252 = vector.broadcast %c2_i32_106 : i32 to vector<64x1xi32>
    %253 = arith.cmpi eq, %221, %252 : vector<64x1xi32>
    %254 = arith.extui %253 : vector<64x1xi1> to vector<64x1xi32>
    %cst_107 = arith.constant dense<-2147483648> : vector<1xi32>
    %255 = vector.multi_reduction <maxsi>, %254, %cst_107 [0] : vector<64x1xi32> to vector<1xi32>
    %256 = vector.shape_cast %255 : vector<1xi32> to vector<1x1xi32>
    %c3_i32_108 = arith.constant 3 : i32
    %257 = vector.broadcast %c3_i32_108 : i32 to vector<64x128xi32>
    %258 = arith.cmpi eq, %223, %257 : vector<64x128xi32>
    %cst_109 = arith.constant -3.40282347E+38 : f32
    %259 = vector.broadcast %cst_109 : f32 to vector<64x128xf32>
    %260 = arith.select %258, %218, %259 : vector<64x128xi1>, vector<64x128xf32>
    %cst_110 = arith.constant dense<0xFF800000> : vector<128xf32>
    %261 = vector.multi_reduction <maximumf>, %260, %cst_110 [0] : vector<64x128xf32> to vector<128xf32>
    %262 = vector.shape_cast %261 : vector<128xf32> to vector<1x128xf32>
    %c3_i32_111 = arith.constant 3 : i32
    %263 = vector.broadcast %c3_i32_111 : i32 to vector<64x1xi32>
    %264 = arith.cmpi eq, %221, %263 : vector<64x1xi32>
    %265 = arith.extui %264 : vector<64x1xi1> to vector<64x1xi32>
    %cst_112 = arith.constant dense<-2147483648> : vector<1xi32>
    %266 = vector.multi_reduction <maxsi>, %265, %cst_112 [0] : vector<64x1xi32> to vector<1xi32>
    %267 = vector.shape_cast %266 : vector<1xi32> to vector<1x1xi32>
    %c4_i32_113 = arith.constant 4 : i32
    %268 = vector.broadcast %c4_i32_113 : i32 to vector<64x128xi32>
    %269 = arith.cmpi eq, %223, %268 : vector<64x128xi32>
    %cst_114 = arith.constant -3.40282347E+38 : f32
    %270 = vector.broadcast %cst_114 : f32 to vector<64x128xf32>
    %271 = arith.select %269, %218, %270 : vector<64x128xi1>, vector<64x128xf32>
    %cst_115 = arith.constant dense<0xFF800000> : vector<128xf32>
    %272 = vector.multi_reduction <maximumf>, %271, %cst_115 [0] : vector<64x128xf32> to vector<128xf32>
    %273 = vector.shape_cast %272 : vector<128xf32> to vector<1x128xf32>
    %c4_i32_116 = arith.constant 4 : i32
    %274 = vector.broadcast %c4_i32_116 : i32 to vector<64x1xi32>
    %275 = arith.cmpi eq, %221, %274 : vector<64x1xi32>
    %276 = arith.extui %275 : vector<64x1xi1> to vector<64x1xi32>
    %cst_117 = arith.constant dense<-2147483648> : vector<1xi32>
    %277 = vector.multi_reduction <maxsi>, %276, %cst_117 [0] : vector<64x1xi32> to vector<1xi32>
    %278 = vector.shape_cast %277 : vector<1xi32> to vector<1x1xi32>
    %c5_i32_118 = arith.constant 5 : i32
    %279 = vector.broadcast %c5_i32_118 : i32 to vector<64x128xi32>
    %280 = arith.cmpi eq, %223, %279 : vector<64x128xi32>
    %cst_119 = arith.constant -3.40282347E+38 : f32
    %281 = vector.broadcast %cst_119 : f32 to vector<64x128xf32>
    %282 = arith.select %280, %218, %281 : vector<64x128xi1>, vector<64x128xf32>
    %cst_120 = arith.constant dense<0xFF800000> : vector<128xf32>
    %283 = vector.multi_reduction <maximumf>, %282, %cst_120 [0] : vector<64x128xf32> to vector<128xf32>
    %284 = vector.shape_cast %283 : vector<128xf32> to vector<1x128xf32>
    %c5_i32_121 = arith.constant 5 : i32
    %285 = vector.broadcast %c5_i32_121 : i32 to vector<64x1xi32>
    %286 = arith.cmpi eq, %221, %285 : vector<64x1xi32>
    %287 = arith.extui %286 : vector<64x1xi1> to vector<64x1xi32>
    %cst_122 = arith.constant dense<-2147483648> : vector<1xi32>
    %288 = vector.multi_reduction <maxsi>, %287, %cst_122 [0] : vector<64x1xi32> to vector<1xi32>
    %289 = vector.shape_cast %288 : vector<1xi32> to vector<1x1xi32>
    %c6_i32_123 = arith.constant 6 : i32
    %290 = vector.broadcast %c6_i32_123 : i32 to vector<64x128xi32>
    %291 = arith.cmpi eq, %223, %290 : vector<64x128xi32>
    %cst_124 = arith.constant -3.40282347E+38 : f32
    %292 = vector.broadcast %cst_124 : f32 to vector<64x128xf32>
    %293 = arith.select %291, %218, %292 : vector<64x128xi1>, vector<64x128xf32>
    %cst_125 = arith.constant dense<0xFF800000> : vector<128xf32>
    %294 = vector.multi_reduction <maximumf>, %293, %cst_125 [0] : vector<64x128xf32> to vector<128xf32>
    %295 = vector.shape_cast %294 : vector<128xf32> to vector<1x128xf32>
    %c6_i32_126 = arith.constant 6 : i32
    %296 = vector.broadcast %c6_i32_126 : i32 to vector<64x1xi32>
    %297 = arith.cmpi eq, %221, %296 : vector<64x1xi32>
    %298 = arith.extui %297 : vector<64x1xi1> to vector<64x1xi32>
    %cst_127 = arith.constant dense<-2147483648> : vector<1xi32>
    %299 = vector.multi_reduction <maxsi>, %298, %cst_127 [0] : vector<64x1xi32> to vector<1xi32>
    %300 = vector.shape_cast %299 : vector<1xi32> to vector<1x1xi32>
    %c7_i32_128 = arith.constant 7 : i32
    %301 = vector.broadcast %c7_i32_128 : i32 to vector<64x128xi32>
    %302 = arith.cmpi eq, %223, %301 : vector<64x128xi32>
    %cst_129 = arith.constant -3.40282347E+38 : f32
    %303 = vector.broadcast %cst_129 : f32 to vector<64x128xf32>
    %304 = arith.select %302, %218, %303 : vector<64x128xi1>, vector<64x128xf32>
    %cst_130 = arith.constant dense<0xFF800000> : vector<128xf32>
    %305 = vector.multi_reduction <maximumf>, %304, %cst_130 [0] : vector<64x128xf32> to vector<128xf32>
    %306 = vector.shape_cast %305 : vector<128xf32> to vector<1x128xf32>
    %c7_i32_131 = arith.constant 7 : i32
    %307 = vector.broadcast %c7_i32_131 : i32 to vector<64x1xi32>
    %308 = arith.cmpi eq, %221, %307 : vector<64x1xi32>
    %309 = arith.extui %308 : vector<64x1xi1> to vector<64x1xi32>
    %cst_132 = arith.constant dense<-2147483648> : vector<1xi32>
    %310 = vector.multi_reduction <maxsi>, %309, %cst_132 [0] : vector<64x1xi32> to vector<1xi32>
    %311 = vector.shape_cast %310 : vector<1xi32> to vector<1x1xi32>
    %312 = tpu.concatenate %229, %240, %251, %262, %273, %284, %295, %306 in 0 : vector<1x128xf32>, vector<1x128xf32>, vector<1x128xf32>, vector<1x128xf32>, vector<1x128xf32>, vector<1x128xf32>, vector<1x128xf32>, vector<1x128xf32> -> vector<8x128xf32>
    %313 = tpu.concatenate %234, %245, %256, %267, %278, %289, %300, %311 in 0 : vector<1x1xi32>, vector<1x1xi32>, vector<1x1xi32>, vector<1x1xi32>, vector<1x1xi32>, vector<1x1xi32>, vector<1x1xi32>, vector<1x1xi32> -> vector<8x1xi32>
    %c0_i32_133 = arith.constant 0 : i32
    %314 = vector.broadcast %c0_i32_133 : i32 to vector<8x1xi32>
    %315 = arith.cmpi sgt, %313, %314 : vector<8x1xi32>
    %cst_134 = arith.constant 0.000000e+00 : f32
    %316 = vector.broadcast %cst_134 : f32 to vector<8x128xf32>
    %317 = vector.shape_cast %315 : vector<8x1xi1> to vector<8x1xi1>
    %318 = vector.broadcast %317 : vector<8x1xi1> to vector<8x128xi1>
    %319 = arith.select %318, %312, %316 : vector<8x128xi1>, vector<8x128xf32>
    %320 = arith.index_cast %c2_i32_88 : i32 to index
    %c0_135 = arith.constant 0 : index
    %c0_136 = arith.constant 0 : index
    %321 = vector.load %arg3[%320, %c0_135, %c0_136] : memref<3x8x128xf32, #tpu.memory_space<vmem>>, vector<1x8x128xf32>
    %322 = vector.shape_cast %321 : vector<1x8x128xf32> to vector<8x128xf32>
    %323 = vector.shape_cast %319 : vector<8x128xf32> to vector<1x8x128xf32>
    tpu.vector_store %arg3[%320, %c0_135, %c0_136], %323 {strides = array<i32>} : memref<3x8x128xf32, #tpu.memory_space<vmem>>, vector<1x8x128xf32>,
    %c3_i32_137 = arith.constant 3 : i32
    return
  }
  func.func @transform_0(%arg0: i32) -> (i32, i32, i32) {
    %c0_i32 = arith.constant 0 : i32
    %c0_i32_0 = arith.constant 0 : i32
    %c0_i32_1 = arith.constant 0 : i32
    return %arg0, %c0_i32, %c0_i32_0 : i32, i32, i32
  }
  func.func @transform_1(%arg0: i32) -> (i32, i32, i32) {
    %c0_i32 = arith.constant 0 : i32
    %c0_i32_0 = arith.constant 0 : i32
    %c0_i32_1 = arith.constant 0 : i32
    return %arg0, %c0_i32, %c0_i32_0 : i32, i32, i32
  }
  func.func @transform_2(%arg0: i32) -> (i32, i32, i32) {
    %c0_i32 = arith.constant 0 : i32
    %c0_i32_0 = arith.constant 0 : i32
    %c0_i32_1 = arith.constant 0 : i32
    return %arg0, %c0_i32, %c0_i32_0 : i32, i32, i32
  }
}

</mosaic_0001>

<bundles_post_ra>
// kernel: tpu_custom_call.1
= control target key start
LH: loop header
LB: loop body
LE: loop exit
PB: predicated region body
PF: predicated region fallthrough
CT: control target
= control target key end

     0   :  { %7 = vsyncpa [#allocation3], 0  ;;  %s4631_s0 = inlined_call_operand.vmem [shape: f32[6,64,128], index: 0, kind: input, shape index: {}]   ;;  %s4632_s1 = inlined_call_operand.vmem [shape: s32[6,64,1], index: 1, kind: input, shape index: {}]   ;;  %s4633_s2 = inlined_call_operand.hbm [shape: f32[6,8,128], index: 2, kind: output, shape index: {}]  }
   0x1   :  { %9 = vsyncpa [#allocation3 + $0x1], 0  ;;  %s2485_s9 = smov 0   ;;  %s2487_s10 = smov 0  }
   0x2   :  { %s2489_s11 = smov 0   ;;  %s2491_s12 = smov 0  }
   0x3 LB: > { %s2506_s13 = sadd.s32 4294967295, %s2464_s12   ;;  %s2285_s14 = sadd.s32 4294967294, %s2464_s12   ;;  %s2464_s12 = sphi %s2491_s12, %s4933_s12   ;;  %s2460_s11 = sphi %s2489_s11, %s4932_s11   ;;  %s2456_s10 = sphi %s2487_s10, %s4931_s10   ;;  %s2452_s9 = sphi %s2485_s9, %s4930_s9  }
   0x4   : > { %s2510_s15 = sadd.s32 1, %s2464_s12   ;;  %s74_s16 = sadd.s32 1, %s2460_s11 }
   0x5   : > { %s71_s17 = ssub.s32 %s2464_s12, %s2510_s15  ;;  %p84_p0 = scmp.ne.s32.totalorder %s2460_s11, %s2456_s10 }
   0x6   : > { %p72_p1 = scmp.eq.s32.totalorder %s71_s17, 0  ;;  %p85_p2 = scmp.eq.s32.totalorder %s2506_s13, 1 }
   0x7   : > { %p90_p3 = scmp.ne.s32.totalorder %s2456_s10, %s2452_s9  ;;  %p91_p4 = scmp.eq.s32.totalorder %s2285_s14, 1 }
   0x8   : > { %s2521_s18 = scalar_select %p72_p1, %s2460_s11, %s74_s16  }
   0x9   : > { %p2523_p5 = por %p85_p2, %p84_p0  ;;  %p2527_p6 = por %p91_p4, %p90_p3 }
   0xa   : > { %p2288_p7 = scmp.ge.s32.totalorder %s2464_s12, 1  ;;  %p129_p8 = scmp.lt.s32.totalorder %s2464_s12, 3 }
   0xc   : > { %p130_p9 = pnand %p2288_p7, %p129_p8 }
   0xe   : > { %133 = sbr.rel (%p130_p9) target bundleno = 536 (0x218), region = 28 }
  0x15   : > { %s158_s21 = smul.u32 3, %s2506_s13  ;;  %v2466_v0 = vmov 0   ;;  %vm258_vm4 = vcmask 7168   ;;  %s155_s29 = sand.u32 1, %s2456_s10  }
  0x16   : > { %2377 = vset.pattern.permute.xlu1 %v2466_v0  ;;  %2376 = vset.pattern.permute.xlu0 %v2466_v0  ;;  %s4379_s30 = smul.u32 24, %s155_s29  ;;  %s2467_s16 = smov [#allocation2]  }
  0x17   : > { %p159_p10 = scmp.lt.s32.totalorder %s158_s21, 5  ;;  %s2332_s5 = smul.u32 384, %s2506_s13 }
  0x18   : > { %s4414_s3 = scalar_lea.vmem [#allocation2], %s4379_s30  ;;  %s4590_s13 = scalar_lea.sflag [#allocation3], %s155_s29 }
  0x19   : > { %s4935_s21 = smov (!%p159_p10, %s158_s21), 5  ;;  %s2211_s4 = sshll.u32 %s4414_s3, 4  ;;  %s4579_s4 = int_to_ptr.vmem [resolvable:$true] %s2211_s4 }
  0x1a   : > { %s2330_s22 = sshll.u32 %s4935_s21, 6  ;;  %s4585_s8 = scalar_lea.hbm %s4633_s2, %s2332_s5 }
  0x1b   : > { %s2544_s25 = scalar_lea.vmem %s4632_s1, %s2330_s22  ;;  %s3500_s28 = scalar_lea.vmem %s4631_s0, %s2330_s22 }
  0x1c   : > { %v2547_v1 = vld [vmem:[%s2544_s25 + $0x10] sm:$0xff]  ;;  %v2550_v2 = vld [vmem:[%s2544_s25] sm:$0xff]  ;;  %v2555_v3 = vld [vmem:[%s2544_s25 + $0x18] sm:$0xff]  ;;  %s2402_s14 = scalar_lea.vmem %s4579_s4, 384  ;;  %s2406_s17 = sshll.u32 %s2467_s16, 4  ;;  %s2407_s17 = int_to_ptr.vmem [resolvable:$false] %s2406_s17 }
  0x1d   : > { %196 = vperm.xlu1 %2377, %v2547_v1   ;;  %190 = vperm.xlu0 %2376, %v2550_v2   ;;  %v2558_v4 = vld [vmem:[%s2544_s25 + $0x8] sm:$0xff]  ;;  %v2564_v6 = vld [vmem:[%s2544_s25 + $0x40] sm:$0xff]  ;;  %v2567_v7 = vld [vmem:[%s2544_s25 + $0x58] sm:$0xff]  ;;  %p2403_p11 = scmp.ne.s32.totalorder %s4579_s4, %s2402_s14  ;;  %s2408_s21 = scalar_lea.vmem %s2407_s17, 768 }
  0x1e   : > { %v2561_v5 = vld [vmem:[%s2544_s25 + $0x48] sm:$0xff]  ;;  %v2570_v8 = vld [vmem:[%s2544_s25 + $0x50] sm:$0xff]  ;;  %v2577_v10 = vld [vmem:[%s2544_s25 + $0x60] sm:$0xff]  ;;  %vm922_vm1 = vcmp.eq.s32.totalorder %v2564_v6, 0  ;;  %vm925_vm3 = vcmp.eq.s32.totalorder %v2567_v7, 0  ;;  %vm998_vm14 = vcmp.eq.s32.totalorder %v2564_v6, 1  ;;  %p2409_p0 = scmp.lt.s32.totalorder %s4579_s4, %s2407_s17  ;;  %p2410_p1 = scmp.lt.s32.totalorder %s2408_s21, %s2402_s14 }
  0x1f   : > { %vm923_vm0 = vcmp.eq.s32.totalorder %v2561_v5, 0  ;;  %v2574_v9 = vld [vmem:[%s2544_s25 + $0x68] sm:$0xff]  ;;  %v2580_v11 = vld [vmem:[%s2544_s25 + $0x78] sm:$0xff]  ;;  %vm924_vm2 = vcmp.eq.s32.totalorder %v2570_v8, 0  ;;  %v2588_v12 = vld [vmem:[%s2544_s25 + $0x70] sm:$0xff]  ;;  %vm926_vm5 = vcmp.eq.s32.totalorder %v2577_v10, 0  ;;  %p2404_p12 = pnand %p2403_p11, %p2523_p5 }
  0x20   : > { %vm927_vm6 = vcmp.eq.s32.totalorder %v2574_v9, 0  ;;  %vm929_vm7 = vcmp.eq.s32.totalorder %v2580_v11, 0  ;;  %v2594_v13 = vld [vmem:[%s2544_s25 + $0x28] sm:$0xff]  ;;  %v2597_v14 = vld [vmem:[%s2544_s25 + $0x20] sm:$0xff]  ;;  %vm928_vm8 = vcmp.eq.s32.totalorder %v2588_v12, 0  ;;  %v930_v15 = vsel %vm922_vm1, 1, %v2466_v0  ;;  %p2411_p2 = por %p2410_p1, %p2409_p0 }
  0x21   : > { %199 = vperm.xlu1 %2377, %v2555_v3   ;;  %193 = vperm.xlu0 %2376, %v2558_v4   ;;  %v931_v16 = vsel %vm923_vm0, 1, %v2466_v0  ;;  %v932_v17 = vsel %vm924_vm2, 1, %v2466_v0  ;;  %v933_v18 = vsel %vm925_vm3, 1, %v2466_v0  ;;  %v934_v19 = vsel %vm926_vm5, 1, %v2466_v0  ;;  %v2619_v28 = vld [vmem:[%s2544_s25 + $0x38] sm:$0xff]  ;;  %v2622_v29 = vld [vmem:[%s2544_s25 + $0x30] sm:$0xff]  ;;  %p2405_p13 = pneg %p2404_p12 }
  0x22   : > { %vm999_vm9 = vcmp.eq.s32.totalorder %v2561_v5, 1  ;;  %v935_v20 = vsel %vm927_vm6, 1, %v2466_v0  ;;  %v936_v21 = vsel %vm928_vm8, 1, %v2466_v0  ;;  %v937_v22 = vsel %vm929_vm7, 1, %v2466_v0 }
  0x23   : > { %v938_v23 = vsel %vm258_vm4, %v930_v15, 2147483648  ;;  %v939_v24 = vsel %vm258_vm4, %v931_v16, 2147483648  ;;  %v940_v25 = vsel %vm258_vm4, %v932_v17, 2147483648  ;;  %v941_v26 = vsel %vm258_vm4, %v933_v18, 2147483648  ;;  %p2412_p3 = pnand %p2411_p2, %p2405_p13 }
  0x24   : > { %v942_v27 = vsel %vm258_vm4, %v934_v19, 2147483648  ;;  %v945_v30 = vsel %vm258_vm4, %v935_v20, 2147483648  ;;  %v948_v31 = vsel %vm258_vm4, %v936_v21, 2147483648  ;;  %v951_v32 = vsel %vm258_vm4, %v937_v22, 2147483648 }
  0x25   : > { %205 = vperm.xlu1 %2377, %v2594_v13   ;;  %202 = vperm.xlu0 %2376, %v2597_v14   ;;  %vm943_vm10 = vcmp.gt.s32.totalorder %v938_v23, %v942_v27  ;;  %vm946_vm11 = vcmp.gt.s32.totalorder %v939_v24, %v945_v30  ;;  %vm949_vm12 = vcmp.gt.s32.totalorder %v940_v25, %v948_v31  ;;  %vm1000_vm1 = vcmp.eq.s32.totalorder %v2570_v8, 1 }
  0x26   : > { %v944_v33 = vsel %vm943_vm10, %v938_v23, %v942_v27  ;;  %vm952_vm13 = vcmp.gt.s32.totalorder %v941_v26, %v951_v32  ;;  %v947_v34 = vsel %vm946_vm11, %v939_v24, %v945_v30  ;;  %v950_v35 = vsel %vm949_vm12, %v940_v25, %v948_v31 }
  0x27   : > { %v953_v36 = vsel %vm952_vm13, %v941_v26, %v951_v32  ;;  %vm954_vm15 = vcmp.gt.s32.totalorder %v944_v33, %v947_v34  ;;  %vm1001_vm2 = vcmp.eq.s32.totalorder %v2567_v7, 1  ;;  %vm1002_vm3 = vcmp.eq.s32.totalorder %v2577_v10, 1 }
  0x28   : > { %vm956_vm0 = vcmp.gt.s32.totalorder %v950_v35, %v953_v36  ;;  %v955_v37 = vsel %vm954_vm15, %v944_v33, %v947_v34  ;;  %vm1003_vm5 = vcmp.eq.s32.totalorder %v2574_v9, 1  ;;  %vm1004_vm7 = vcmp.eq.s32.totalorder %v2588_v12, 1 }
  0x29   : > { %211 = vperm.xlu1 %2377, %v2619_v28   ;;  %208 = vperm.xlu0 %2376, %v2622_v29   ;;  %v957_v38 = vsel %vm956_vm0, %v950_v35, %v953_v36  ;;  %vm1005_vm8 = vcmp.eq.s32.totalorder %v2580_v11, 1  ;;  %v1006_v39 = vsel %vm998_vm14, 1, %v2466_v0  ;;  %vm1075_vm10 = vcmp.eq.s32.totalorder %v2561_v5, 2 }
  0x2a   : > { %vm958_vm6 = vcmp.gt.s32.totalorder %v955_v37, %v957_v38  ;;  %v1007_v41 = vsel %vm999_vm9, 1, %v2466_v0  ;;  %v1008_v42 = vsel %vm1000_vm1, 1, %v2466_v0  ;;  %v1009_v43 = vsel %vm1001_vm2, 1, %v2466_v0 }
  0x2b   : > { %v959_v40 = vsel %vm958_vm6, %v955_v37, %v957_v38  ;;  %v1010_v45 = vsel %vm1002_vm3, 1, %v2466_v0  ;;  %v1011_v46 = vsel %vm1003_vm5, 1, %v2466_v0  ;;  %v1012_v47 = vsel %vm1004_vm7, 1, %v2466_v0  ;;  %v2319_v38 = vld [vmem:[%s2544_s25 + $0x88] sm:$0xff] }
  0x2c   : > { %v960_v44 = vrot.slane %v959_v40, 4  ;;  %v1013_v48 = vsel %vm1005_vm8, 1, %v2466_v0  ;;  %v1014_v49 = vsel %vm258_vm4, %v1006_v39, 2147483648  ;;  %v1015_v50 = vsel %vm258_vm4, %v1007_v41, 2147483648  ;;  %v2318_v39 = vld [vmem:[%s2544_s25 + $0x80] sm:$0xff] }
  0x2d   : > { %873 = vperm.xlu1 %2377, %v2561_v5   ;;  %870 = vperm.xlu0 %2376, %v2564_v6   ;;  %v1016_v51 = vsel %vm258_vm4, %v1008_v42, 2147483648  ;;  %v1017_v52 = vsel %vm258_vm4, %v1009_v43, 2147483648  ;;  %v1018_v53 = vsel %vm258_vm4, %v1010_v45, 2147483648  ;;  %v1021_v54 = vsel %vm258_vm4, %v1011_v46, 2147483648 }
  0x2e   : > { %vm961_vm9 = vcmp.gt.s32.totalorder %v959_v40, %v960_v44  ;;  %vm1019_vm11 = vcmp.gt.s32.totalorder %v1014_v49, %v1018_v53  ;;  %vm1022_vm12 = vcmp.gt.s32.totalorder %v1015_v50, %v1021_v54  ;;  %v1024_v56 = vsel %vm258_vm4, %v1012_v47, 2147483648 }
  0x2f   : > { %v962_v55 = vsel %vm961_vm9, %v959_v40, %v960_v44  ;;  %v1020_v58 = vsel %vm1019_vm11, %v1014_v49, %v1018_v53  ;;  %v1023_v59 = vsel %vm1022_vm12, %v1015_v50, %v1021_v54  ;;  %vm1025_vm13 = vcmp.gt.s32.totalorder %v1016_v51, %v1024_v56  ;;  %v2320_v49 = vld [vmem:[%s2544_s25 + $0x90] sm:$0xff] }
  0x30   : > { %v963_v57 = vrot.slane %v962_v55, 2  ;;  %v1026_v60 = vsel %vm1025_vm13, %v1016_v51, %v1024_v56  ;;  %v1027_v61 = vsel %vm258_vm4, %v1013_v48, 2147483648  ;;  %vm1030_vm14 = vcmp.gt.s32.totalorder %v1020_v58, %v1023_v59  ;;  %v2321_v48 = vld [vmem:[%s2544_s25 + $0x98] sm:$0xff] }
  0x31   : > { %879 = vperm.xlu1 %2377, %v2567_v7   ;;  %876 = vperm.xlu0 %2376, %v2570_v8   ;;  %vm1074_vm15 = vcmp.eq.s32.totalorder %v2564_v6, 2  ;;  %vm1028_vm1 = vcmp.gt.s32.totalorder %v1017_v52, %v1027_v61  ;;  %v1031_v62 = vsel %vm1030_vm14, %v1020_v58, %v1023_v59  ;;  %vm1076_vm2 = vcmp.eq.s32.totalorder %v2570_v8, 2  ;;  %v2323_v58 = vld [vmem:[%s2544_s25 + $0xa8] sm:$0xff]  ;;  %v2322_v59 = vld [vmem:[%s2544_s25 + $0xa0] sm:$0xff] }
  0x32   : > { %vm964_vm0 = vcmp.gt.s32.totalorder %v962_v55, %v963_v57  ;;  %v1029_v15 = vsel %vm1028_vm1, %v1017_v52, %v1027_v61  ;;  %vm1077_vm3 = vcmp.eq.s32.totalorder %v2567_v7, 2  ;;  %vm1078_vm5 = vcmp.eq.s32.totalorder %v2577_v10, 2 }
  0x33   : > { %v965_v63 = vsel %vm964_vm0, %v962_v55, %v963_v57  ;;  %vm1032_vm6 = vcmp.gt.s32.totalorder %v1026_v60, %v1029_v15  ;;  %vm1079_vm7 = vcmp.eq.s32.totalorder %v2574_v9, 2  ;;  %vm1080_vm8 = vcmp.eq.s32.totalorder %v2588_v12, 2 }
  0x34   : > { %v966_v16 = vrot.slane %v965_v63, 1  ;;  %v1033_v17 = vsel %vm1032_vm6, %v1026_v60, %v1029_v15  ;;  %vm1081_vm9 = vcmp.eq.s32.totalorder %v2580_v11, 2  ;;  %v1082_v18 = vsel %vm1074_vm15, 1, %v2466_v0 }
  0x35   : > { %885 = vperm.xlu1 %2377, %v2574_v9   ;;  %882 = vperm.xlu0 %2376, %v2577_v10   ;;  %v1083_v19 = vsel %vm1075_vm10, 1, %v2466_v0  ;;  %vm1034_vm12 = vcmp.gt.s32.totalorder %v1031_v62, %v1033_v17  ;;  %v1084_v20 = vsel %vm1076_vm2, 1, %v2466_v0  ;;  %v1085_v21 = vsel %vm1077_vm3, 1, %v2466_v0 }
  0x36   : > { %vm967_vm11 = vcmp.gt.s32.totalorder %v965_v63, %v966_v16  ;;  %v1035_v23 = vsel %vm1034_vm12, %v1031_v62, %v1033_v17  ;;  %v1086_v24 = vsel %vm1078_vm5, 1, %v2466_v0  ;;  %v1087_v25 = vsel %vm1079_vm7, 1, %v2466_v0 }
  0x37   : > { %v2678_v22 = vsel %vm967_vm11, %v965_v63, %v966_v16  ;;  %v1036_v26 = vrot.slane %v1035_v23, 4  ;;  %v1088_v27 = vsel %vm1080_vm8, 1, %v2466_v0  ;;  %v1089_v30 = vsel %vm1081_vm9, 1, %v2466_v0 }
  0x38   : > { %v1090_v31 = vsel %vm258_vm4, %v1082_v18, 2147483648  ;;  %v1091_v32 = vsel %vm258_vm4, %v1083_v19, 2147483648  ;;  %v1092_v33 = vsel %vm258_vm4, %v1084_v20, 2147483648  ;;  %v1093_v34 = vsel %vm258_vm4, %v1085_v21, 2147483648 }
  0x39   : > { %891 = vperm.xlu1 %2377, %v2580_v11   ;;  %888 = vperm.xlu0 %2376, %v2588_v12   ;;  %v1094_v35 = vsel %vm258_vm4, %v1086_v24, 2147483648  ;;  %vm1037_vm10 = vcmp.gt.s32.totalorder %v1035_v23, %v1036_v26  ;;  %v1097_v36 = vsel %vm258_vm4, %v1087_v25, 2147483648  ;;  %v1100_v37 = vsel %vm258_vm4, %v1088_v27, 2147483648  ;;  %v2324_v27 = vld [vmem:[%s2544_s25 + $0xb0] sm:$0xff] }
  0x3a   : > { %vm1095_vm13 = vcmp.gt.s32.totalorder %v1090_v31, %v1094_v35  ;;  %v1038_v40 = vsel %vm1037_vm10, %v1035_v23, %v1036_v26  ;;  %vm1098_vm14 = vcmp.gt.s32.totalorder %v1091_v32, %v1097_v36  ;;  %vm1101_vm15 = vcmp.gt.s32.totalorder %v1092_v33, %v1100_v37  ;;  %v2325_v26 = vld [vmem:[%s2544_s25 + $0xb8] sm:$0xff] }
  0x3b   : > { %v1096_v41 = vsel %vm1095_vm13, %v1090_v31, %v1094_v35  ;;  %v1039_v42 = vrot.slane %v1038_v40, 2  ;;  %v1099_v43 = vsel %vm1098_vm14, %v1091_v32, %v1097_v36  ;;  %v1102_v44 = vsel %vm1101_vm15, %v1092_v33, %v1100_v37 }
  0x3c   : > { %v1103_v45 = vsel %vm258_vm4, %v1089_v30, 2147483648  ;;  %vm1106_vm1 = vcmp.gt.s32.totalorder %v1096_v41, %v1099_v43  ;;  %vm1150_vm2 = vcmp.eq.s32.totalorder %v2564_v6, 3  ;;  %vm1151_vm3 = vcmp.eq.s32.totalorder %v2561_v5, 3 }
  0x3d   : > { %1546 = vperm.xlu1 %2377, %v2319_v38   ;;  %1543 = vperm.xlu0 %2376, %v2318_v39   ;;  %vm1104_vm0 = vcmp.gt.s32.totalorder %v1093_v34, %v1103_v45  ;;  %vm1040_vm5 = vcmp.gt.s32.totalorder %v1038_v40, %v1039_v42  ;;  %v1107_v47 = vsel %vm1106_vm1, %v1096_v41, %v1099_v43  ;;  %vm1152_vm6 = vcmp.eq.s32.totalorder %v2570_v8, 3 }
  0x3e   : > { %v1105_v46 = vsel %vm1104_vm0, %v1093_v34, %v1103_v45  ;;  %v1041_v50 = vsel %vm1040_vm5, %v1038_v40, %v1039_v42  ;;  %vm1153_vm8 = vcmp.eq.s32.totalorder %v2567_v7, 3  ;;  %vm1154_vm9 = vcmp.eq.s32.totalorder %v2577_v10, 3 }
  0x3f   : > { %vm1108_vm7 = vcmp.gt.s32.totalorder %v1102_v44, %v1105_v46  ;;  %v1042_v51 = vrot.slane %v1041_v50, 1  ;;  %vm1155_vm11 = vcmp.eq.s32.totalorder %v2574_v9, 3  ;;  %vm1156_vm12 = vcmp.eq.s32.totalorder %v2588_v12, 3 }
  0x40   : > { %v1109_v52 = vsel %vm1108_vm7, %v1102_v44, %v1105_v46  ;;  %vm1157_vm13 = vcmp.eq.s32.totalorder %v2580_v11, 3  ;;  %v1158_v53 = vsel %vm1150_vm2, 1, %v2466_v0  ;;  %v1159_v54 = vsel %vm1151_vm3, 1, %v2466_v0 }
  0x41   : > { %1552 = vperm.xlu1 %2377, %v2321_v48   ;;  %1549 = vperm.xlu0 %2376, %v2320_v49   ;;  %vm1110_vm10 = vcmp.gt.s32.totalorder %v1107_v47, %v1109_v52  ;;  %vm1043_vm14 = vcmp.gt.s32.totalorder %v1041_v50, %v1042_v51  ;;  %v1160_v56 = vsel %vm1152_vm6, 1, %v2466_v0  ;;  %v1161_v57 = vsel %vm1153_vm8, 1, %v2466_v0 }
  0x42   : > { %v1111_v55 = vsel %vm1110_vm10, %v1107_v47, %v1109_v52  ;;  %v2722_v60 = vsel %vm1043_vm14, %v1041_v50, %v1042_v51  ;;  %v1162_v62 = vsel %vm1154_vm9, 1, %v2466_v0  ;;  %v1163_v63 = vsel %vm1155_vm11, 1, %v2466_v0 }
  0x43   : > { %v1112_v61 = vrot.slane %v1111_v55, 4  ;;  %v1164_v15 = vsel %vm1156_vm12, 1, %v2466_v0  ;;  %v1165_v16 = vsel %vm1157_vm13, 1, %v2466_v0  ;;  %v1166_v17 = vsel %vm258_vm4, %v1158_v53, 2147483648 }
  0x44   : > { %v1167_v18 = vsel %vm258_vm4, %v1159_v54, 2147483648  ;;  %v1168_v19 = vsel %vm258_vm4, %v1160_v56, 2147483648  ;;  %v1169_v20 = vsel %vm258_vm4, %v1161_v57, 2147483648  ;;  %v1170_v21 = vsel %vm258_vm4, %v1162_v62, 2147483648 }
  0x45   : > { %1558 = vperm.xlu1 %2377, %v2323_v58   ;;  %1555 = vperm.xlu0 %2376, %v2322_v59   ;;  %vm1113_vm15 = vcmp.gt.s32.totalorder %v1111_v55, %v1112_v61  ;;  %vm1171_vm0 = vcmp.gt.s32.totalorder %v1166_v17, %v1170_v21  ;;  %v1173_v24 = vsel %vm258_vm4, %v1163_v63, 2147483648  ;;  %v1176_v25 = vsel %vm258_vm4, %v1164_v15, 2147483648 }
  0x46   : > { %v1114_v23 = vsel %vm1113_vm15, %v1111_v55, %v1112_v61  ;;  %v1172_v31 = vsel %vm1171_vm0, %v1166_v17, %v1170_v21  ;;  %vm1174_vm1 = vcmp.gt.s32.totalorder %v1167_v18, %v1173_v24  ;;  %vm1177_vm2 = vcmp.gt.s32.totalorder %v1168_v19, %v1176_v25 }
  0x47   : > { %v1115_v30 = vrot.slane %v1114_v23, 2  ;;  %v1175_v32 = vsel %vm1174_vm1, %v1167_v18, %v1173_v24  ;;  %v1178_v33 = vsel %vm1177_vm2, %v1168_v19, %v1176_v25  ;;  %v1179_v34 = vsel %vm258_vm4, %v1165_v16, 2147483648 }
  0x48   : > { %vm1226_vm3 = vcmp.eq.s32.totalorder %v2564_v6, 4  ;;  %vm1180_vm6 = vcmp.gt.s32.totalorder %v1169_v20, %v1179_v34  ;;  %vm1182_vm7 = vcmp.gt.s32.totalorder %v1172_v31, %v1175_v32  ;;  %vm1227_vm8 = vcmp.eq.s32.totalorder %v2561_v5, 4 }
  0x49   : > { %1564 = vperm.xlu1 %2377, %v2325_v26   ;;  %1561 = vperm.xlu0 %2376, %v2324_v27   ;;  %vm1116_vm5 = vcmp.gt.s32.totalorder %v1114_v23, %v1115_v30  ;;  %v1181_v36 = vsel %vm1180_vm6, %v1169_v20, %v1179_v34  ;;  %v1183_v37 = vsel %vm1182_vm7, %v1172_v31, %v1175_v32  ;;  %vm1228_vm9 = vcmp.eq.s32.totalorder %v2570_v8, 4 }
  0x4a   : > { %v1117_v35 = vsel %vm1116_vm5, %v1114_v23, %v1115_v30  ;;  %vm1184_vm11 = vcmp.gt.s32.totalorder %v1178_v33, %v1181_v36  ;;  %vm1229_vm12 = vcmp.eq.s32.totalorder %v2567_v7, 4  ;;  %vm1230_vm10 = vcmp.eq.s32.totalorder %v2577_v10, 4 }
  0x4b   : > { %v1118_v38 = vrot.slane %v1117_v35, 1  ;;  %v1185_v39 = vsel %vm1184_vm11, %v1178_v33, %v1181_v36  ;;  %vm1231_vm13 = vcmp.eq.s32.totalorder %v2574_v9, 4  ;;  %vm1232_vm14 = vcmp.eq.s32.totalorder %v2588_v12, 4 }
  0x4c   : > { %vm1233_vm15 = vcmp.eq.s32.totalorder %v2580_v11, 4  ;;  %vm1186_vm1 = vcmp.gt.s32.totalorder %v1183_v37, %v1185_v39  ;;  %v1234_v40 = vsel %vm1226_vm3, 1, %v2466_v0  ;;  %v1235_v41 = vsel %vm1227_vm8, 1, %v2466_v0 }
  0x4d   : > { %vm1119_vm0 = vcmp.gt.s32.totalorder %v1117_v35, %v1118_v38  ;;  %v1187_v43 = vsel %vm1186_vm1, %v1183_v37, %v1185_v39  ;;  %v1236_v44 = vsel %vm1228_vm9, 1, %v2466_v0  ;;  %v1237_v45 = vsel %vm1229_vm12, 1, %v2466_v0 }
  0x4e   : > { %v2758_v42 = vsel %vm1119_vm0, %v1117_v35, %v1118_v38  ;;  %v1188_v46 = vrot.slane %v1187_v43, 4  ;;  %v1238_v47 = vsel %vm1230_vm10, 1, %v2466_v0  ;;  %v1239_v48 = vsel %vm1231_vm13, 1, %v2466_v0 }
  0x4f   : > { %v1240_v49 = vsel %vm1232_vm14, 1, %v2466_v0  ;;  %v1241_v50 = vsel %vm1233_vm15, 1, %v2466_v0  ;;  %v1242_v51 = vsel %vm258_vm4, %v1234_v40, 2147483648  ;;  %v1243_v52 = vsel %vm258_vm4, %v1235_v41, 2147483648 }
  0x50   : > { %v1244_v53 = vsel %vm258_vm4, %v1236_v44, 2147483648  ;;  %vm1189_vm2 = vcmp.gt.s32.totalorder %v1187_v43, %v1188_v46  ;;  %v1245_v54 = vsel %vm258_vm4, %v1237_v45, 2147483648  ;;  %v1246_v55 = vsel %vm258_vm4, %v1238_v47, 2147483648 }
  0x51   : > { %v1249_v56 = vsel %vm258_vm4, %v1239_v48, 2147483648  ;;  %v1190_v57 = vsel %vm1189_vm2, %v1187_v43, %v1188_v46  ;;  %vm1247_vm3 = vcmp.gt.s32.totalorder %v1242_v51, %v1246_v55  ;;  %v1252_v58 = vsel %vm258_vm4, %v1240_v49, 2147483648 }
  0x52   : > { %vm1250_vm5 = vcmp.gt.s32.totalorder %v1243_v52, %v1249_v56  ;;  %v1191_v59 = vrot.slane %v1190_v57, 2  ;;  %v1248_v61 = vsel %vm1247_vm3, %v1242_v51, %v1246_v55  ;;  %vm1253_vm6 = vcmp.gt.s32.totalorder %v1244_v53, %v1252_v58 }
  0x53   : > { %v1251_v62 = vsel %vm1250_vm5, %v1243_v52, %v1249_v56  ;;  %v1254_v63 = vsel %vm1253_vm6, %v1244_v53, %v1252_v58  ;;  %v1255_v15 = vsel %vm258_vm4, %v1241_v50, 2147483648  ;;  %vm1302_vm8 = vcmp.eq.s32.totalorder %v2564_v6, 5 }
  0x54   : > { %vm1258_vm7 = vcmp.gt.s32.totalorder %v1248_v61, %v1251_v62  ;;  %vm1192_vm9 = vcmp.gt.s32.totalorder %v1190_v57, %v1191_v59  ;;  %vm1256_vm11 = vcmp.gt.s32.totalorder %v1245_v54, %v1255_v15  ;;  %vm1303_vm12 = vcmp.eq.s32.totalorder %v2561_v5, 5 }
  0x55   : > { %v1259_v16 = vsel %vm1258_vm7, %v1248_v61, %v1251_v62  ;;  %v1193_v17 = vsel %vm1192_vm9, %v1190_v57, %v1191_v59  ;;  %v1257_v18 = vsel %vm1256_vm11, %v1245_v54, %v1255_v15  ;;  %vm1304_vm10 = vcmp.eq.s32.totalorder %v2570_v8, 5 }
  0x56   : > { %vm1305_vm13 = vcmp.eq.s32.totalorder %v2567_v7, 5  ;;  %v1194_v19 = vrot.slane %v1193_v17, 1  ;;  %vm1260_vm14 = vcmp.gt.s32.totalorder %v1254_v63, %v1257_v18  ;;  %vm1306_vm15 = vcmp.eq.s32.totalorder %v2577_v10, 5 }
  0x57   : > { %vm1307_vm0 = vcmp.eq.s32.totalorder %v2574_v9, 5  ;;  %v1261_v20 = vsel %vm1260_vm14, %v1254_v63, %v1257_v18  ;;  %vm1308_vm1 = vcmp.eq.s32.totalorder %v2588_v12, 5  ;;  %vm1309_vm2 = vcmp.eq.s32.totalorder %v2580_v11, 5 }
  0x58   : > { %v1310_v21 = vsel %vm1302_vm8, 1, %v2466_v0  ;;  %vm1195_vm3 = vcmp.gt.s32.totalorder %v1193_v17, %v1194_v19  ;;  %vm1262_vm5 = vcmp.gt.s32.totalorder %v1259_v16, %v1261_v20  ;;  %v1311_v23 = vsel %vm1303_vm12, 1, %v2466_v0 }
  0x59   : > { %v1312_v24 = vsel %vm1304_vm10, 1, %v2466_v0  ;;  %v2787_v25 = vsel %vm1195_vm3, %v1193_v17, %v1194_v19  ;;  %v1263_v26 = vsel %vm1262_vm5, %v1259_v16, %v1261_v20  ;;  %v1313_v27 = vsel %vm1305_vm13, 1, %v2466_v0 }
  0x5a   : > { %v1314_v30 = vsel %vm1306_vm15, 1, %v2466_v0  ;;  %v1264_v31 = vrot.slane %v1263_v26, 4  ;;  %v1315_v32 = vsel %vm1307_vm0, 1, %v2466_v0  ;;  %v1316_v33 = vsel %vm1308_vm1, 1, %v2466_v0 }
  0x5b   : > { %v1317_v34 = vsel %vm1309_vm2, 1, %v2466_v0  ;;  %v1318_v35 = vsel %vm258_vm4, %v1310_v21, 2147483648  ;;  %v1319_v36 = vsel %vm258_vm4, %v1311_v23, 2147483648  ;;  %v1320_v37 = vsel %vm258_vm4, %v1312_v24, 2147483648 }
  0x5c   : > { %v1321_v38 = vsel %vm258_vm4, %v1313_v27, 2147483648  ;;  %vm1265_vm6 = vcmp.gt.s32.totalorder %v1263_v26, %v1264_v31  ;;  %v1322_v39 = vsel %vm258_vm4, %v1314_v30, 2147483648  ;;  %v1325_v40 = vsel %vm258_vm4, %v1315_v32, 2147483648 }
  0x5d   : > { %v1328_v41 = vsel %vm258_vm4, %v1316_v33, 2147483648  ;;  %v1266_v43 = vsel %vm1265_vm6, %v1263_v26, %v1264_v31  ;;  %vm1323_vm7 = vcmp.gt.s32.totalorder %v1318_v35, %v1322_v39  ;;  %vm1326_vm8 = vcmp.gt.s32.totalorder %v1319_v36, %v1325_v40 }
  0x5e   : > { %vm1329_vm9 = vcmp.gt.s32.totalorder %v1320_v37, %v1328_v41  ;;  %v1267_v44 = vrot.slane %v1266_v43, 2  ;;  %v1324_v45 = vsel %vm1323_vm7, %v1318_v35, %v1322_v39  ;;  %v1327_v46 = vsel %vm1326_vm8, %v1319_v36, %v1325_v40 }
  0x5f   : > { %v1330_v47 = vsel %vm1329_vm9, %v1320_v37, %v1328_v41  ;;  %v1331_v48 = vsel %vm258_vm4, %v1317_v34, 2147483648  ;;  %vm1334_vm11 = vcmp.gt.s32.totalorder %v1324_v45, %v1327_v46  ;;  %vm1378_vm12 = vcmp.eq.s32.totalorder %v2564_v6, 6 }
  0x60   : > { %vm1379_vm10 = vcmp.eq.s32.totalorder %v2561_v5, 6  ;;  %vm1268_vm13 = vcmp.gt.s32.totalorder %v1266_v43, %v1267_v44  ;;  %vm1332_vm14 = vcmp.gt.s32.totalorder %v1321_v38, %v1331_v48  ;;  %v1335_v49 = vsel %vm1334_vm11, %v1324_v45, %v1327_v46 }
  0x61   : > { %vm1380_vm15 = vcmp.eq.s32.totalorder %v2570_v8, 6  ;;  %v1269_v50 = vsel %vm1268_vm13, %v1266_v43, %v1267_v44  ;;  %v1333_v51 = vsel %vm1332_vm14, %v1321_v38, %v1331_v48  ;;  %vm1381_vm0 = vcmp.eq.s32.totalorder %v2567_v7, 6 }
  0x62   : > { %vm1382_vm1 = vcmp.eq.s32.totalorder %v2577_v10, 6  ;;  %v1270_v52 = vrot.slane %v1269_v50, 1  ;;  %vm1336_vm2 = vcmp.gt.s32.totalorder %v1330_v47, %v1333_v51  ;;  %vm1383_vm3 = vcmp.eq.s32.totalorder %v2574_v9, 6 }
  0x63   : > { %vm1384_vm5 = vcmp.eq.s32.totalorder %v2588_v12, 6  ;;  %v1337_v53 = vsel %vm1336_vm2, %v1330_v47, %v1333_v51  ;;  %vm1385_vm6 = vcmp.eq.s32.totalorder %v2580_v11, 6  ;;  %v1386_v54 = vsel %vm1378_vm12, 1, %v2466_v0 }
  0x64   : > { %v1387_v55 = vsel %vm1379_vm10, 1, %v2466_v0  ;;  %vm1271_vm7 = vcmp.gt.s32.totalorder %v1269_v50, %v1270_v52  ;;  %vm1338_vm8 = vcmp.gt.s32.totalorder %v1335_v49, %v1337_v53  ;;  %v1388_v56 = vsel %vm1380_vm15, 1, %v2466_v0 }
  0x65   : > { %v1389_v57 = vsel %vm1381_vm0, 1, %v2466_v0  ;;  %v2818_v58 = vsel %vm1271_vm7, %v1269_v50, %v1270_v52  ;;  %v1339_v59 = vsel %vm1338_vm8, %v1335_v49, %v1337_v53  ;;  %v1390_v61 = vsel %vm1382_vm1, 1, %v2466_v0 }
  0x66   : > { %v1391_v62 = vsel %vm1383_vm3, 1, %v2466_v0  ;;  %v1340_v63 = vrot.slane %v1339_v59, 4  ;;  %v1392_v15 = vsel %vm1384_vm5, 1, %v2466_v0  ;;  %v1393_v16 = vsel %vm1385_vm6, 1, %v2466_v0 }
  0x67   : > { %v1394_v17 = vsel %vm258_vm4, %v1386_v54, 2147483648  ;;  %v1395_v18 = vsel %vm258_vm4, %v1387_v55, 2147483648  ;;  %v1396_v19 = vsel %vm258_vm4, %v1388_v56, 2147483648  ;;  %v1397_v20 = vsel %vm258_vm4, %v1389_v57, 2147483648 }
  0x68   : > { %v1398_v21 = vsel %vm258_vm4, %v1390_v61, 2147483648  ;;  %vm1341_vm9 = vcmp.gt.s32.totalorder %v1339_v59, %v1340_v63  ;;  %v1401_v23 = vsel %vm258_vm4, %v1391_v62, 2147483648  ;;  %v1404_v24 = vsel %vm258_vm4, %v1392_v15, 2147483648 }
  0x69   : > { %vm1399_vm11 = vcmp.gt.s32.totalorder %v1394_v17, %v1398_v21  ;;  %v1342_v26 = vsel %vm1341_vm9, %v1339_v59, %v1340_v63  ;;  %vm1402_vm12 = vcmp.gt.s32.totalorder %v1395_v18, %v1401_v23  ;;  %vm1405_vm10 = vcmp.gt.s32.totalorder %v1396_v19, %v1404_v24 }
  0x6a   : > { %v1400_v27 = vsel %vm1399_vm11, %v1394_v17, %v1398_v21  ;;  %v1343_v30 = vrot.slane %v1342_v26, 2  ;;  %v1403_v31 = vsel %vm1402_vm12, %v1395_v18, %v1401_v23  ;;  %v1406_v32 = vsel %vm1405_vm10, %v1396_v19, %v1404_v24 }
  0x6b   : > { %v1407_v33 = vsel %vm258_vm4, %v1393_v16, 2147483648  ;;  %vm1410_vm15 = vcmp.gt.s32.totalorder %v1400_v27, %v1403_v31  ;;  %vm1454_vm0 = vcmp.eq.s32.totalorder %v2564_v6, 7  ;;  %vm1455_vm1 = vcmp.eq.s32.totalorder %v2561_v5, 7 }
  0x6c   : > { %vm1408_vm14 = vcmp.gt.s32.totalorder %v1397_v20, %v1407_v33  ;;  %vm1344_vm3 = vcmp.gt.s32.totalorder %v1342_v26, %v1343_v30  ;;  %v1411_v35 = vsel %vm1410_vm15, %v1400_v27, %v1403_v31  ;;  %vm1456_vm5 = vcmp.eq.s32.totalorder %v2570_v8, 7 }
  0x6d   : > { %v1409_v34 = vsel %vm1408_vm14, %v1397_v20, %v1407_v33  ;;  %vm4715_vm6 = vcmask 1042432   ;;  %v1345_v36 = vsel %vm1344_vm3, %v1342_v26, %v1343_v30  ;;  %vm1457_vm8 = vcmp.eq.s32.totalorder %v2567_v7, 7 }
  0x6e   : > { %vm1412_vm7 = vcmp.gt.s32.totalorder %v1406_v32, %v1409_v34  ;;  %vm1458_vm9 = vcmp.eq.s32.totalorder %v2577_v10, 7  ;;  %vm4636_vm11 = vcmask 1043456   ;;  %v1346_v37 = vrot.slane %v1345_v36, 1 }
  0x6f   : > { %v1413_v38 = vsel %vm1412_vm7, %v1406_v32, %v1409_v34  ;;  %vm1459_vm12 = vcmp.eq.s32.totalorder %v2574_v9, 7  ;;  %vm1460_vm10 = vcmp.eq.s32.totalorder %v2588_v12, 7  ;;  %vm4634_vm2 = vcmask 1044480  }
  0x70   : > { %vm1414_vm13 = vcmp.gt.s32.totalorder %v1411_v35, %v1413_v38  ;;  %vm1461_vm14 = vcmp.eq.s32.totalorder %v2580_v11, 7  ;;  %v1462_v39 = vsel %vm1454_vm0, 1, %v2466_v0  ;;  %v1463_v40 = vsel %vm1455_vm1, 1, %v2466_v0 }
  0x71   : > { %vm242_vm15 = vcmp.eq.s32.totalorder %v2550_v2, 0  ;;  %vm1347_vm3 = vcmp.gt.s32.totalorder %v1345_v36, %v1346_v37  ;;  %v1415_v41 = vsel %vm1414_vm13, %v1411_v35, %v1413_v38  ;;  %v1464_v43 = vsel %vm1456_vm5, 1, %v2466_v0 }
  0x72   : > { %v1465_v44 = vsel %vm1457_vm8, 1, %v2466_v0  ;;  %vm243_vm7 = vcmp.eq.s32.totalorder %v2558_v4, 0  ;;  %vm244_vm0 = vcmp.eq.s32.totalorder %v2547_v1, 0  ;;  %v1348_v6 = vsel %vm1347_vm3, %v1345_v36, %v1346_v37 }
  0x73   : > { %v1416_v45 = vrot.slane %v1415_v41, 4  ;;  %v1466_v5 = vsel %vm1458_vm9, 1, %v2466_v0  ;;  %v1467_v46 = vsel %vm1459_vm12, 1, %v2466_v0  ;;  %vm245_vm13 = vcmp.eq.s32.totalorder %v2555_v3, 0 }
  0x74   : > { %v1468_v7 = vsel %vm1460_vm10, 1, %v2466_v0  ;;  %v1469_v8 = vsel %vm1461_vm14, 1, %v2466_v0  ;;  %v1470_v10 = vsel %vm258_vm4, %v1462_v39, 2147483648  ;;  %v1471_v47 = vsel %vm258_vm4, %v1463_v40, 2147483648 }
  0x75   : > { %vm1417_vm9 = vcmp.gt.s32.totalorder %v1415_v41, %v1416_v45  ;;  %v1472_v9 = vsel %vm258_vm4, %v1464_v43, 2147483648  ;;  %v1473_v48 = vsel %vm258_vm4, %v1465_v44, 2147483648  ;;  %v1474_v49 = vsel %vm258_vm4, %v1466_v5, 2147483648 }
  0x76   : > { %v1418_v50 = vsel %vm1417_vm9, %v1415_v41, %v1416_v45  ;;  %vm1475_vm12 = vcmp.gt.s32.totalorder %v1470_v10, %v1474_v49  ;;  %v1477_v12 = vsel %vm258_vm4, %v1467_v46, 2147483648  ;;  %v1480_v11 = vsel %vm258_vm4, %v1468_v7, 2147483648 }
  0x77   : > { %v1419_v51 = vrot.slane %v1418_v50, 2  ;;  %v1476_v52 = vsel %vm1475_vm12, %v1470_v10, %v1474_v49  ;;  %vm1478_vm10 = vcmp.gt.s32.totalorder %v1471_v47, %v1477_v12  ;;  %vm1481_vm14 = vcmp.gt.s32.totalorder %v1472_v9, %v1480_v11 }
  0x78   : > { %v1479_v53 = vsel %vm1478_vm10, %v1471_v47, %v1477_v12  ;;  %v1482_v54 = vsel %vm1481_vm14, %v1472_v9, %v1480_v11  ;;  %v1483_v55 = vsel %vm258_vm4, %v1469_v8, 2147483648  ;;  %vm4718_vm3 = vcmask 1040384  }
  0x79   : > { %v1508_v56 = vsel %vm4718_vm3, %v2678_v22, %v2722_v60  ;;  %vm1420_vm8 = vcmp.gt.s32.totalorder %v1418_v50, %v1419_v51  ;;  %vm1484_vm5 = vcmp.gt.s32.totalorder %v1473_v48, %v1483_v55  ;;  %vm1486_vm9 = vcmp.gt.s32.totalorder %v1476_v52, %v1479_v53 }
  0x7a   : > { %vm4719_vm1 = vcmask 1041408   ;;  %v1421_v59 = vsel %vm1420_vm8, %v1418_v50, %v1419_v51  ;;  %v1485_v61 = vsel %vm1484_vm5, %v1473_v48, %v1483_v55  ;;  %v1487_v62 = vsel %vm1486_vm9, %v1476_v52, %v1479_v53 }
  0x7b   : > { %v1509_v57 = vsel %vm4719_vm1, %v1508_v56, %v2758_v42  ;;  %v1422_v15 = vrot.slane %v1421_v59, 1  ;;  %vm1488_vm12 = vcmp.gt.s32.totalorder %v1482_v54, %v1485_v61  ;;  %vm248_vm10 = vcmp.eq.s32.totalorder %v2622_v29, 0 }
  0x7c   : > { %v1510_v63 = vsel %vm4715_vm6, %v1509_v57, %v2787_v25  ;;  %v1489_v22 = vsel %vm1488_vm12, %v1482_v54, %v1485_v61  ;;  %vm249_vm14 = vcmp.eq.s32.totalorder %v2619_v28, 0  ;;  %v250_v42 = vsel %vm242_vm15, 1, %v2466_v0 }
  0x7d   : > { %v1511_v16 = vsel %vm4636_vm11, %v1510_v63, %v2818_v58  ;;  %vm1423_vm1 = vcmp.gt.s32.totalorder %v1421_v59, %v1422_v15  ;;  %vm1490_vm5 = vcmp.gt.s32.totalorder %v1487_v62, %v1489_v22  ;;  %v251_v25 = vsel %vm243_vm7, 1, %v2466_v0 }
  0x7e   : > { %v1512_v60 = vsel %vm4634_vm2, %v1511_v16, %v1348_v6  ;;  %v252_v58 = vsel %vm244_vm0, 1, %v2466_v0  ;;  %v1424_v17 = vsel %vm1423_vm1, %v1421_v59, %v1422_v15  ;;  %v1491_v18 = vsel %vm1490_vm5, %v1487_v62, %v1489_v22  ;;  %v2950_v16 = vld [vmem:[%s2544_s25] sm:$0xff] }
  0x7f   : > { %v253_v19 = vsel %vm245_vm13, 1, %v2466_v0  ;;  %vm4720_vm8 = vcmp.eq.s32.totalorder %v2597_v14, 0  ;;  %v1492_v21 = vrot.slane %v1491_v18, 4  ;;  %vm4721_vm15 = vcmask 1045504  }
  0x80   : > { %v254_v20 = vsel %vm4720_vm8, 1, %v2466_v0  ;;  %v1513_v23 = vsel %vm4721_vm15, %v1512_v60, %v1424_v17  ;;  %vm4722_vm7 = vcmp.eq.s32.totalorder %v2594_v13, 0  ;;  %v256_v26 = vsel %vm248_vm10, 1, %v2466_v0  ;;  %v2958_v17 = vld [vmem:[%s2544_s25 + $0x10] sm:$0xff] }
  0x81   : > { %v255_v24 = vsel %vm4722_vm7, 1, %v2466_v0  ;;  %vm4635_vm0 = vcmask 1046528   ;;  %v257_v27 = vsel %vm249_vm14, 1, %v2466_v0  ;;  %v259_v30 = vsel %vm258_vm4, %v250_v42, 2147483648 }
  0x82   : > { %v260_v31 = vsel %vm258_vm4, %v251_v25, 2147483648  ;;  %v261_v32 = vsel %vm258_vm4, %v252_v58, 2147483648  ;;  %vm1493_vm13 = vcmp.gt.s32.totalorder %v1491_v18, %v1492_v21  ;;  %v262_v33 = vsel %vm258_vm4, %v253_v19, 2147483648  ;;  %v2954_v25 = vld [vmem:[%s2544_s25 + $0x8] sm:$0xff] }
  0x83   : > { %v263_v34 = vsel %vm258_vm4, %v254_v20, 2147483648  ;;  %v266_v35 = vsel %vm258_vm4, %v255_v24, 2147483648  ;;  %v1494_v36 = vsel %vm1493_vm13, %v1491_v18, %v1492_v21  ;;  %v269_v37 = vsel %vm258_vm4, %v256_v26, 2147483648  ;;  %v2962_v18 = vld [vmem:[%s2544_s25 + $0x18] sm:$0xff] }
  0x84   : > { %vm264_vm3 = vcmp.gt.s32.totalorder %v259_v30, %v263_v34  ;;  %vm267_vm9 = vcmp.gt.s32.totalorder %v260_v31, %v266_v35  ;;  %v1495_v38 = vrot.slane %v1494_v36, 2  ;;  %vm270_vm12 = vcmp.gt.s32.totalorder %v261_v32, %v269_v37 }
  0x85   : > { %v265_v39 = vsel %vm264_vm3, %v259_v30, %v263_v34  ;;  %v268_v40 = vsel %vm267_vm9, %v260_v31, %v266_v35  ;;  %v271_v41 = vsel %vm270_vm12, %v261_v32, %v269_v37  ;;  %v272_v43 = vsel %vm258_vm4, %v257_v27, 2147483648 }
  0x86   : > { %vm275_vm10 = vcmp.gt.s32.totalorder %v265_v39, %v268_v40  ;;  %vm319_vm14 = vcmp.eq.s32.totalorder %v2550_v2, 1  ;;  %vm1496_vm1 = vcmp.gt.s32.totalorder %v1494_v36, %v1495_v38  ;;  %vm273_vm5 = vcmp.gt.s32.totalorder %v262_v33, %v272_v43 }
  0x87   : > { %v276_v44 = vsel %vm275_vm10, %v265_v39, %v268_v40  ;;  %vm320_vm8 = vcmp.eq.s32.totalorder %v2558_v4, 1  ;;  %v1497_v6 = vsel %vm1496_vm1, %v1494_v36, %v1495_v38  ;;  %v274_v45 = vsel %vm273_vm5, %v262_v33, %v272_v43 }
  0x88   : > { %vm321_vm15 = vcmp.eq.s32.totalorder %v2547_v1, 1  ;;  %vm322_vm7 = vcmp.eq.s32.totalorder %v2555_v3, 1  ;;  %v1498_v5 = vrot.slane %v1497_v6, 1  ;;  %vm277_vm13 = vcmp.gt.s32.totalorder %v271_v41, %v274_v45 }
  0x89   : > { %vm323_vm3 = vcmp.eq.s32.totalorder %v2597_v14, 1  ;;  %vm324_vm9 = vcmp.eq.s32.totalorder %v2594_v13, 1  ;;  %v278_v46 = vsel %vm277_vm13, %v271_v41, %v274_v45  ;;  %vm325_vm12 = vcmp.eq.s32.totalorder %v2622_v29, 1 }
  0x8a   : > { %vm326_vm2 = vcmp.eq.s32.totalorder %v2619_v28, 1  ;;  %v327_v4 = vsel %vm319_vm14, 1, %v2466_v0  ;;  %vm1499_vm10 = vcmp.gt.s32.totalorder %v1497_v6, %v1498_v5  ;;  %vm279_vm1 = vcmp.gt.s32.totalorder %v276_v44, %v278_v46 }
  0x8b   : > { %v328_v1 = vsel %vm320_vm8, 1, %v2466_v0  ;;  %v329_v3 = vsel %vm321_vm15, 1, %v2466_v0  ;;  %v1500_v7 = vsel %vm1499_vm10, %v1497_v6, %v1498_v5  ;;  %v280_v8 = vsel %vm279_vm1, %v276_v44, %v278_v46 }
  0x8c   : > { %v330_v10 = vsel %vm322_vm7, 1, %v2466_v0  ;;  %v331_v47 = vsel %vm323_vm3, 1, %v2466_v0  ;;  %v1514_v9 = vsel %vm4635_vm0, %v1513_v23, %v1500_v7  ;;  %v281_v48 = vrot.slane %v280_v8, 4  ;;  %v3004_v7 = vld [vmem:[%s2544_s25 + $0x30] sm:$0xff] }
  0x8d   : > { %v332_v49 = vsel %vm324_vm9, 1, %v2466_v0  ;;  %v333_v2 = vsel %vm325_vm12, 1, %v2466_v0  ;;  %vm1515_vm14 = vcmp.gt.s32.totalorder %v1514_v9, 0  ;;  %v334_v50 = vsel %vm326_vm2, 1, %v2466_v0 }
  0x8e   : > { %v335_v12 = vsel %vm258_vm4, %v327_v4, 2147483648  ;;  %v336_v11 = vsel %vm258_vm4, %v328_v1, 2147483648  ;;  %v1516_v51 = vsel %vm1515_vm14, 1, %v2466_v0  ;;  %vm282_vm5 = vcmp.gt.s32.totalorder %v280_v8, %v281_v48  ;;  %v2996_v4 = vld [vmem:[%s2544_s25 + $0x20] sm:$0xff] }
  0x8f   : > { %v337_v52 = vsel %vm258_vm4, %v329_v3, 2147483648  ;;  %v338_v53 = vsel %vm258_vm4, %v330_v10, 2147483648  ;;  %1518 = vperm.xlu1 %2377, %v1516_v51   ;;  %v283_v54 = vsel %vm282_vm5, %v280_v8, %v281_v48  ;;  %v339_v55 = vsel %vm258_vm4, %v331_v47, 2147483648  ;;  %v3000_v3 = vld [vmem:[%s2544_s25 + $0x28] sm:$0xff]  ;;  %v3008_v8 = vld [vmem:[%s2544_s25 + $0x38] sm:$0xff] }
  0x90   : > { %v342_v56 = vsel %vm258_vm4, %v332_v49, 2147483648  ;;  %v345_v57 = vsel %vm258_vm4, %v333_v2, 2147483648  ;;  %v284_v59 = vrot.slane %v283_v54, 2  ;;  %vm340_vm2 = vcmp.gt.s32.totalorder %v335_v12, %v339_v55 }
  0x91   : > { %vm343_vm8 = vcmp.gt.s32.totalorder %v336_v11, %v342_v56  ;;  %vm346_vm15 = vcmp.gt.s32.totalorder %v337_v52, %v345_v57  ;;  %v341_v61 = vsel %vm340_vm2, %v335_v12, %v339_v55  ;;  %v348_v15 = vsel %vm258_vm4, %v334_v50, 2147483648 }
  0x92   : > { %v344_v62 = vsel %vm343_vm8, %v336_v11, %v342_v56  ;;  %v347_v63 = vsel %vm346_vm15, %v337_v52, %v345_v57  ;;  %vm285_vm7 = vcmp.gt.s32.totalorder %v283_v54, %v284_v59  ;;  %vm349_vm13 = vcmp.gt.s32.totalorder %v338_v53, %v348_v15 }
  0x93   : > { %vm351_vm3 = vcmp.gt.s32.totalorder %v341_v61, %v344_v62  ;;  %vm395_vm9 = vcmp.eq.s32.totalorder %v2950_v16, 2  ;;  %v286_v22 = vsel %vm285_vm7, %v283_v54, %v284_v59  ;;  %v350_v60 = vsel %vm349_vm13, %v338_v53, %v348_v15 }
  0x94   : > { %v352_v42 = vsel %vm351_vm3, %v341_v61, %v344_v62  ;;  %vm396_vm12 = vcmp.eq.s32.totalorder %v2954_v25, 2  ;;  %v287_v58 = vrot.slane %v286_v22, 1  ;;  %vm353_vm10 = vcmp.gt.s32.totalorder %v347_v63, %v350_v60 }
  0x95   : > { %vm397_vm1 = vcmp.eq.s32.totalorder %v2958_v17, 2  ;;  %vm398_vm14 = vcmp.eq.s32.totalorder %v2962_v18, 2  ;;  %v354_v19 = vsel %vm353_vm10, %v347_v63, %v350_v60  ;;  %vm399_vm5 = vcmp.eq.s32.totalorder %v2597_v14, 2 }
  0x96   : > { %vm400_vm2 = vcmp.eq.s32.totalorder %v2594_v13, 2  ;;  %vm401_vm8 = vcmp.eq.s32.totalorder %v2622_v29, 2  ;;  %vm288_vm15 = vcmp.gt.s32.totalorder %v286_v22, %v287_v58  ;;  %vm355_vm7 = vcmp.gt.s32.totalorder %v352_v42, %v354_v19 }
  0x97   : > { %vm402_vm13 = vcmp.eq.s32.totalorder %v2619_v28, 2  ;;  %v403_v20 = vsel %vm395_vm9, 1, %v2466_v0  ;;  %v2972_v21 = vsel %vm288_vm15, %v286_v22, %v287_v58  ;;  %v356_v23 = vsel %vm355_vm7, %v352_v42, %v354_v19 }
  0x98   : > { %v404_v24 = vsel %vm396_vm12, 1, %v2466_v0  ;;  %v405_v14 = vsel %vm397_vm1, 1, %v2466_v0  ;;  %v357_v13 = vrot.slane %v356_v23, 4  ;;  %v406_v29 = vsel %vm398_vm14, 1, %v2466_v0 }
  0x99   : > { %v407_v26 = vsel %vm399_vm5, 1, %v2466_v0  ;;  %v408_v28 = vsel %vm400_vm2, 1, %v2466_v0  ;;  %v409_v27 = vsel %vm401_vm8, 1, %v2466_v0  ;;  %v410_v30 = vsel %vm402_vm13, 1, %v2466_v0 }
  0x9a   : > { %v411_v31 = vsel %vm258_vm4, %v403_v20, 2147483648  ;;  %v412_v32 = vsel %vm258_vm4, %v404_v24, 2147483648  ;;  %vm358_vm3 = vcmp.gt.s32.totalorder %v356_v23, %v357_v13  ;;  %v413_v33 = vsel %vm258_vm4, %v405_v14, 2147483648 }
  0x9b   : > { %v414_v34 = vsel %vm258_vm4, %v406_v29, 2147483648  ;;  %v415_v35 = vsel %vm258_vm4, %v407_v26, 2147483648  ;;  %v359_v36 = vsel %vm358_vm3, %v356_v23, %v357_v13  ;;  %v418_v37 = vsel %vm258_vm4, %v408_v28, 2147483648 }
  0x9c   : > { %vm416_vm9 = vcmp.gt.s32.totalorder %v411_v31, %v415_v35  ;;  %v421_v38 = vsel %vm258_vm4, %v409_v27, 2147483648  ;;  %v360_v39 = vrot.slane %v359_v36, 2  ;;  %vm419_vm12 = vcmp.gt.s32.totalorder %v412_v32, %v418_v37 }
  0x9d   : > { %v417_v40 = vsel %vm416_vm9, %v411_v31, %v415_v35  ;;  %vm422_vm10 = vcmp.gt.s32.totalorder %v413_v33, %v421_v38  ;;  %v420_v41 = vsel %vm419_vm12, %v412_v32, %v418_v37  ;;  %v424_v44 = vsel %vm258_vm4, %v410_v30, 2147483648 }
  0x9e   : > { %v423_v43 = vsel %vm422_vm10, %v413_v33, %v421_v38  ;;  %vm471_vm1 = vcmp.eq.s32.totalorder %v2950_v16, 3  ;;  %vm361_vm14 = vcmp.gt.s32.totalorder %v359_v36, %v360_v39  ;;  %vm425_vm5 = vcmp.gt.s32.totalorder %v414_v34, %v424_v44 }
  0x9f   : > { %vm427_vm2 = vcmp.gt.s32.totalorder %v417_v40, %v420_v41  ;;  %vm472_vm8 = vcmp.eq.s32.totalorder %v2954_v25, 3  ;;  %v362_v6 = vsel %vm361_vm14, %v359_v36, %v360_v39  ;;  %v426_v45 = vsel %vm425_vm5, %v414_v34, %v424_v44 }
  0xa0   : > { %v428_v5 = vsel %vm427_vm2, %v417_v40, %v420_v41  ;;  %vm473_vm15 = vcmp.eq.s32.totalorder %v2958_v17, 3  ;;  %v363_v46 = vrot.slane %v362_v6, 1  ;;  %vm429_vm7 = vcmp.gt.s32.totalorder %v423_v43, %v426_v45 }
  0xa1   : > { %vm474_vm13 = vcmp.eq.s32.totalorder %v2962_v18, 3  ;;  %vm475_vm3 = vcmp.eq.s32.totalorder %v2996_v4, 3  ;;  %v430_v1 = vsel %vm429_vm7, %v423_v43, %v426_v45  ;;  %vm476_vm9 = vcmp.eq.s32.totalorder %v3000_v3, 3 }
  0xa2   : > { %vm477_vm12 = vcmp.eq.s32.totalorder %v3004_v7, 3  ;;  %vm478_vm10 = vcmp.eq.s32.totalorder %v3008_v8, 3  ;;  %vm364_vm14 = vcmp.gt.s32.totalorder %v362_v6, %v363_v46  ;;  %vm431_vm5 = vcmp.gt.s32.totalorder %v428_v5, %v430_v1 }
  0xa3   : > { %v479_v10 = vsel %vm471_vm1, 1, %v2466_v0  ;;  %v480_v47 = vsel %vm472_vm8, 1, %v2466_v0  ;;  %v3017_v9 = vsel %vm364_vm14, %v362_v6, %v363_v46  ;;  %v432_v48 = vsel %vm431_vm5, %v428_v5, %v430_v1 }
  0xa4   : > { %v481_v49 = vsel %vm473_vm15, 1, %v2466_v0  ;;  %v482_v2 = vsel %vm474_vm13, 1, %v2466_v0  ;;  %v433_v50 = vrot.slane %v432_v48, 4  ;;  %v483_v12 = vsel %vm475_vm3, 1, %v2466_v0 }
  0xa5   : > { %v484_v11 = vsel %vm476_vm9, 1, %v2466_v0  ;;  %v485_v51 = vsel %vm477_vm12, 1, %v2466_v0  ;;  %v486_v52 = vsel %vm478_vm10, 1, %v2466_v0  ;;  %v487_v53 = vsel %vm258_vm4, %v479_v10, 2147483648 }
  0xa6   : > { %v488_v54 = vsel %vm258_vm4, %v480_v47, 2147483648  ;;  %v489_v55 = vsel %vm258_vm4, %v481_v49, 2147483648  ;;  %vm434_vm1 = vcmp.gt.s32.totalorder %v432_v48, %v433_v50  ;;  %v490_v56 = vsel %vm258_vm4, %v482_v2, 2147483648 }
  0xa7   : > { %v491_v57 = vsel %vm258_vm4, %v483_v12, 2147483648  ;;  %v494_v59 = vsel %vm258_vm4, %v484_v11, 2147483648  ;;  %v435_v61 = vsel %vm434_vm1, %v432_v48, %v433_v50  ;;  %v497_v62 = vsel %vm258_vm4, %v485_v51, 2147483648 }
  0xa8   : > { %vm492_vm2 = vcmp.gt.s32.totalorder %v487_v53, %v491_v57  ;;  %vm495_vm8 = vcmp.gt.s32.totalorder %v488_v54, %v494_v59  ;;  %v436_v63 = vrot.slane %v435_v61, 2  ;;  %vm498_vm15 = vcmp.gt.s32.totalorder %v489_v55, %v497_v62 }
  0xa9   : > { %v493_v15 = vsel %vm492_vm2, %v487_v53, %v491_v57  ;;  %v496_v22 = vsel %vm495_vm8, %v488_v54, %v494_v59  ;;  %v499_v60 = vsel %vm498_vm15, %v489_v55, %v497_v62  ;;  %v500_v42 = vsel %vm258_vm4, %v486_v52, 2147483648 }
  0xaa   : > { %vm503_vm7 = vcmp.gt.s32.totalorder %v493_v15, %v496_v22  ;;  %vm547_vm13 = vcmp.eq.s32.totalorder %v2950_v16, 4  ;;  %vm437_vm3 = vcmp.gt.s32.totalorder %v435_v61, %v436_v63  ;;  %vm501_vm9 = vcmp.gt.s32.totalorder %v490_v56, %v500_v42 }
  0xab   : > { %v504_v58 = vsel %vm503_vm7, %v493_v15, %v496_v22  ;;  %vm548_vm12 = vcmp.eq.s32.totalorder %v2954_v25, 4  ;;  %v438_v19 = vsel %vm437_vm3, %v435_v61, %v436_v63  ;;  %v502_v20 = vsel %vm501_vm9, %v490_v56, %v500_v42 }
  0xac   : > { %vm549_vm10 = vcmp.eq.s32.totalorder %v2958_v17, 4  ;;  %vm550_vm14 = vcmp.eq.s32.totalorder %v2962_v18, 4  ;;  %v439_v23 = vrot.slane %v438_v19, 1  ;;  %vm505_vm5 = vcmp.gt.s32.totalorder %v499_v60, %v502_v20 }
  0xad   : > { %vm551_vm1 = vcmp.eq.s32.totalorder %v2996_v4, 4  ;;  %vm552_vm2 = vcmp.eq.s32.totalorder %v3000_v3, 4  ;;  %v506_v24 = vsel %vm505_vm5, %v499_v60, %v502_v20  ;;  %vm553_vm8 = vcmp.eq.s32.totalorder %v3004_v7, 4 }
  0xae   : > { %vm554_vm15 = vcmp.eq.s32.totalorder %v3008_v8, 4  ;;  %v555_v14 = vsel %vm547_vm13, 1, %v2466_v0  ;;  %vm440_vm7 = vcmp.gt.s32.totalorder %v438_v19, %v439_v23  ;;  %vm507_vm3 = vcmp.gt.s32.totalorder %v504_v58, %v506_v24 }
  0xaf   : > { %v556_v13 = vsel %vm548_vm12, 1, %v2466_v0  ;;  %v557_v29 = vsel %vm549_vm10, 1, %v2466_v0  ;;  %v3052_v26 = vsel %vm440_vm7, %v438_v19, %v439_v23  ;;  %v508_v28 = vsel %vm507_vm3, %v504_v58, %v506_v24 }
  0xb0   : > { %v558_v27 = vsel %vm550_vm14, 1, %v2466_v0  ;;  %v559_v30 = vsel %vm551_vm1, 1, %v2466_v0  ;;  %v509_v31 = vrot.slane %v508_v28, 4  ;;  %v560_v32 = vsel %vm552_vm2, 1, %v2466_v0 }
  0xb1   : > { %v561_v33 = vsel %vm553_vm8, 1, %v2466_v0  ;;  %v562_v34 = vsel %vm554_vm15, 1, %v2466_v0  ;;  %v563_v35 = vsel %vm258_vm4, %v555_v14, 2147483648  ;;  %v564_v36 = vsel %vm258_vm4, %v556_v13, 2147483648 }
  0xb2   : > { %v565_v37 = vsel %vm258_vm4, %v557_v29, 2147483648  ;;  %v566_v38 = vsel %vm258_vm4, %v558_v27, 2147483648  ;;  %vm510_vm13 = vcmp.gt.s32.totalorder %v508_v28, %v509_v31  ;;  %v567_v39 = vsel %vm258_vm4, %v559_v30, 2147483648 }
  0xb3   : > { %v570_v40 = vsel %vm258_vm4, %v560_v32, 2147483648  ;;  %v573_v41 = vsel %vm258_vm4, %v561_v33, 2147483648  ;;  %v511_v43 = vsel %vm510_vm13, %v508_v28, %v509_v31  ;;  %vm568_vm9 = vcmp.gt.s32.totalorder %v563_v35, %v567_v39 }
  0xb4   : > { %vm571_vm12 = vcmp.gt.s32.totalorder %v564_v36, %v570_v40  ;;  %vm574_vm10 = vcmp.gt.s32.totalorder %v565_v37, %v573_v41  ;;  %v512_v44 = vrot.slane %v511_v43, 2  ;;  %v569_v6 = vsel %vm568_vm9, %v563_v35, %v567_v39 }
  0xb5   : > { %v572_v45 = vsel %vm571_vm12, %v564_v36, %v570_v40  ;;  %v575_v5 = vsel %vm574_vm10, %v565_v37, %v573_v41  ;;  %v576_v46 = vsel %vm258_vm4, %v562_v34, 2147483648  ;;  %vm623_vm5 = vcmp.eq.s32.totalorder %v2950_v16, 5 }
  0xb6   : > { %vm579_vm14 = vcmp.gt.s32.totalorder %v569_v6, %v572_v45  ;;  %vm624_vm1 = vcmp.eq.s32.totalorder %v2954_v25, 5  ;;  %vm513_vm2 = vcmp.gt.s32.totalorder %v511_v43, %v512_v44  ;;  %vm577_vm8 = vcmp.gt.s32.totalorder %v566_v38, %v576_v46 }
  0xb7   : > { %v580_v1 = vsel %vm579_vm14, %v569_v6, %v572_v45  ;;  %vm625_vm15 = vcmp.eq.s32.totalorder %v2958_v17, 5  ;;  %v514_v10 = vsel %vm513_vm2, %v511_v43, %v512_v44  ;;  %v578_v47 = vsel %vm577_vm8, %v566_v38, %v576_v46 }
  0xb8   : > { %vm626_vm7 = vcmp.eq.s32.totalorder %v2962_v18, 5  ;;  %vm627_vm3 = vcmp.eq.s32.totalorder %v2996_v4, 5  ;;  %v515_v48 = vrot.slane %v514_v10, 1  ;;  %vm581_vm13 = vcmp.gt.s32.totalorder %v575_v5, %v578_v47 }
  0xb9   : > { %vm628_vm9 = vcmp.eq.s32.totalorder %v3000_v3, 5  ;;  %vm629_vm12 = vcmp.eq.s32.totalorder %v3004_v7, 5  ;;  %v582_v49 = vsel %vm581_vm13, %v575_v5, %v578_v47  ;;  %vm630_vm10 = vcmp.eq.s32.totalorder %v3008_v8, 5 }
  0xba   : > { %v631_v2 = vsel %vm623_vm5, 1, %v2466_v0  ;;  %v632_v50 = vsel %vm624_vm1, 1, %v2466_v0  ;;  %vm516_vm14 = vcmp.gt.s32.totalorder %v514_v10, %v515_v48  ;;  %vm583_vm2 = vcmp.gt.s32.totalorder %v580_v1, %v582_v49 }
  0xbb   : > { %v633_v12 = vsel %vm625_vm15, 1, %v2466_v0  ;;  %v634_v11 = vsel %vm626_vm7, 1, %v2466_v0  ;;  %v3083_v51 = vsel %vm516_vm14, %v514_v10, %v515_v48  ;;  %v584_v52 = vsel %vm583_vm2, %v580_v1, %v582_v49 }
  0xbc   : > { %v635_v53 = vsel %vm627_vm3, 1, %v2466_v0  ;;  %v636_v54 = vsel %vm628_vm9, 1, %v2466_v0  ;;  %v585_v55 = vrot.slane %v584_v52, 4  ;;  %v637_v56 = vsel %vm629_vm12, 1, %v2466_v0 }
  0xbd   : > { %v638_v57 = vsel %vm630_vm10, 1, %v2466_v0  ;;  %v639_v59 = vsel %vm258_vm4, %v631_v2, 2147483648  ;;  %v640_v61 = vsel %vm258_vm4, %v632_v50, 2147483648  ;;  %v641_v62 = vsel %vm258_vm4, %v633_v12, 2147483648 }
  0xbe   : > { %v642_v63 = vsel %vm258_vm4, %v634_v11, 2147483648  ;;  %v643_v15 = vsel %vm258_vm4, %v635_v53, 2147483648  ;;  %vm586_vm5 = vcmp.gt.s32.totalorder %v584_v52, %v585_v55  ;;  %v646_v22 = vsel %vm258_vm4, %v636_v54, 2147483648 }
  0xbf   : > { %vm644_vm1 = vcmp.gt.s32.totalorder %v639_v59, %v643_v15  ;;  %v649_v60 = vsel %vm258_vm4, %v637_v56, 2147483648  ;;  %v587_v42 = vsel %vm586_vm5, %v584_v52, %v585_v55  ;;  %vm647_vm8 = vcmp.gt.s32.totalorder %v640_v61, %v646_v22 }
  0xc0   : > { %v645_v58 = vsel %vm644_vm1, %v639_v59, %v643_v15  ;;  %vm650_vm15 = vcmp.gt.s32.totalorder %v641_v62, %v649_v60  ;;  %v588_v19 = vrot.slane %v587_v42, 2  ;;  %v648_v20 = vsel %vm647_vm8, %v640_v61, %v646_v22 }
  0xc1   : > { %v651_v23 = vsel %vm650_vm15, %v641_v62, %v649_v60  ;;  %v652_v24 = vsel %vm258_vm4, %v638_v57, 2147483648  ;;  %vm655_vm3 = vcmp.gt.s32.totalorder %v645_v58, %v648_v20  ;;  %vm699_vm13 = vcmp.eq.s32.totalorder %v2950_v16, 6 }
  0xc2   : > { %vm653_vm7 = vcmp.gt.s32.totalorder %v642_v63, %v652_v24  ;;  %vm700_vm9 = vcmp.eq.s32.totalorder %v2954_v25, 6  ;;  %vm589_vm12 = vcmp.gt.s32.totalorder %v587_v42, %v588_v19  ;;  %v656_v13 = vsel %vm655_vm3, %v645_v58, %v648_v20 }
  0xc3   : > { %v654_v14 = vsel %vm653_vm7, %v642_v63, %v652_v24  ;;  %vm701_vm10 = vcmp.eq.s32.totalorder %v2958_v17, 6  ;;  %v590_v29 = vsel %vm589_vm12, %v587_v42, %v588_v19  ;;  %vm702_vm2 = vcmp.eq.s32.totalorder %v2962_v18, 6 }
  0xc4   : > { %vm657_vm14 = vcmp.gt.s32.totalorder %v651_v23, %v654_v14  ;;  %vm703_vm5 = vcmp.eq.s32.totalorder %v2996_v4, 6  ;;  %v591_v28 = vrot.slane %v590_v29, 1  ;;  %vm704_vm1 = vcmp.eq.s32.totalorder %v3000_v3, 6 }
  0xc5   : > { %v658_v27 = vsel %vm657_vm14, %v651_v23, %v654_v14  ;;  %vm705_vm8 = vcmp.eq.s32.totalorder %v3004_v7, 6  ;;  %vm706_vm0 = vcmp.eq.s32.totalorder %v3008_v8, 6  ;;  %v707_v30 = vsel %vm699_vm13, 1, %v2466_v0 }
  0xc6   : > { %vm659_vm15 = vcmp.gt.s32.totalorder %v656_v13, %v658_v27  ;;  %v708_v31 = vsel %vm700_vm9, 1, %v2466_v0  ;;  %vm592_vm7 = vcmp.gt.s32.totalorder %v590_v29, %v591_v28  ;;  %v709_v33 = vsel %vm701_vm10, 1, %v2466_v0 }
  0xc7   : > { %v660_v32 = vsel %vm659_vm15, %v656_v13, %v658_v27  ;;  %v710_v34 = vsel %vm702_vm2, 1, %v2466_v0  ;;  %v3113_v35 = vsel %vm592_vm7, %v590_v29, %v591_v28  ;;  %v711_v37 = vsel %vm703_vm5, 1, %v2466_v0 }
  0xc8   : > { %v661_v36 = vrot.slane %v660_v32, 4  ;;  %v712_v38 = vsel %vm704_vm1, 1, %v2466_v0  ;;  %v713_v39 = vsel %vm705_vm8, 1, %v2466_v0  ;;  %v714_v40 = vsel %vm706_vm0, 1, %v2466_v0 }
  0xc9   : > { %v715_v41 = vsel %vm258_vm4, %v707_v30, 2147483648  ;;  %v716_v43 = vsel %vm258_vm4, %v708_v31, 2147483648  ;;  %v717_v44 = vsel %vm258_vm4, %v709_v33, 2147483648  ;;  %v718_v6 = vsel %vm258_vm4, %v710_v34, 2147483648  ;;  %v3163_v30 = vld [vmem:[%s2544_s25 + $0x80] sm:$0xff]  ;;  %v3169_v31 = vld [vmem:[%s2544_s25 + $0x88] sm:$0xff] }
  0xca   : > { %vm662_vm3 = vcmp.gt.s32.totalorder %v660_v32, %v661_v36  ;;  %v719_v45 = vsel %vm258_vm4, %v711_v37, 2147483648  ;;  %v722_v46 = vsel %vm258_vm4, %v712_v38, 2147483648  ;;  %v725_v1 = vsel %vm258_vm4, %v713_v39, 2147483648  ;;  %v3178_v33 = vld [vmem:[%s2544_s25 + $0x98] sm:$0xff]  ;;  %v3182_v34 = vld [vmem:[%s2544_s25 + $0xa0] sm:$0xff]  ;;  %v3190_v38 = vld [vmem:[%s2544_s25 + $0xb0] sm:$0xff] }
  0xcb   : > { %v663_v5 = vsel %vm662_vm3, %v660_v32, %v661_v36  ;;  %vm720_vm13 = vcmp.gt.s32.totalorder %v715_v41, %v719_v45  ;;  %vm723_vm0 = vcmp.gt.s32.totalorder %v716_v43, %v722_v46  ;;  %vm726_vm9 = vcmp.gt.s32.totalorder %v717_v44, %v725_v1  ;;  %v3174_v32 = vld [vmem:[%s2544_s25 + $0x90] sm:$0xff]  ;;  %v3194_v39 = vld [vmem:[%s2544_s25 + $0xb8] sm:$0xff] }
  0xcc   : > { %v664_v10 = vrot.slane %v663_v5, 2  ;;  %v721_v47 = vsel %vm720_vm13, %v715_v41, %v719_v45  ;;  %v724_v48 = vsel %vm723_vm0, %v716_v43, %v722_v46  ;;  %v727_v49 = vsel %vm726_vm9, %v717_v44, %v725_v1 }
  0xcd   : > { %v728_v2 = vsel %vm258_vm4, %v714_v40, 2147483648  ;;  %vm775_vm12 = vcmp.eq.s32.totalorder %v2950_v16, 7  ;;  %vm731_vm2 = vcmp.gt.s32.totalorder %v721_v47, %v724_v48  ;;  %vm776_vm5 = vcmp.eq.s32.totalorder %v2954_v25, 7 }
  0xce   : > { %vm665_vm10 = vcmp.gt.s32.totalorder %v663_v5, %v664_v10  ;;  %vm729_vm14 = vcmp.gt.s32.totalorder %v718_v6, %v728_v2  ;;  %v732_v11 = vsel %vm731_vm2, %v721_v47, %v724_v48  ;;  %vm777_vm1 = vcmp.eq.s32.totalorder %v2958_v17, 7 }
  0xcf   : > { %v666_v50 = vsel %vm665_vm10, %v663_v5, %v664_v10  ;;  %v730_v12 = vsel %vm729_vm14, %v718_v6, %v728_v2  ;;  %vm778_vm15 = vcmp.eq.s32.totalorder %v2962_v18, 7  ;;  %vm779_vm7 = vcmp.eq.s32.totalorder %v2996_v4, 7 }
  0xd0   : > { %v667_v52 = vrot.slane %v666_v50, 1  ;;  %vm733_vm8 = vcmp.gt.s32.totalorder %v727_v49, %v730_v12  ;;  %vm780_vm3 = vcmp.eq.s32.totalorder %v3000_v3, 7  ;;  %vm781_vm13 = vcmp.eq.s32.totalorder %v3004_v7, 7 }
  0xd1   : > { %v734_v53 = vsel %vm733_vm8, %v727_v49, %v730_v12  ;;  %vm782_vm0 = vcmp.eq.s32.totalorder %v3008_v8, 7  ;;  %v783_v54 = vsel %vm775_vm12, 1, %v2466_v0  ;;  %v784_v17 = vsel %vm776_vm5, 1, %v2466_v0 }
  0xd2   : > { %vm668_vm9 = vcmp.gt.s32.totalorder %v666_v50, %v667_v52  ;;  %vm735_vm11 = vcmp.gt.s32.totalorder %v732_v11, %v734_v53  ;;  %v785_v4 = vsel %vm777_vm1, 1, %v2466_v0  ;;  %v786_v3 = vsel %vm778_vm15, 1, %v2466_v0 }
  0xd3   : > { %v669_v18 = vsel %vm668_vm9, %v666_v50, %v667_v52  ;;  %v736_v55 = vsel %vm735_vm11, %v732_v11, %v734_v53  ;;  %v787_v7 = vsel %vm779_vm7, 1, %v2466_v0  ;;  %v788_v8 = vsel %vm780_vm3, 1, %v2466_v0 }
  0xd4   : > { %v737_v56 = vrot.slane %v736_v55, 4  ;;  %v789_v57 = vsel %vm781_vm13, 1, %v2466_v0  ;;  %v790_v16 = vsel %vm782_vm0, 1, %v2466_v0  ;;  %v791_v59 = vsel %vm258_vm4, %v783_v54, 2147483648 }
  0xd5   : > { %v792_v25 = vsel %vm258_vm4, %v784_v17, 2147483648  ;;  %v793_v61 = vsel %vm258_vm4, %v785_v4, 2147483648  ;;  %v794_v62 = vsel %vm258_vm4, %v786_v3, 2147483648  ;;  %v795_v63 = vsel %vm258_vm4, %v787_v7, 2147483648 }
  0xd6   : > { %vm738_vm11 = vcmp.gt.s32.totalorder %v736_v55, %v737_v56  ;;  %v798_v15 = vsel %vm258_vm4, %v788_v8, 2147483648  ;;  %vm796_vm12 = vcmp.gt.s32.totalorder %v791_v59, %v795_v63  ;;  %v801_v60 = vsel %vm258_vm4, %v789_v57, 2147483648 }
  0xd7   : > { %v739_v22 = vsel %vm738_vm11, %v736_v55, %v737_v56  ;;  %vm799_vm10 = vcmp.gt.s32.totalorder %v792_v25, %v798_v15  ;;  %v797_v58 = vsel %vm796_vm12, %v791_v59, %v795_v63  ;;  %vm802_vm14 = vcmp.gt.s32.totalorder %v793_v61, %v801_v60 }
  0xd8   : > { %v740_v42 = vrot.slane %v739_v22, 2  ;;  %v800_v19 = vsel %vm799_vm10, %v792_v25, %v798_v15  ;;  %v803_v20 = vsel %vm802_vm14, %v793_v61, %v801_v60  ;;  %v804_v23 = vsel %vm258_vm4, %v790_v16, 2147483648 }
  0xd9   : > { %vm807_vm2 = vcmp.gt.s32.totalorder %v797_v58, %v800_v19  ;;  %vm4723_vm5 = vcmask 1040384   ;;  %vm805_vm8 = vcmp.gt.s32.totalorder %v794_v62, %v804_v23  ;;  %vm4724_vm15 = vcmask 1041408  }
  0xda   : > { %v836_v24 = vsel %vm4723_vm5, %v2972_v21, %v3017_v9  ;;  %vm741_vm1 = vcmp.gt.s32.totalorder %v739_v22, %v740_v42  ;;  %v808_v14 = vsel %vm807_vm2, %v797_v58, %v800_v19  ;;  %v806_v28 = vsel %vm805_vm8, %v794_v62, %v804_v23 }
  0xdb   : > { %v837_v13 = vsel %vm4724_vm15, %v836_v24, %v3052_v26  ;;  %v742_v29 = vsel %vm741_vm1, %v739_v22, %v740_v42  ;;  %vm1595_vm7 = vcmp.eq.s32.totalorder %v3163_v30, 0  ;;  %vm809_vm3 = vcmp.gt.s32.totalorder %v803_v20, %v806_v28 }
  0xdc   : > { %v838_v27 = vsel %vm4715_vm6, %v837_v13, %v3083_v51  ;;  %v743_v21 = vrot.slane %v742_v29, 1  ;;  %vm4725_vm13 = vcmask 1043456   ;;  %vm1596_vm0 = vcmp.eq.s32.totalorder %v3169_v31, 0 }
  0xdd   : > { %v839_v9 = vsel %vm4725_vm13, %v838_v27, %v3113_v35  ;;  %v810_v26 = vsel %vm809_vm3, %v803_v20, %v806_v28  ;;  %vm4726_vm9 = vcmask 1044480   ;;  %vm1597_vm11 = vcmp.eq.s32.totalorder %v3174_v32, 0  ;;  %v3186_v35 = vld [vmem:[%s2544_s25 + $0xa8] sm:$0xff] }
  0xde   : > { %v840_v51 = vsel %vm4726_vm9, %v839_v9, %v669_v18  ;;  %vm1598_vm12 = vcmp.eq.s32.totalorder %v3178_v33, 0  ;;  %vm744_vm10 = vcmp.gt.s32.totalorder %v742_v29, %v743_v21  ;;  %vm811_vm14 = vcmp.gt.s32.totalorder %v808_v14, %v810_v26 }
  0xdf   : > { %vm1599_vm2 = vcmp.eq.s32.totalorder %v3182_v34, 0  ;;  %vm1600_vm5 = vcmp.eq.s32.totalorder %v3186_v35, 0  ;;  %v745_v36 = vsel %vm744_vm10, %v742_v29, %v743_v21  ;;  %v812_v37 = vsel %vm811_vm14, %v808_v14, %v810_v26 }
  0xe0   : > { %vm1601_vm1 = vcmp.eq.s32.totalorder %v3190_v38, 0  ;;  %vm1602_vm8 = vcmp.eq.s32.totalorder %v3194_v39, 0  ;;  %v813_v40 = vrot.slane %v812_v37, 4  ;;  %vm4727_vm15 = vcmask 1045504  }
  0xe1   : > { %v841_v41 = vsel %vm4727_vm15, %v840_v51, %v745_v36  ;;  %v1603_v43 = vsel %vm1595_vm7, 1, %v2466_v0  ;;  %v1604_v44 = vsel %vm1596_vm0, 1, %v2466_v0  ;;  %v1605_v6 = vsel %vm1597_vm11, 1, %v2466_v0 }
  0xe2   : > { %v1606_v45 = vsel %vm1598_vm12, 1, %v2466_v0  ;;  %v1607_v5 = vsel %vm1599_vm2, 1, %v2466_v0  ;;  %v1608_v46 = vsel %vm1600_vm5, 1, %v2466_v0  ;;  %vm814_vm3 = vcmp.gt.s32.totalorder %v812_v37, %v813_v40 }
  0xe3   : > { %v1609_v1 = vsel %vm1601_vm1, 1, %v2466_v0  ;;  %v1610_v10 = vsel %vm1602_vm8, 1, %v2466_v0  ;;  %v1611_v47 = vsel %vm258_vm4, %v1603_v43, 2147483648  ;;  %v815_v48 = vsel %vm814_vm3, %v812_v37, %v813_v40 }
  0xe4   : > { %v1612_v49 = vsel %vm258_vm4, %v1604_v44, 2147483648  ;;  %v1613_v2 = vsel %vm258_vm4, %v1605_v6, 2147483648  ;;  %v1614_v50 = vsel %vm258_vm4, %v1606_v45, 2147483648  ;;  %v816_v12 = vrot.slane %v815_v48, 2 }
  0xe5   : > { %v1615_v11 = vsel %vm258_vm4, %v1607_v5, 2147483648  ;;  %v1618_v52 = vsel %vm258_vm4, %v1608_v46, 2147483648  ;;  %v1621_v53 = vsel %vm258_vm4, %v1609_v1, 2147483648  ;;  %v1624_v54 = vsel %vm258_vm4, %v1610_v10, 2147483648 }
  0xe6   : > { %vm1616_vm7 = vcmp.gt.s32.totalorder %v1611_v47, %v1615_v11  ;;  %vm1619_vm13 = vcmp.gt.s32.totalorder %v1612_v49, %v1618_v52  ;;  %vm1622_vm0 = vcmp.gt.s32.totalorder %v1613_v2, %v1621_v53  ;;  %vm817_vm9 = vcmp.gt.s32.totalorder %v815_v48, %v816_v12 }
  0xe7   : > { %v1617_v17 = vsel %vm1616_vm7, %v1611_v47, %v1615_v11  ;;  %v1620_v18 = vsel %vm1619_vm13, %v1612_v49, %v1618_v52  ;;  %v1623_v55 = vsel %vm1622_vm0, %v1613_v2, %v1621_v53  ;;  %v818_v4 = vsel %vm817_vm9, %v815_v48, %v816_v12 }
  0xe8   : > { %vm1625_vm11 = vcmp.gt.s32.totalorder %v1614_v50, %v1624_v54  ;;  %vm1627_vm12 = vcmp.gt.s32.totalorder %v1617_v17, %v1620_v18  ;;  %vm1671_vm10 = vcmp.eq.s32.totalorder %v3163_v30, 1  ;;  %v819_v3 = vrot.slane %v818_v4, 1 }
  0xe9   : > { %v1626_v56 = vsel %vm1625_vm11, %v1614_v50, %v1624_v54  ;;  %v1628_v7 = vsel %vm1627_vm12, %v1617_v17, %v1620_v18  ;;  %vm1672_vm14 = vcmp.eq.s32.totalorder %v3169_v31, 1  ;;  %vm1673_vm5 = vcmp.eq.s32.totalorder %v3174_v32, 1 }
  0xea   : > { %vm1629_vm2 = vcmp.gt.s32.totalorder %v1623_v55, %v1626_v56  ;;  %vm1674_vm1 = vcmp.eq.s32.totalorder %v3178_v33, 1  ;;  %vm1675_vm8 = vcmp.eq.s32.totalorder %v3182_v34, 1  ;;  %vm820_vm15 = vcmp.gt.s32.totalorder %v818_v4, %v819_v3 }
  0xeb   : > { %v1630_v8 = vsel %vm1629_vm2, %v1623_v55, %v1626_v56  ;;  %vm1676_vm3 = vcmp.eq.s32.totalorder %v3186_v35, 1  ;;  %vm1677_vm7 = vcmp.eq.s32.totalorder %v3190_v38, 1  ;;  %v821_v57 = vsel %vm820_vm15, %v818_v4, %v819_v3 }
  0xec   : > { %vm1631_vm13 = vcmp.gt.s32.totalorder %v1628_v7, %v1630_v8  ;;  %vm1678_vm0 = vcmp.eq.s32.totalorder %v3194_v39, 1  ;;  %v1679_v16 = vsel %vm1671_vm10, 1, %v2466_v0  ;;  %vm4728_vm9 = vcmask 1046528  }
  0xed   : > { %v842_v59 = vsel %vm4728_vm9, %v841_v41, %v821_v57  ;;  %v1632_v25 = vsel %vm1631_vm13, %v1628_v7, %v1630_v8  ;;  %v1680_v61 = vsel %vm1672_vm14, 1, %v2466_v0  ;;  %v1681_v62 = vsel %vm1673_vm5, 1, %v2466_v0 }
  0xee   : > { %vm843_vm11 = vcmp.gt.s32.totalorder %v842_v59, 0  ;;  %v1633_v63 = vrot.slane %v1632_v25, 4  ;;  %v1682_v15 = vsel %vm1674_vm1, 1, %v2466_v0  ;;  %v1683_v22 = vsel %vm1675_vm8, 1, %v2466_v0 }
  0xef   : > { %v844_v60 = vsel %vm843_vm11, 1, %v2466_v0  ;;  %v1684_v42 = vsel %vm1676_vm3, 1, %v2466_v0  ;;  %v1685_v58 = vsel %vm1677_vm7, 1, %v2466_v0  ;;  %v1686_v19 = vsel %vm1678_vm0, 1, %v2466_v0 }
  0xf0   : > { %846 = vperm.xlu0 %2376, %v844_v60   ;;  %vm1634_vm12 = vcmp.gt.s32.totalorder %v1632_v25, %v1633_v63  ;;  %v1687_v20 = vsel %vm258_vm4, %v1679_v16, 2147483648  ;;  %v1688_v23 = vsel %vm258_vm4, %v1680_v61, 2147483648  ;;  %v1689_v24 = vsel %vm258_vm4, %v1681_v62, 2147483648 }
  0xf1   : > { %v1690_v14 = vsel %vm258_vm4, %v1682_v15, 2147483648  ;;  %v1691_v13 = vsel %vm258_vm4, %v1683_v22, 2147483648  ;;  %v1694_v29 = vsel %vm258_vm4, %v1684_v42, 2147483648  ;;  %v1635_v28 = vsel %vm1634_vm12, %v1632_v25, %v1633_v63 }
  0xf2   : > { %vm1692_vm10 = vcmp.gt.s32.totalorder %v1687_v20, %v1691_v13  ;;  %vm1695_vm14 = vcmp.gt.s32.totalorder %v1688_v23, %v1694_v29  ;;  %v1697_v27 = vsel %vm258_vm4, %v1685_v58, 2147483648  ;;  %v1700_v26 = vsel %vm258_vm4, %v1686_v19, 2147483648 }
  0xf3   : > { %v1693_v21 = vsel %vm1692_vm10, %v1687_v20, %v1691_v13  ;;  %v1696_v9 = vsel %vm1695_vm14, %v1688_v23, %v1694_v29  ;;  %vm1698_vm2 = vcmp.gt.s32.totalorder %v1689_v24, %v1697_v27  ;;  %vm1701_vm5 = vcmp.gt.s32.totalorder %v1690_v14, %v1700_v26 }
  0xf4   : > { %v1699_v51 = vsel %vm1698_vm2, %v1689_v24, %v1697_v27  ;;  %vm1703_vm1 = vcmp.gt.s32.totalorder %v1693_v21, %v1696_v9  ;;  %v1702_v36 = vsel %vm1701_vm5, %v1690_v14, %v1700_v26  ;;  %v1636_v40 = vrot.slane %v1635_v28, 2 }
  0xf5   : > { %v1704_v37 = vsel %vm1703_vm1, %v1693_v21, %v1696_v9  ;;  %vm1705_vm8 = vcmp.gt.s32.totalorder %v1699_v51, %v1702_v36  ;;  %vm1747_vm15 = vcmp.eq.s32.totalorder %v3163_v30, 2  ;;  %vm1748_vm3 = vcmp.eq.s32.totalorder %v3169_v31, 2 }
  0xf6   : > { %v1706_v41 = vsel %vm1705_vm8, %v1699_v51, %v1702_v36  ;;  %vm1749_vm7 = vcmp.eq.s32.totalorder %v3174_v32, 2  ;;  %vm1750_vm13 = vcmp.eq.s32.totalorder %v3178_v33, 2  ;;  %vm1751_vm0 = vcmp.eq.s32.totalorder %v3182_v34, 2 }
  0xf7   : > { %vm1707_vm9 = vcmp.gt.s32.totalorder %v1704_v37, %v1706_v41  ;;  %vm1752_vm11 = vcmp.eq.s32.totalorder %v3186_v35, 2  ;;  %vm1753_vm12 = vcmp.eq.s32.totalorder %v3190_v38, 2  ;;  %vm1754_vm10 = vcmp.eq.s32.totalorder %v3194_v39, 2 }
  0xf8   : > { %v1708_v43 = vsel %vm1707_vm9, %v1704_v37, %v1706_v41  ;;  %v1755_v44 = vsel %vm1747_vm15, 1, %v2466_v0  ;;  %v1756_v6 = vsel %vm1748_vm3, 1, %v2466_v0  ;;  %v1757_v5 = vsel %vm1749_vm7, 1, %v2466_v0 }
  0xf9   : > { %v1709_v45 = vrot.slane %v1708_v43, 4  ;;  %v1758_v46 = vsel %vm1750_vm13, 1, %v2466_v0  ;;  %v1759_v1 = vsel %vm1751_vm0, 1, %v2466_v0  ;;  %vm3267_vm14 = vcmp.gt.s32.totalorder %v1635_v28, %v1636_v40 }
  0xfa   : > { %v1760_v47 = vsel %vm1752_vm11, 1, %v2466_v0  ;;  %v1761_v48 = vsel %vm1753_vm12, 1, %v2466_v0  ;;  %v1763_v49 = vsel %vm258_vm4, %v1755_v44, 2147483648  ;;  %v1762_v2 = vsel %vm1754_vm10, 1, %v2466_v0 }
  0xfb   : > { %vm1710_vm2 = vcmp.gt.s32.totalorder %v1708_v43, %v1709_v45  ;;  %v1764_v50 = vsel %vm258_vm4, %v1756_v6, 2147483648  ;;  %v1765_v12 = vsel %vm258_vm4, %v1757_v5, 2147483648  ;;  %v1766_v11 = vsel %vm258_vm4, %v1758_v46, 2147483648 }
  0xfc   : > { %v1767_v52 = vsel %vm258_vm4, %v1759_v1, 2147483648  ;;  %v1770_v53 = vsel %vm258_vm4, %v1760_v47, 2147483648  ;;  %v1773_v54 = vsel %vm258_vm4, %v1761_v48, 2147483648  ;;  %v1711_v17 = vsel %vm1710_vm2, %v1708_v43, %v1709_v45 }
  0xfd   : > { %vm1768_vm5 = vcmp.gt.s32.totalorder %v1763_v49, %v1767_v52  ;;  %vm1771_vm1 = vcmp.gt.s32.totalorder %v1764_v50, %v1770_v53  ;;  %vm1774_vm8 = vcmp.gt.s32.totalorder %v1765_v12, %v1773_v54  ;;  %v1776_v3 = vsel %vm258_vm4, %v1762_v2, 2147483648 }
  0xfe   : > { %v1769_v18 = vsel %vm1768_vm5, %v1763_v49, %v1767_v52  ;;  %v1772_v55 = vsel %vm1771_vm1, %v1764_v50, %v1770_v53  ;;  %v1775_v4 = vsel %vm1774_vm8, %v1765_v12, %v1773_v54  ;;  %vm1777_vm15 = vcmp.gt.s32.totalorder %v1766_v11, %v1776_v3 }
  0xff   : > { %vm1779_vm3 = vcmp.gt.s32.totalorder %v1769_v18, %v1772_v55  ;;  %v1712_v56 = vrot.slane %v1711_v17, 2  ;;  %v1778_v7 = vsel %vm1777_vm15, %v1766_v11, %v1776_v3  ;;  %vm1823_vm7 = vcmp.eq.s32.totalorder %v3163_v30, 3 }
 0x100   : > { %v1780_v8 = vsel %vm1779_vm3, %v1769_v18, %v1772_v55  ;;  %v3285_v57 = vsel %vm3267_vm14, %v1635_v28, %v1636_v40  ;;  %vm1781_vm13 = vcmp.gt.s32.totalorder %v1775_v4, %v1778_v7  ;;  %vm1824_vm0 = vcmp.eq.s32.totalorder %v3169_v31, 3 }
 0x101   : > { %vm1825_vm9 = vcmp.eq.s32.totalorder %v3174_v32, 3  ;;  %v1782_v16 = vsel %vm1781_vm13, %v1775_v4, %v1778_v7  ;;  %vm1826_vm11 = vcmp.eq.s32.totalorder %v3178_v33, 3  ;;  %vm1827_vm12 = vcmp.eq.s32.totalorder %v3182_v34, 3 }
 0x102   : > { %vm1828_vm10 = vcmp.eq.s32.totalorder %v3186_v35, 3  ;;  %vm1783_vm2 = vcmp.gt.s32.totalorder %v1780_v8, %v1782_v16  ;;  %vm1829_vm5 = vcmp.eq.s32.totalorder %v3190_v38, 3  ;;  %vm1830_vm1 = vcmp.eq.s32.totalorder %v3194_v39, 3 }
 0x103   : > { %v1831_v59 = vsel %vm1823_vm7, 1, %v2466_v0  ;;  %vm3295_vm14 = vcmp.gt.s32.totalorder %v1711_v17, %v1712_v56  ;;  %v1784_v61 = vsel %vm1783_vm2, %v1780_v8, %v1782_v16  ;;  %v1832_v62 = vsel %vm1824_vm0, 1, %v2466_v0 }
 0x104   : > { %v1833_v63 = vsel %vm1825_vm9, 1, %v2466_v0  ;;  %v1785_v15 = vrot.slane %v1784_v61, 4  ;;  %v1834_v22 = vsel %vm1826_vm11, 1, %v2466_v0  ;;  %v1835_v60 = vsel %vm1827_vm12, 1, %v2466_v0 }
 0x105   : > { %v1836_v42 = vsel %vm1828_vm10, 1, %v2466_v0  ;;  %v1837_v58 = vsel %vm1829_vm5, 1, %v2466_v0  ;;  %v1838_v19 = vsel %vm1830_vm1, 1, %v2466_v0  ;;  %v1839_v20 = vsel %vm258_vm4, %v1831_v59, 2147483648 }
 0x106   : > { %v1840_v23 = vsel %vm258_vm4, %v1832_v62, 2147483648  ;;  %vm1786_vm8 = vcmp.gt.s32.totalorder %v1784_v61, %v1785_v15  ;;  %v1841_v24 = vsel %vm258_vm4, %v1833_v63, 2147483648  ;;  %v1842_v14 = vsel %vm258_vm4, %v1834_v22, 2147483648 }
 0x107   : > { %v1843_v13 = vsel %vm258_vm4, %v1835_v60, 2147483648  ;;  %v1787_v29 = vsel %vm1786_vm8, %v1784_v61, %v1785_v15  ;;  %v1846_v28 = vsel %vm258_vm4, %v1836_v42, 2147483648  ;;  %v1849_v27 = vsel %vm258_vm4, %v1837_v58, 2147483648 }
 0x108   : > { %vm1844_vm15 = vcmp.gt.s32.totalorder %v1839_v20, %v1843_v13  ;;  %v1639_v21 = vrot.slane %v3285_v57, 1  ;;  %vm1847_vm3 = vcmp.gt.s32.totalorder %v1840_v23, %v1846_v28  ;;  %vm1850_vm7 = vcmp.gt.s32.totalorder %v1841_v24, %v1849_v27 }
 0x109   : > { %v1845_v9 = vsel %vm1844_vm15, %v1839_v20, %v1843_v13  ;;  %v1848_v26 = vsel %vm1847_vm3, %v1840_v23, %v1846_v28  ;;  %v1851_v51 = vsel %vm1850_vm7, %v1841_v24, %v1849_v27  ;;  %v1852_v36 = vsel %vm258_vm4, %v1838_v19, 2147483648 }
 0x10a   : > { %v3317_v37 = vsel %vm3295_vm14, %v1711_v17, %v1712_v56  ;;  %v1788_v40 = vrot.slane %v1787_v29, 2  ;;  %vm1853_vm13 = vcmp.gt.s32.totalorder %v1842_v14, %v1852_v36  ;;  %vm1855_vm0 = vcmp.gt.s32.totalorder %v1845_v9, %v1848_v26 }
 0x10b   : > { %v1854_v41 = vsel %vm1853_vm13, %v1842_v14, %v1852_v36  ;;  %v1856_v43 = vsel %vm1855_vm0, %v1845_v9, %v1848_v26  ;;  %vm1899_vm9 = vcmp.eq.s32.totalorder %v3163_v30, 4  ;;  %vm1900_vm11 = vcmp.eq.s32.totalorder %v3169_v31, 4 }
 0x10c   : > { %vm3322_vm12 = vcmp.gt.s32.totalorder %v3285_v57, %v1639_v21  ;;  %vm1857_vm10 = vcmp.gt.s32.totalorder %v1851_v51, %v1854_v41  ;;  %vm1901_vm2 = vcmp.eq.s32.totalorder %v3174_v32, 4  ;;  %vm1902_vm5 = vcmp.eq.s32.totalorder %v3178_v33, 4 }
 0x10d   : > { %v1858_v6 = vsel %vm1857_vm10, %v1851_v51, %v1854_v41  ;;  %vm1903_vm1 = vcmp.eq.s32.totalorder %v3182_v34, 4  ;;  %vm1904_vm14 = vcmp.eq.s32.totalorder %v3186_v35, 4  ;;  %vm1905_vm8 = vcmp.eq.s32.totalorder %v3190_v38, 4 }
 0x10e   : > { %v1715_v45 = vrot.slane %v3317_v37, 1  ;;  %vm1859_vm15 = vcmp.gt.s32.totalorder %v1856_v43, %v1858_v6  ;;  %v1907_v5 = vsel %vm1899_vm9, 1, %v2466_v0  ;;  %v1908_v46 = vsel %vm1900_vm11, 1, %v2466_v0 }
 0x10f   : > { %vm1789_vm3 = vcmp.gt.s32.totalorder %v1787_v29, %v1788_v40  ;;  %v1860_v1 = vsel %vm1859_vm15, %v1856_v43, %v1858_v6  ;;  %vm1906_vm7 = vcmp.eq.s32.totalorder %v3194_v39, 4  ;;  %v1909_v10 = vsel %vm1901_vm2, 1, %v2466_v0 }
 0x110   : > { %v1910_v47 = vsel %vm1902_vm5, 1, %v2466_v0  ;;  %v1911_v48 = vsel %vm1903_vm1, 1, %v2466_v0  ;;  %v1912_v49 = vsel %vm1904_vm14, 1, %v2466_v0  ;;  %v1913_v2 = vsel %vm1905_vm8, 1, %v2466_v0 }
 0x111   : > { %v1861_v50 = vrot.slane %v1860_v1, 4  ;;  %v1915_v12 = vsel %vm258_vm4, %v1907_v5, 2147483648  ;;  %v1916_v11 = vsel %vm258_vm4, %v1908_v46, 2147483648  ;;  %v1917_v52 = vsel %vm258_vm4, %v1909_v10, 2147483648 }
 0x112   : > { %v3343_v53 = vsel %vm1789_vm3, %v1787_v29, %v1788_v40  ;;  %v1914_v54 = vsel %vm1906_vm7, 1, %v2466_v0  ;;  %v1919_v17 = vsel %vm258_vm4, %v1911_v48, 2147483648  ;;  %v1922_v18 = vsel %vm258_vm4, %v1912_v49, 2147483648 }
 0x113   : > { %v1918_v55 = vsel %vm258_vm4, %v1910_v47, 2147483648  ;;  %vm1920_vm13 = vcmp.gt.s32.totalorder %v1915_v12, %v1919_v17  ;;  %vm1923_vm0 = vcmp.gt.s32.totalorder %v1916_v11, %v1922_v18  ;;  %v1925_v4 = vsel %vm258_vm4, %v1913_v2, 2147483648 }
 0x114   : > { %v3353_v3 = vsel %vm3322_vm12, %v3285_v57, %v1639_v21  ;;  %v1921_v56 = vsel %vm1920_vm13, %v1915_v12, %v1919_v17  ;;  %v1924_v7 = vsel %vm1923_vm0, %v1916_v11, %v1922_v18  ;;  %vm1926_vm9 = vcmp.gt.s32.totalorder %v1917_v52, %v1925_v4 }
 0x115   : > { %vm1862_vm11 = vcmp.gt.s32.totalorder %v1860_v1, %v1861_v50  ;;  %v1927_v8 = vsel %vm1926_vm9, %v1917_v52, %v1925_v4  ;;  %v1928_v16 = vsel %vm258_vm4, %v1914_v54, 2147483648  ;;  %vm1931_vm10 = vcmp.gt.s32.totalorder %v1921_v56, %v1924_v7 }
 0x116   : > { %vm3359_vm2 = vcmp.gt.s32.totalorder %v3317_v37, %v1715_v45  ;;  %v1791_v25 = vrot.slane %v3343_v53, 1  ;;  %vm1929_vm5 = vcmp.gt.s32.totalorder %v1918_v55, %v1928_v16  ;;  %vm1975_vm12 = vcmp.eq.s32.totalorder %v3163_v30, 5 }
 0x117   : > { %v1930_v57 = vsel %vm1929_vm5, %v1918_v55, %v1928_v16  ;;  %v1932_v61 = vsel %vm1931_vm10, %v1921_v56, %v1924_v7  ;;  %vm1976_vm1 = vcmp.eq.s32.totalorder %v3169_v31, 5  ;;  %vm1977_vm14 = vcmp.eq.s32.totalorder %v3174_v32, 5 }
 0x118   : > { %v1863_v62 = vsel %vm1862_vm11, %v1860_v1, %v1861_v50  ;;  %vm1933_vm8 = vcmp.gt.s32.totalorder %v1927_v8, %v1930_v57  ;;  %vm1978_vm15 = vcmp.eq.s32.totalorder %v3178_v33, 5  ;;  %vm1979_vm3 = vcmp.eq.s32.totalorder %v3182_v34, 5 }
 0x119   : > { %v1934_v63 = vsel %vm1933_vm8, %v1927_v8, %v1930_v57  ;;  %vm1980_vm7 = vcmp.eq.s32.totalorder %v3186_v35, 5  ;;  %vm1981_vm13 = vcmp.eq.s32.totalorder %v3190_v38, 5  ;;  %vm1982_vm0 = vcmp.eq.s32.totalorder %v3194_v39, 5 }
 0x11a   : > { %vm1935_vm9 = vcmp.gt.s32.totalorder %v1932_v61, %v1934_v63  ;;  %v1983_v15 = vsel %vm1975_vm12, 1, %v2466_v0  ;;  %v1984_v22 = vsel %vm1976_vm1, 1, %v2466_v0  ;;  %v1985_v60 = vsel %vm1977_vm14, 1, %v2466_v0 }
 0x11b   : > { %v1864_v42 = vrot.slane %v1863_v62, 2  ;;  %v1936_v58 = vsel %vm1935_vm9, %v1932_v61, %v1934_v63  ;;  %v1986_v19 = vsel %vm1978_vm15, 1, %v2466_v0  ;;  %v1987_v20 = vsel %vm1979_vm3, 1, %v2466_v0 }
 0x11c   : > { %v1937_v23 = vrot.slane %v1936_v58, 4  ;;  %v1988_v24 = vsel %vm1980_vm7, 1, %v2466_v0  ;;  %v1989_v14 = vsel %vm1981_vm13, 1, %v2466_v0  ;;  %v1990_v13 = vsel %vm1982_vm0, 1, %v2466_v0 }
 0x11d   : > { %v1991_v29 = vsel %vm258_vm4, %v1983_v15, 2147483648  ;;  %v1992_v28 = vsel %vm258_vm4, %v1984_v22, 2147483648  ;;  %v1993_v27 = vsel %vm258_vm4, %v1985_v60, 2147483648  ;;  %v1994_v21 = vsel %vm258_vm4, %v1986_v19, 2147483648 }
 0x11e   : > { %vm1938_vm11 = vcmp.gt.s32.totalorder %v1936_v58, %v1937_v23  ;;  %v1995_v9 = vsel %vm258_vm4, %v1987_v20, 2147483648  ;;  %v1998_v26 = vsel %vm258_vm4, %v1988_v24, 2147483648  ;;  %v2001_v51 = vsel %vm258_vm4, %v1989_v14, 2147483648 }
 0x11f   : > { %v1939_v36 = vsel %vm1938_vm11, %v1936_v58, %v1937_v23  ;;  %vm1996_vm10 = vcmp.gt.s32.totalorder %v1991_v29, %v1995_v9  ;;  %vm1999_vm5 = vcmp.gt.s32.totalorder %v1992_v28, %v1998_v26  ;;  %vm2002_vm12 = vcmp.gt.s32.totalorder %v1993_v27, %v2001_v51 }
 0x120   : > { %v3392_v40 = vsel %vm3359_vm2, %v3317_v37, %v1715_v45  ;;  %vm3397_vm1 = vcmp.gt.s32.totalorder %v3343_v53, %v1791_v25  ;;  %v1997_v43 = vsel %vm1996_vm10, %v1991_v29, %v1995_v9  ;;  %v2000_v44 = vsel %vm1999_vm5, %v1992_v28, %v1998_v26 }
 0x121   : > { %vm1865_vm14 = vcmp.gt.s32.totalorder %v1863_v62, %v1864_v42  ;;  %v2003_v6 = vsel %vm2002_vm12, %v1993_v27, %v2001_v51  ;;  %v2004_v5 = vsel %vm258_vm4, %v1990_v13, 2147483648  ;;  %vm2007_vm8 = vcmp.gt.s32.totalorder %v1997_v43, %v2000_v44 }
 0x122   : > { %v1940_v46 = vrot.slane %v1939_v36, 2  ;;  %vm2005_vm15 = vcmp.gt.s32.totalorder %v1994_v21, %v2004_v5  ;;  %vm2051_vm3 = vcmp.eq.s32.totalorder %v3163_v30, 6  ;;  %vm2052_vm2 = vcmp.eq.s32.totalorder %v3169_v31, 6 }
 0x123   : > { %v2006_v37 = vsel %vm2005_vm15, %v1994_v21, %v2004_v5  ;;  %v2008_v45 = vsel %vm2007_vm8, %v1997_v43, %v2000_v44  ;;  %vm2053_vm7 = vcmp.eq.s32.totalorder %v3174_v32, 6  ;;  %vm2054_vm13 = vcmp.eq.s32.totalorder %v3178_v33, 6 }
 0x124   : > { %v3406_v1 = vsel %vm1865_vm14, %v1863_v62, %v1864_v42  ;;  %vm2009_vm0 = vcmp.gt.s32.totalorder %v2003_v6, %v2006_v37  ;;  %vm2055_vm9 = vcmp.eq.s32.totalorder %v3182_v34, 6  ;;  %vm2056_vm11 = vcmp.eq.s32.totalorder %v3186_v35, 6 }
 0x125   : > { %v2010_v10 = vsel %vm2009_vm0, %v2003_v6, %v2006_v37  ;;  %vm2057_vm10 = vcmp.eq.s32.totalorder %v3190_v38, 6  ;;  %vm2058_vm5 = vcmp.eq.s32.totalorder %v3194_v39, 6  ;;  %v2059_v47 = vsel %vm2051_vm3, 1, %v2466_v0 }
 0x126   : > { %vm2011_vm12 = vcmp.gt.s32.totalorder %v2008_v45, %v2010_v10  ;;  %v2060_v48 = vsel %vm2052_vm2, 1, %v2466_v0  ;;  %v2061_v49 = vsel %vm2053_vm7, 1, %v2466_v0  ;;  %v2062_v2 = vsel %vm2054_vm13, 1, %v2466_v0 }
 0x127   : > { %vm3416_vm14 = vcmp.gt.s32.totalorder %v1939_v36, %v1940_v46  ;;  %v2012_v12 = vsel %vm2011_vm12, %v2008_v45, %v2010_v10  ;;  %v2063_v11 = vsel %vm2055_vm9, 1, %v2466_v0  ;;  %v2064_v52 = vsel %vm2056_vm11, 1, %v2466_v0 }
 0x128   : > { %v2013_v54 = vrot.slane %v2012_v12, 4  ;;  %v2065_v17 = vsel %vm2057_vm10, 1, %v2466_v0  ;;  %v2066_v18 = vsel %vm2058_vm5, 1, %v2466_v0  ;;  %v2067_v55 = vsel %vm258_vm4, %v2059_v47, 2147483648 }
 0x129   : > { %v2068_v4 = vsel %vm258_vm4, %v2060_v48, 2147483648  ;;  %v2069_v56 = vsel %vm258_vm4, %v2061_v49, 2147483648  ;;  %v2070_v7 = vsel %vm258_vm4, %v2062_v2, 2147483648  ;;  %v2071_v8 = vsel %vm258_vm4, %v2063_v11, 2147483648 }
 0x12a   : > { %vm2014_vm8 = vcmp.gt.s32.totalorder %v2012_v12, %v2013_v54  ;;  %vm2072_vm15 = vcmp.gt.s32.totalorder %v2067_v55, %v2071_v8  ;;  %v2074_v16 = vsel %vm258_vm4, %v2064_v52, 2147483648  ;;  %v2077_v59 = vsel %vm258_vm4, %v2065_v17, 2147483648 }
 0x12b   : > { %v3436_v57 = vsel %vm3397_vm1, %v3343_v53, %v1791_v25  ;;  %v2073_v61 = vsel %vm2072_vm15, %v2067_v55, %v2071_v8  ;;  %vm2075_vm3 = vcmp.gt.s32.totalorder %v2068_v4, %v2074_v16  ;;  %vm2078_vm2 = vcmp.gt.s32.totalorder %v2069_v56, %v2077_v59 }
 0x12c   : > { %v2015_v62 = vsel %vm2014_vm8, %v2012_v12, %v2013_v54  ;;  %v2076_v63 = vsel %vm2075_vm3, %v2068_v4, %v2074_v16  ;;  %v2079_v15 = vsel %vm2078_vm2, %v2069_v56, %v2077_v59  ;;  %v2080_v22 = vsel %vm258_vm4, %v2066_v18, 2147483648  ;;  %v3503_v59 = vpop.permute.xlu0 %190 }
 0x12d   : > { %v1867_v60 = vrot.slane %v3406_v1, 1  ;;  %v3442_v42 = vsel %vm3416_vm14, %v1939_v36, %v1940_v46  ;;  %vm2081_vm7 = vcmp.gt.s32.totalorder %v2070_v7, %v2080_v22  ;;  %vm2083_vm13 = vcmp.gt.s32.totalorder %v2073_v61, %v2076_v63  ;;  %4751 = vst [vmem:[#allocation6_spill] sm:$0xff] %v3503_v59 }
 0x12e   : > { %v2082_v58 = vsel %vm2081_vm7, %v2070_v7, %v2080_v22  ;;  %v2084_v19 = vsel %vm2083_vm13, %v2073_v61, %v2076_v63  ;;  %vm2127_vm1 = vcmp.eq.s32.totalorder %v3163_v30, 7  ;;  %vm2128_vm0 = vcmp.eq.s32.totalorder %v3169_v31, 7  ;;  %v3493_v7 = vpop.permute.xlu1 %196  ;;  %v175_v61 = vld [vmem:[%s3500_s28 + $0x10] sm:$0xff] }
 0x12f   : > { %v2016_v53 = vrot.slane %v2015_v62, 2  ;;  %vm2085_vm9 = vcmp.gt.s32.totalorder %v2079_v15, %v2082_v58  ;;  %vm2129_vm11 = vcmp.eq.s32.totalorder %v3174_v32, 7  ;;  %vm2130_vm10 = vcmp.eq.s32.totalorder %v3178_v33, 7  ;;  %4749 = vst [vmem:[#allocation5_spill] sm:$0xff] %v3493_v7 }
 0x130   : > { %v2086_v25 = vsel %vm2085_vm9, %v2079_v15, %v2082_v58  ;;  %vm2131_vm5 = vcmp.eq.s32.totalorder %v3182_v34, 7  ;;  %vm2132_vm12 = vcmp.eq.s32.totalorder %v3186_v35, 7  ;;  %vm2133_vm14 = vcmp.eq.s32.totalorder %v3190_v38, 7 }
 0x131   : > { %vm3452_vm8 = vcmp.gt.s32.totalorder %v3406_v1, %v1867_v60  ;;  %vm2087_vm15 = vcmp.gt.s32.totalorder %v2084_v19, %v2086_v25  ;;  %vm2134_vm3 = vcmp.eq.s32.totalorder %v3194_v39, 7  ;;  %v2135_v30 = vsel %vm2127_vm1, 1, %v2466_v0 }
 0x132   : > { %v2136_v31 = vsel %vm2128_vm0, 1, %v2466_v0  ;;  %v1943_v32 = vrot.slane %v3442_v42, 1  ;;  %v2088_v33 = vsel %vm2087_vm15, %v2084_v19, %v2086_v25  ;;  %v2137_v34 = vsel %vm2129_vm11, 1, %v2466_v0  ;;  %v3512_v63 = vpop.permute.xlu1 %199  ;;  %v176_v19 = vld [vmem:[%s3500_s28 + $0x18] sm:$0xff]  ;;  %v3533_v25 = vpop.permute.xlu0 %193 }
 0x133   : > { %v2138_v35 = vsel %vm2130_vm10, 1, %v2466_v0  ;;  %vm3462_vm2 = vcmp.gt.s32.totalorder %v2015_v62, %v2016_v53  ;;  %v2089_v23 = vrot.slane %v2088_v33, 4  ;;  %v2139_v24 = vsel %vm2131_vm5, 1, %v2466_v0  ;;  %4753 = vst [vmem:[#allocation7_spill] sm:$0xff] %v3512_v63  ;;  %4755 = vst [vmem:[#allocation9_spill] sm:$0xff] %v3533_v25 }
 0x134   : > { %v2140_v39 = vsel %vm2132_vm12, 1, %v2466_v0  ;;  %v2141_v14 = vsel %vm2133_vm14, 1, %v2466_v0  ;;  %v2142_v13 = vsel %vm2134_vm3, 1, %v2466_v0  ;;  %v2143_v29 = vsel %vm258_vm4, %v2135_v30, 2147483648 }
 0x135   : > { %v2144_v28 = vsel %vm258_vm4, %v2136_v31, 2147483648  ;;  %vm2090_vm7 = vcmp.gt.s32.totalorder %v2088_v33, %v2089_v23  ;;  %v2145_v27 = vsel %vm258_vm4, %v2137_v34, 2147483648  ;;  %v2146_v21 = vsel %vm258_vm4, %v2138_v35, 2147483648 }
 0x136   : > { %v2147_v9 = vsel %vm258_vm4, %v2139_v24, 2147483648  ;;  %v2091_v26 = vsel %vm2090_vm7, %v2088_v33, %v2089_v23  ;;  %v2150_v51 = vsel %vm258_vm4, %v2140_v39, 2147483648  ;;  %v2153_v36 = vsel %vm258_vm4, %v2141_v14, 2147483648  ;;  %v174_v33 = vld [vmem:[%s3500_s28 + $0x8] sm:$0xff]  ;;  %v3554_v38 = vpop.permute.xlu1 %205 }
 0x137   : > { %vm2148_vm13 = vcmp.gt.s32.totalorder %v2143_v29, %v2147_v9  ;;  %v2092_v41 = vrot.slane %v2091_v26, 2  ;;  %vm2151_vm1 = vcmp.gt.s32.totalorder %v2144_v28, %v2150_v51  ;;  %vm2154_vm0 = vcmp.gt.s32.totalorder %v2145_v27, %v2153_v36  ;;  %4757 = vst [vmem:[#allocation11_spill] sm:$0xff] %v3554_v38  ;;  %v178_v39 = vld [vmem:[%s3500_s28 + $0x28] sm:$0xff] }
 0x138   : > { %v2149_v43 = vsel %vm2148_vm13, %v2143_v29, %v2147_v9  ;;  %v2018_v44 = vsel %vm3462_vm2, %v2015_v62, %v2016_v53  ;;  %v2152_v6 = vsel %vm2151_vm1, %v2144_v28, %v2150_v51  ;;  %v2155_v5 = vsel %vm2154_vm0, %v2145_v27, %v2153_v36  ;;  %v3575_v27 = vpop.permute.xlu0 %202 }
 0x139   : > { %v2156_v46 = vsel %vm258_vm4, %v2142_v13, 2147483648  ;;  %vm2093_vm9 = vcmp.gt.s32.totalorder %v2091_v26, %v2092_v41  ;;  %vm2159_vm10 = vcmp.gt.s32.totalorder %v2149_v43, %v2152_v6  ;;  %vm4745_vm5 = vcmask 1040384   ;;  %4760 = vst [vmem:[#allocation14_spill] sm:$0xff] %v3575_v27 }
 0x13a   : > { %vm2157_vm11 = vcmp.gt.s32.totalorder %v2146_v21, %v2156_v46  ;;  %v2181_v37 = vsel %vm4745_vm5, %v3353_v3, %v3392_v40  ;;  %v2160_v10 = vsel %vm2159_vm10, %v2149_v43, %v2152_v6  ;;  %v2019_v47 = vrot.slane %v2018_v44, 1 }
 0x13b   : > { %v2158_v45 = vsel %vm2157_vm11, %v2146_v21, %v2156_v46  ;;  %v2094_v48 = vsel %vm2093_vm9, %v2091_v26, %v2092_v41  ;;  %v1869_v49 = vsel %vm3452_vm8, %v3406_v1, %v1867_v60  ;;  %vm1944_vm14 = vcmp.gt.s32.totalorder %v3442_v42, %v1943_v32  ;;  %v173_v60 = vld [vmem:[%s3500_s28] sm:$0xff] }
 0x13c   : > { %vm2161_vm12 = vcmp.gt.s32.totalorder %v2155_v5, %v2158_v45  ;;  %vm4746_vm4 = vcmask 1041408   ;;  %v2095_v12 = vrot.slane %v2094_v48, 1  ;;  %v1945_v3 = vsel %vm1944_vm14, %v3442_v42, %v1943_v32  ;;  %v3582_v26 = vld [vmem:[%s3500_s28 + $0x20] sm:$0xff] }
 0x13d   : > { %v2162_v2 = vsel %vm2161_vm12, %v2155_v5, %v2158_v45  ;;  %v2182_v50 = vsel %vm4746_vm4, %v2181_v37, %v3436_v57  ;;  %vm2020_vm3 = vcmp.gt.s32.totalorder %v2018_v44, %v2019_v47  ;;  %vm4747_vm8 = vcmask 1043456  }
 0x13e   : > { %vm2163_vm15 = vcmp.gt.s32.totalorder %v2160_v10, %v2162_v2  ;;  %v2183_v52 = vsel %vm4715_vm6, %v2182_v50, %v1869_v49  ;;  %v2021_v54 = vsel %vm2020_vm3, %v2018_v44, %v2019_v47  ;;  %vm2096_vm7 = vcmp.gt.s32.totalorder %v2094_v48, %v2095_v12  ;;  %v3605_v47 = vpop.permute.xlu1 %211 }
 0x13f   : > { %v2164_v11 = vsel %vm2163_vm15, %v2160_v10, %v2162_v2  ;;  %v2184_v17 = vsel %vm4747_vm8, %v2183_v52, %v1945_v3  ;;  %v2097_v55 = vsel %vm2096_vm7, %v2094_v48, %v2095_v12  ;;  %vm4748_vm1 = vcmask 1044480   ;;  %4763 = vst [vmem:[#allocation17_spill] sm:$0xff] %v3605_v47  ;;  %v3607_v48 = vpop.permute.xlu0 %208 }
 0x140   : > { %v2165_v40 = vrot.slane %v2164_v11, 4  ;;  %v2185_v4 = vsel %vm4748_vm1, %v2184_v17, %v2021_v54  ;;  %vm4750_vm0 = vcmask 1045504   ;;  %vm215_vm11 = vcmp.eq.s32.totalorder %v3493_v7, 0  ;;  %4764 = vst [vmem:[#allocation18_spill] sm:$0xff] %v3607_v48  ;;  %v3623_v54 = vld [vmem:[%s3500_s28 + $0x38] sm:$0xff] }
 0x141   : > { %v2186_v16 = vsel %vm4750_vm0, %v2185_v4, %v2097_v55  ;;  %vm4752_vm10 = vcmask 1046528   ;;  %vm292_vm5 = vcmp.eq.s32.totalorder %v3493_v7, 1  ;;  %vm368_vm12 = vcmp.eq.s32.totalorder %v3493_v7, 2  ;;  %4766 = vst [vmem:[#allocation20_spill] sm:$0xff] %v3623_v54 }
 0x142   : > { %vm2166_vm2 = vcmp.gt.s32.totalorder %v2164_v11, %v2165_v40  ;;  %vm444_vm4 = vcmp.eq.s32.totalorder %v3493_v7, 3  ;;  %vm520_vm15 = vcmp.eq.s32.totalorder %v3493_v7, 4  ;;  %v3515_v22 = vsel %vm215_vm11, %v175_v61, -3.4028235e+38 }
 0x143   : > { %v2167_v1 = vsel %vm2166_vm2, %v2164_v11, %v2165_v40  ;;  %vm596_vm3 = vcmp.eq.s32.totalorder %v3493_v7, 5  ;;  %vm213_vm2 = vcmp.eq.s32.totalorder %v3503_v59, 0  ;;  %v3520_v42 = vsel %vm292_vm5, %v175_v61, -3.4028235e+38 }
 0x144   : > { %v2168_v18 = vrot.slane %v2167_v1, 2  ;;  %v3522_v58 = vsel %vm368_vm12, %v175_v61, -3.4028235e+38  ;;  %vm290_vm7 = vcmp.eq.s32.totalorder %v3503_v59, 1  ;;  %vm366_vm8 = vcmp.eq.s32.totalorder %v3503_v59, 2 }
 0x145   : > { %v3527_v53 = vsel %vm444_vm4, %v175_v61, -3.4028235e+38  ;;  %vm518_vm1 = vcmp.eq.s32.totalorder %v3503_v59, 4  ;;  %v3535_v20 = vsel %vm596_vm3, %v175_v61, -3.4028235e+38  ;;  %vm594_vm0 = vcmp.eq.s32.totalorder %v3503_v59, 5 }
 0x146   : > { %vm2169_vm13 = vcmp.gt.s32.totalorder %v2167_v1, %v2168_v18  ;;  %4756 = vst [vmem:[#allocation10_spill] sm:$0xff] %v3535_v20  ;;  %v3537_v30 = vsel %vm213_vm2, %v173_v60, -3.4028235e+38  ;;  %v3541_v31 = vsel %vm290_vm7, %v173_v60, -3.4028235e+38  ;;  %vm293_vm11 = vcmp.eq.s32.totalorder %v3512_v63, 1 }
 0x147   : > { %v2170_v56 = vsel %vm2169_vm13, %v2167_v1, %v2168_v18  ;;  %vm442_vm13 = vcmp.eq.s32.totalorder %v3503_v59, 3  ;;  %v3543_v32 = vsel %vm366_vm8, %v173_v60, -3.4028235e+38  ;;  %v3550_v35 = vsel %vm518_vm1, %v173_v60, -3.4028235e+38  ;;  %v3627_v1 = vld [vmem:[%s3500_s28 + $0x30] sm:$0xff] }
 0x148   : > { %v2171_v8 = vrot.slane %v2170_v56, 1  ;;  %v3548_v34 = vsel %vm442_vm13, %v173_v60, -3.4028235e+38  ;;  %vm445_vm5 = vcmp.eq.s32.totalorder %v3512_v63, 3  ;;  %vm521_vm12 = vcmp.eq.s32.totalorder %v3512_v63, 4  ;;  %4767 = vst [vmem:[#allocation21_spill] sm:$0xff] %v3627_v1 }
 0x149   : > { %v3556_v23 = vsel %vm594_vm0, %v173_v60, -3.4028235e+38  ;;  %vm214_vm4 = vcmp.eq.s32.totalorder %v3533_v25, 0  ;;  %v3563_v14 = vsel %vm293_vm11, %v176_v19, -3.4028235e+38  ;;  %vm367_vm3 = vcmp.eq.s32.totalorder %v3533_v25, 2 }
 0x14a   : > { %vm2172_vm9 = vcmp.gt.s32.totalorder %v2170_v56, %v2171_v8  ;;  %4758 = vst [vmem:[#allocation12_spill] sm:$0xff] %v3556_v23  ;;  %v3569_v29 = vsel %vm445_vm5, %v176_v19, -3.4028235e+38  ;;  %v3571_v28 = vsel %vm521_vm12, %v176_v19, -3.4028235e+38  ;;  %vm443_vm2 = vcmp.eq.s32.totalorder %v3533_v25, 3 }
 0x14b   : > { %v2173_v57 = vsel %vm2172_vm9, %v2170_v56, %v2171_v8  ;;  %vm216_vm9 = vcmp.eq.s32.totalorder %v3512_v63, 0  ;;  %4759 = vst [vmem:[#allocation13_spill] sm:$0xff] %v3571_v28  ;;  %vm218_vm7 = vcmp.eq.s32.totalorder %v3554_v38, 0  ;;  %v222_v9 = vsel %vm214_vm4, %v174_v33, -3.4028235e+38 }
 0x14c   : > { %v2187_v62 = vsel %vm4752_vm10, %v2186_v16, %v2173_v57  ;;  %vm369_vm10 = vcmp.eq.s32.totalorder %v3512_v63, 2  ;;  %v3558_v24 = vsel %vm216_vm9, %v176_v19, -3.4028235e+38  ;;  %vm295_vm8 = vcmp.eq.s32.totalorder %v3554_v38, 1 }
 0x14d   : > { %vm2188_vm14 = vcmp.gt.s32.totalorder %v2187_v62, 0  ;;  %v3565_v13 = vsel %vm369_vm10, %v176_v19, -3.4028235e+38  ;;  %vm371_vm13 = vcmp.eq.s32.totalorder %v3554_v38, 2  ;;  %v3586_v36 = vsel %vm367_vm3, %v174_v33, -3.4028235e+38 }
 0x14e   : > { %v2189_v15 = vsel %vm2188_vm14, 1, %v2466_v0  ;;  %v3529_v0 = vsel %vm520_vm15, %v175_v61, -3.4028235e+38  ;;  %vm597_vm14 = vcmp.eq.s32.totalorder %v3512_v63, 5  ;;  %vm291_vm15 = vcmp.eq.s32.totalorder %v3533_v25, 1 }
 0x14f   : > { %2191 = vperm.xlu0 %2376, %v2189_v15   ;;  %4754 = vst [vmem:[#allocation8_spill] sm:$0xff] %v3529_v0  ;;  %v3577_v21 = vsel %vm597_vm14, %v176_v19, -3.4028235e+38  ;;  %v3584_v51 = vsel %vm291_vm15, %v174_v33, -3.4028235e+38  ;;  %vm519_vm1 = vcmp.eq.s32.totalorder %v3533_v25, 4 }
 0x150   : > { %4761 = vst [vmem:[#allocation15_spill] sm:$0xff] %v3577_v21  ;;  %vm447_vm0 = vcmp.eq.s32.totalorder %v3554_v38, 3  ;;  %v3590_v41 = vsel %vm443_vm2, %v174_v33, -3.4028235e+38  ;;  %vm595_vm9 = vcmp.eq.s32.totalorder %v3533_v25, 5  ;;  %vm217_vm11 = vcmp.eq.s32.totalorder %v3575_v27, 0 }
 0x151   : > { %v226_v43 = vsel %vm218_vm7, %v178_v39, -3.4028235e+38  ;;  %v303_v44 = vsel %vm295_vm8, %v178_v39, -3.4028235e+38  ;;  %v379_v6 = vsel %vm371_vm13, %v178_v39, -3.4028235e+38 }
 0x152   : > { %vm523_vm10 = vcmp.eq.s32.totalorder %v3554_v38, 4  ;;  %vm294_vm5 = vcmp.eq.s32.totalorder %v3575_v27, 1  ;;  %v3596_v5 = vsel %vm519_vm1, %v174_v33, -3.4028235e+38  ;;  %v3598_v46 = vsel %vm447_vm0, %v178_v39, -3.4028235e+38 }
 0x153   : > { %vm599_vm12 = vcmp.eq.s32.totalorder %v3554_v38, 5  ;;  %v3601_v37 = vsel %vm595_vm9, %v174_v33, -3.4028235e+38  ;;  %v230_v45 = vmax.f32 %v222_v9, %v226_v43  ;;  %v225_v10 = vsel %vm217_vm11, %v3582_v26, -3.4028235e+38  ;;  %v3671_v43 = vpop.permute.xlu0 %870 }
 0x154   : > { %4762 = vst [vmem:[#allocation16_spill] sm:$0xff] %v3601_v37  ;;  %vm370_vm14 = vcmp.eq.s32.totalorder %v3575_v27, 2  ;;  %v307_v49 = vmax.f32 %v3584_v51, %v303_v44  ;;  %v383_v2 = vmax.f32 %v3586_v36, %v379_v6  ;;  %v3611_v50 = vsel %vm523_vm10, %v178_v39, -3.4028235e+38 }
 0x155   : > { %v302_v12 = vsel %vm294_vm5, %v3582_v26, -3.4028235e+38  ;;  %v459_v11 = vmax.f32 %v3590_v41, %v3598_v46  ;;  %v3616_v3 = vsel %vm599_vm12, %v178_v39, -3.4028235e+38  ;;  %vm446_vm4 = vcmp.eq.s32.totalorder %v3575_v27, 3  ;;  %v3669_v41 = vpop.permute.xlu1 %873 }
 0x156   : > { %4765 = vst [vmem:[#allocation19_spill] sm:$0xff] %v3616_v3  ;;  %vm522_vm15 = vcmp.eq.s32.totalorder %v3575_v27, 4  ;;  %v229_v40 = vmax.f32 %v3537_v30, %v225_v10  ;;  %v378_v52 = vsel %vm370_vm14, %v3582_v26, -3.4028235e+38  ;;  %vm220_vm3 = vcmp.eq.s32.totalorder %v3605_v47, 0 }
 0x157   : > { %vm219_vm2 = vcmp.eq.s32.totalorder %v3607_v48, 0  ;;  %v306_v18 = vmax.f32 %v3541_v31, %v302_v12  ;;  %vm297_vm7 = vcmp.eq.s32.totalorder %v3605_v47, 1  ;;  %vm373_vm8 = vcmp.eq.s32.totalorder %v3605_v47, 2 }
 0x158   : > { %v454_v55 = vsel %vm446_vm4, %v3582_v26, -3.4028235e+38  ;;  %v3637_v4 = vsel %vm522_vm15, %v3582_v26, -3.4028235e+38  ;;  %vm296_vm13 = vcmp.eq.s32.totalorder %v3607_v48, 1  ;;  %vm372_vm1 = vcmp.eq.s32.totalorder %v3607_v48, 2 }
 0x159   : > { %v382_v56 = vmax.f32 %v3543_v32, %v378_v52  ;;  %v228_v8 = vsel %vm220_vm3, %v3623_v54, -3.4028235e+38  ;;  %vm449_vm0 = vcmp.eq.s32.totalorder %v3605_v47, 3  ;;  %v227_v16 = vsel %vm219_vm2, %v3627_v1, -3.4028235e+38 }
 0x15a   : > { %v233_v57 = vmax.f32 %v229_v40, %v230_v45  ;;  %v305_v61 = vsel %vm297_vm7, %v3623_v54, -3.4028235e+38  ;;  %v381_v62 = vsel %vm373_vm8, %v3623_v54, -3.4028235e+38  ;;  %vm448_vm9 = vcmp.eq.s32.totalorder %v3607_v48, 3  ;;  %v3711_v40 = vld [vmem:[%s3500_s28 + $0x40] sm:$0xff] }
 0x15b   : > { %v458_v15 = vmax.f32 %v3548_v34, %v454_v55  ;;  %vm525_vm11 = vcmp.eq.s32.totalorder %v3605_v47, 4  ;;  %v304_v60 = vsel %vm296_vm13, %v3627_v1, -3.4028235e+38  ;;  %v380_v19 = vsel %vm372_vm1, %v3627_v1, -3.4028235e+38  ;;  %4775 = vst [vmem:[#allocation29_spill] sm:$0xff] %v3711_v40  ;;  %v3721_v55 = vpop.permute.xlu1 %879 }
 0x15c   : > { %vm598_vm10 = vcmp.eq.s32.totalorder %v3575_v27, 5  ;;  %v232_v30 = vmax.f32 %v3558_v24, %v228_v8  ;;  %v457_v31 = vsel %vm449_vm0, %v3623_v54, -3.4028235e+38  ;;  %v231_v32 = vmax.f32 %v3515_v22, %v227_v16 }
 0x15d   : > { %v309_v33 = vmax.f32 %v3563_v14, %v305_v61  ;;  %v385_v39 = vmax.f32 %v3565_v13, %v381_v62  ;;  %v456_v34 = vsel %vm448_vm9, %v3627_v1, -3.4028235e+38  ;;  %vm524_vm5 = vcmp.eq.s32.totalorder %v3607_v48, 4  ;;  %v3735_v61 = vld [vmem:[%s3500_s28 + $0x58] sm:$0xff] }
 0x15e   : > { %v3661_v9 = vsel %vm525_vm11, %v3623_v54, -3.4028235e+38  ;;  %vm601_vm12 = vcmp.eq.s32.totalorder %v3605_v47, 5  ;;  %v308_v51 = vmax.f32 %v3520_v42, %v304_v60  ;;  %v384_v24 = vmax.f32 %v3522_v58, %v380_v19  ;;  %4777 = vst [vmem:[#allocation31_spill] sm:$0xff] %v3735_v61 }
 0x15f   : > { %4768 = vst [vmem:[#allocation22_spill] sm:$0xff] %v3661_v9  ;;  %v310_v36 = vmax.f32 %v306_v18, %v307_v49  ;;  %v386_v22 = vmax.f32 %v382_v56, %v383_v2  ;;  %v461_v13 = vmax.f32 %v3569_v29, %v457_v31  ;;  %v234_v44 = vmax.f32 %v231_v32, %v232_v30  ;;  %v3693_v49 = vld [vmem:[%s3500_s28 + $0x48] sm:$0xff]  ;;  %v3723_v56 = vpop.permute.xlu0 %876  ;;  %v3759_v31 = vld [vmem:[%s3500_s28 + $0x50] sm:$0xff] }
 0x160   : > { %v460_v6 = vmax.f32 %v3527_v53, %v456_v34  ;;  %v3675_v46 = vsel %vm524_vm5, %v3627_v1, -3.4028235e+38  ;;  %vm600_vm14 = vcmp.eq.s32.totalorder %v3607_v48, 5  ;;  %v3678_v42 = vmax.f32 %v458_v15, %v459_v11  ;;  %4772 = vst [vmem:[#allocation26_spill] sm:$0xff] %v3693_v49  ;;  %4778 = vst [vmem:[#allocation32_spill] sm:$0xff] %v3759_v31 }
 0x161   : > { %4769 = vst [vmem:[#allocation23_spill] sm:$0xff] %v3675_v46  ;;  %v3683_v58 = vsel %vm598_vm10, %v3582_v26, -3.4028235e+38  ;;  %v3690_v53 = vsel %vm601_vm12, %v3623_v54, -3.4028235e+38  ;;  %v311_v45 = vmax.f32 %v308_v51, %v309_v33  ;;  %v387_v10 = vmax.f32 %v384_v24, %v385_v39  ;;  %v3779_v24 = vpop.permute.xlu1 %885 }
 0x162   : > { %4770 = vst [vmem:[#allocation24_spill] sm:$0xff] %v3683_v58  ;;  %4771 = vst [vmem:[#allocation25_spill] sm:$0xff] %v3690_v53  ;;  %vm894_vm4 = vcmp.eq.s32.totalorder %v3669_v41, 0  ;;  %vm970_vm15 = vcmp.eq.s32.totalorder %v3669_v41, 1  ;;  %v3700_v2 = vsel %vm600_vm14, %v3627_v1, -3.4028235e+38  ;;  %v3704_v12 = vmax.f32 %v233_v57, %v234_v44 }
 0x163   : > { %4773 = vst [vmem:[#allocation27_spill] sm:$0xff] %v3700_v2  ;;  %vm1046_vm3 = vcmp.eq.s32.totalorder %v3669_v41, 2  ;;  %vm1122_vm2 = vcmp.eq.s32.totalorder %v3669_v41, 3  ;;  %v3706_v11 = vmax.f32 %v460_v6, %v461_v13  ;;  %vm1198_vm7 = vcmp.eq.s32.totalorder %v3669_v41, 4  ;;  %v3792_v44 = vld [vmem:[%s3500_s28 + $0x68] sm:$0xff]  ;;  %v3795_v6 = vld [vmem:[%s3500_s28 + $0x60] sm:$0xff] }
 0x164   : > { %4774 = vst [vmem:[#allocation28_spill] sm:$0xff] %v3704_v12  ;;  %vm1274_vm8 = vcmp.eq.s32.totalorder %v3669_v41, 5  ;;  %v3714_v52 = vsel %vm894_vm4, %v3693_v49, -3.4028235e+38  ;;  %v3717_v18 = vsel %vm970_vm15, %v3693_v49, -3.4028235e+38  ;;  %v3725_v8 = vmax.f32 %v310_v36, %v311_v45  ;;  %v3781_v36 = vpop.permute.xlu0 %882 }
 0x165   : > { %vm893_vm13 = vcmp.eq.s32.totalorder %v3671_v43, 0  ;;  %vm969_vm1 = vcmp.eq.s32.totalorder %v3671_v43, 1  ;;  %v3728_v16 = vsel %vm1046_vm3, %v3693_v49, -3.4028235e+38  ;;  %v3731_v57 = vsel %vm1122_vm2, %v3693_v49, -3.4028235e+38  ;;  %v3845_v58 = vpop.permute.xlu1 %891 }
 0x166   : > { %4776 = vst [vmem:[#allocation30_spill] sm:$0xff] %v3725_v8  ;;  %vm1045_vm0 = vcmp.eq.s32.totalorder %v3671_v43, 2  ;;  %v3738_v62 = vsel %vm1198_vm7, %v3693_v49, -3.4028235e+38  ;;  %v3741_v15 = vsel %vm1274_vm8, %v3693_v49, -3.4028235e+38  ;;  %v3761_v32 = vmax.f32 %v386_v22, %v387_v10 }
 0x167   : > { %vm1121_vm9 = vcmp.eq.s32.totalorder %v3671_v43, 3  ;;  %vm1197_vm11 = vcmp.eq.s32.totalorder %v3671_v43, 4  ;;  %v3746_v60 = vsel %vm893_vm13, %v3711_v40, -3.4028235e+38  ;;  %v3749_v19 = vsel %vm969_vm1, %v3711_v40, -3.4028235e+38 }
 0x168   : > { %vm1273_vm10 = vcmp.eq.s32.totalorder %v3671_v43, 5  ;;  %vm896_vm5 = vcmp.eq.s32.totalorder %v3721_v55, 0  ;;  %v3754_v30 = vsel %vm1045_vm0, %v3711_v40, -3.4028235e+38  ;;  %vm972_vm12 = vcmp.eq.s32.totalorder %v3721_v55, 1  ;;  %4779 = vst [vmem:[#allocation33_spill] sm:$0xff] %v3761_v32  ;;  %v3861_v0 = vpop.permute.xlu0 %888 }
 0x169   : > { %vm1048_vm14 = vcmp.eq.s32.totalorder %v3721_v55, 2  ;;  %v3764_v33 = vsel %vm1121_vm9, %v3711_v40, -3.4028235e+38  ;;  %v3767_v39 = vsel %vm1197_vm11, %v3711_v40, -3.4028235e+38  ;;  %vm1124_vm4 = vcmp.eq.s32.totalorder %v3721_v55, 3  ;;  %v3927_v28 = vpop.permute.xlu1 %1546 }
 0x16a   : > { %vm1200_vm15 = vcmp.eq.s32.totalorder %v3721_v55, 4  ;;  %v3772_v34 = vsel %vm1273_vm10, %v3711_v40, -3.4028235e+38  ;;  %v3775_v51 = vsel %vm896_vm5, %v3735_v61, -3.4028235e+38  ;;  %vm1276_vm3 = vcmp.eq.s32.totalorder %v3721_v55, 5 }
 0x16b   : > { %vm895_vm2 = vcmp.eq.s32.totalorder %v3723_v56, 0  ;;  %v3784_v22 = vsel %vm972_vm12, %v3735_v61, -3.4028235e+38  ;;  %v3787_v13 = vsel %vm1048_vm14, %v3735_v61, -3.4028235e+38  ;;  %vm971_vm7 = vcmp.eq.s32.totalorder %v3723_v56, 1 }
 0x16c   : > { %vm1047_vm8 = vcmp.eq.s32.totalorder %v3723_v56, 2  ;;  %4780 = vst [vmem:[#allocation34_spill] sm:$0xff] %v3792_v44  ;;  %4781 = vst [vmem:[#allocation35_spill] sm:$0xff] %v3795_v6  ;;  %v3798_v45 = vsel %vm1124_vm4, %v3735_v61, -3.4028235e+38  ;;  %vm1123_vm13 = vcmp.eq.s32.totalorder %v3723_v56, 3  ;;  %v3834_v20 = vmax.f32 %v3678_v42, %v3706_v11 }
 0x16d   : > { %v3801_v10 = vsel %vm1200_vm15, %v3735_v61, -3.4028235e+38  ;;  %vm1199_vm1 = vcmp.eq.s32.totalorder %v3723_v56, 4  ;;  %v3806_v26 = vsel %vm1276_vm3, %v3735_v61, -3.4028235e+38  ;;  %vm898_vm0 = vcmp.eq.s32.totalorder %v3779_v24, 0 }
 0x16e   : > { %v3809_v29 = vsel %vm895_vm2, %v3759_v31, -3.4028235e+38  ;;  %vm897_vm9 = vcmp.eq.s32.totalorder %v3781_v36, 0  ;;  %v3814_v14 = vsel %vm971_vm7, %v3759_v31, -3.4028235e+38  ;;  %vm974_vm11 = vcmp.eq.s32.totalorder %v3779_v24, 1 }
 0x16f   : > { %v3817_v17 = vsel %vm1047_vm8, %v3759_v31, -3.4028235e+38  ;;  %vm1050_vm10 = vcmp.eq.s32.totalorder %v3779_v24, 2  ;;  %v3822_v54 = vsel %vm1123_vm13, %v3759_v31, -3.4028235e+38  ;;  %vm1126_vm5 = vcmp.eq.s32.totalorder %v3779_v24, 3 }
 0x170   : > { %v3825_v1 = vsel %vm1199_vm1, %v3759_v31, -3.4028235e+38  ;;  %vm973_vm12 = vcmp.eq.s32.totalorder %v3781_v36, 1  ;;  %v906_v21 = vsel %vm898_vm0, %v3792_v44, -3.4028235e+38  ;;  %vm1202_vm14 = vcmp.eq.s32.totalorder %v3779_v24, 4 }
 0x171   : > { %v905_v53 = vsel %vm897_vm9, %v3795_v6, -3.4028235e+38  ;;  %4782 = vst [vmem:[#allocation36_spill] sm:$0xff] %v3834_v20  ;;  %vm1275_vm4 = vcmp.eq.s32.totalorder %v3723_v56, 5  ;;  %v982_v2 = vsel %vm974_vm11, %v3792_v44, -3.4028235e+38  ;;  %v4783_v42 = vmax.f32 %v3596_v5, %v3611_v50 }
 0x172   : > { %v1058_v37 = vsel %vm1050_vm10, %v3792_v44, -3.4028235e+38  ;;  %vm1049_vm15 = vcmp.eq.s32.totalorder %v3781_v36, 2  ;;  %v3841_v3 = vsel %vm1126_vm5, %v3792_v44, -3.4028235e+38  ;;  %vm1125_vm3 = vcmp.eq.s32.totalorder %v3781_v36, 3 }
 0x173   : > { %v981_v23 = vsel %vm973_vm12, %v3795_v6, -3.4028235e+38  ;;  %v4784_v11 = vmax.f32 %v3550_v35, %v3637_v4  ;;  %v910_v48 = vmax.f32 %v3714_v52, %v906_v21  ;;  %v3857_v63 = vsel %vm1202_vm14, %v3792_v44, -3.4028235e+38  ;;  %4788 = vst [vmem:[#allocation40_spill] sm:$0xff] %v3927_v28 }
 0x174   : > { %vm1278_vm2 = vcmp.eq.s32.totalorder %v3779_v24, 5  ;;  %v909_v46 = vmax.f32 %v3746_v60, %v905_v53  ;;  %v3864_v9 = vsel %vm1275_vm4, %v3759_v31, -3.4028235e+38  ;;  %v986_v5 = vmax.f32 %v3717_v18, %v982_v2  ;;  %v3876_v53 = vld [vmem:[%s3500_s28 + $0x78] sm:$0xff] }
 0x175   : > { %v3853_v47 = vmax.f32 %v4784_v11, %v4783_v42  ;;  %v1062_v35 = vmax.f32 %v3728_v16, %v1058_v37  ;;  %v1057_v50 = vsel %vm1049_vm15, %v3795_v6, -3.4028235e+38  ;;  %v985_v4 = vmax.f32 %v3749_v19, %v981_v23  ;;  %4786 = vst [vmem:[#allocation38_spill] sm:$0xff] %v3876_v53  ;;  %v3886_v37 = vld [vmem:[%s3500_s28 + $0x70] sm:$0xff] }
 0x176   : > { %v3873_v52 = vsel %vm1125_vm3, %v3795_v6, -3.4028235e+38  ;;  %vm900_vm7 = vcmp.eq.s32.totalorder %v3845_v58, 0  ;;  %v3882_v2 = vsel %vm1278_vm2, %v3792_v44, -3.4028235e+38  ;;  %vm1201_vm8 = vcmp.eq.s32.totalorder %v3781_v36, 4 }
 0x177   : > { %4785 = vst [vmem:[#allocation37_spill] sm:$0xff] %v3853_v47  ;;  %4787 = vst [vmem:[#allocation39_spill] sm:$0xff] %v3886_v37  ;;  %vm899_vm13 = vcmp.eq.s32.totalorder %v3861_v0, 0  ;;  %v3889_v23 = vmax.f32 %v909_v46, %v910_v48  ;;  %v1061_v18 = vmax.f32 %v3754_v30, %v1057_v50  ;;  %vm976_vm1 = vcmp.eq.s32.totalorder %v3845_v58, 1 }
 0x178   : > { %vm975_vm0 = vcmp.eq.s32.totalorder %v3861_v0, 1  ;;  %v908_v19 = vsel %vm900_vm7, %v3876_v53, -3.4028235e+38  ;;  %vm1052_vm9 = vcmp.eq.s32.totalorder %v3845_v58, 2  ;;  %vm1051_vm11 = vcmp.eq.s32.totalorder %v3861_v0, 2 }
 0x179   : > { %v3899_v42 = vmax.f32 %v985_v4, %v986_v5  ;;  %v3902_v48 = vsel %vm1201_vm8, %v3795_v6, -3.4028235e+38  ;;  %vm1128_vm10 = vcmp.eq.s32.totalorder %v3845_v58, 3  ;;  %v907_v46 = vsel %vm899_vm13, %v3886_v37, -3.4028235e+38 }
 0x17a   : > { %vm1277_vm5 = vcmp.eq.s32.totalorder %v3781_v36, 5  ;;  %v984_v30 = vsel %vm976_vm1, %v3876_v53, -3.4028235e+38  ;;  %vm1204_vm12 = vcmp.eq.s32.totalorder %v3845_v58, 4  ;;  %v983_v11 = vsel %vm975_vm0, %v3886_v37, -3.4028235e+38 }
 0x17b   : > { %v912_v50 = vmax.f32 %v3775_v51, %v908_v19  ;;  %v1060_v5 = vsel %vm1052_vm9, %v3876_v53, -3.4028235e+38  ;;  %v1059_v4 = vsel %vm1051_vm11, %v3886_v37, -3.4028235e+38  ;;  %vm1127_vm14 = vcmp.eq.s32.totalorder %v3861_v0, 3 }
 0x17c   : > { %v3915_v60 = vsel %vm1128_vm10, %v3876_v53, -3.4028235e+38  ;;  %vm1280_vm4 = vcmp.eq.s32.totalorder %v3845_v58, 5  ;;  %v911_v16 = vmax.f32 %v3809_v29, %v907_v46  ;;  %vm1203_vm15 = vcmp.eq.s32.totalorder %v3861_v0, 4 }
 0x17d   : > { %v988_v51 = vmax.f32 %v3784_v22, %v984_v30  ;;  %v3924_v19 = vsel %vm1204_vm12, %v3876_v53, -3.4028235e+38  ;;  %v987_v47 = vmax.f32 %v3814_v14, %v983_v11  ;;  %v3929_v27 = vmax.f32 %v1061_v18, %v1062_v35  ;;  %v3953_v18 = vld [vmem:[%s3500_s28 + $0x88] sm:$0xff]  ;;  %v3956_v11 = vpop.permute.xlu0 %1543 }
 0x17e   : > { %v1064_v38 = vmax.f32 %v3787_v13, %v1060_v5  ;;  %v1063_v29 = vmax.f32 %v3817_v17, %v1059_v4  ;;  %v3934_v46 = vsel %vm1127_vm14, %v3886_v37, -3.4028235e+38  ;;  %v3939_v22 = vsel %vm1277_vm5, %v3795_v6, -3.4028235e+38  ;;  %4789 = vst [vmem:[#allocation41_spill] sm:$0xff] %v3953_v18  ;;  %4790 = vst [vmem:[#allocation42_spill] sm:$0xff] %v3956_v11 }
 0x17f   : > { %v3944_v14 = vsel %vm1280_vm4, %v3876_v53, -3.4028235e+38  ;;  %v3947_v35 = vsel %vm1203_vm15, %v3886_v37, -3.4028235e+38  ;;  %v914_v13 = vmax.f32 %v911_v16, %v912_v50  ;;  %vm1279_vm3 = vcmp.eq.s32.totalorder %v3861_v0, 5  ;;  %v3971_v50 = vld [vmem:[%s3500_s28 + $0x80] sm:$0xff] }
 0x180   : > { %vm1567_vm2 = vcmp.eq.s32.totalorder %v3927_v28, 0  ;;  %v3958_v5 = vmax.f32 %v987_v47, %v988_v51  ;;  %v1139_v4 = vmax.f32 %v3822_v54, %v3934_v46  ;;  %vm1643_vm7 = vcmp.eq.s32.totalorder %v3927_v28, 1  ;;  %4791 = vst [vmem:[#allocation43_spill] sm:$0xff] %v3971_v50  ;;  %v3992_v46 = vld [vmem:[%s3500_s28 + $0x98] sm:$0xff] }
 0x181   : > { %vm1719_vm8 = vcmp.eq.s32.totalorder %v3927_v28, 2  ;;  %v3964_v17 = vmax.f32 %v1063_v29, %v1064_v38  ;;  %vm1795_vm13 = vcmp.eq.s32.totalorder %v3927_v28, 3  ;;  %vm1871_vm1 = vcmp.eq.s32.totalorder %v3927_v28, 4  ;;  %v3981_v38 = vpop.permute.xlu1 %1552  ;;  %4793 = vst [vmem:[#allocation45_spill] sm:$0xff] %v3992_v46  ;;  %v4010_v7 = vpop.permute.xlu0 %1549 }
 0x182   : > { %v3974_v47 = vsel %vm1279_vm3, %v3886_v37, -3.4028235e+38  ;;  %v3977_v54 = vsel %vm1567_vm2, %v3953_v18, -3.4028235e+38  ;;  %vm1947_vm0 = vcmp.eq.s32.totalorder %v3927_v28, 5  ;;  %vm1566_vm9 = vcmp.eq.s32.totalorder %v3956_v11, 0 }
 0x183   : > { %4792 = vst [vmem:[#allocation44_spill] sm:$0xff] %v3981_v38  ;;  %v3984_v51 = vsel %vm1643_vm7, %v3953_v18, -3.4028235e+38  ;;  %v3987_v29 = vsel %vm1719_vm8, %v3953_v18, -3.4028235e+38  ;;  %vm1642_vm11 = vcmp.eq.s32.totalorder %v3956_v11, 1  ;;  %v4060_v37 = vmax.f32 %v3889_v23, %v914_v13 }
 0x184   : > { %vm1718_vm10 = vcmp.eq.s32.totalorder %v3956_v11, 2  ;;  %v3995_v16 = vsel %vm1795_vm13, %v3953_v18, -3.4028235e+38  ;;  %v3998_v21 = vsel %vm1871_vm1, %v3953_v18, -3.4028235e+38  ;;  %vm1794_vm5 = vcmp.eq.s32.totalorder %v3956_v11, 3 }
 0x185   : > { %4794 = vst [vmem:[#allocation46_spill] sm:$0xff] %v3995_v16  ;;  %4795 = vst [vmem:[#allocation47_spill] sm:$0xff] %v3998_v21  ;;  %vm1870_vm12 = vcmp.eq.s32.totalorder %v3956_v11, 4  ;;  %v4003_v30 = vsel %vm1947_vm0, %v3953_v18, -3.4028235e+38  ;;  %vm1946_vm14 = vcmp.eq.s32.totalorder %v3956_v11, 5  ;;  %v4039_v8 = vpop.permute.xlu1 %1558  ;;  %v4070_v6 = vpop.permute.xlu0 %1555  ;;  %v4811_v13 = vmax.f32 %v3798_v45, %v3915_v60 }
 0x186   : > { %4796 = vst [vmem:[#allocation48_spill] sm:$0xff] %v4003_v30  ;;  %v4006_v28 = vsel %vm1566_vm9, %v3971_v50, -3.4028235e+38  ;;  %vm1569_vm4 = vcmp.eq.s32.totalorder %v3981_v38, 0  ;;  %4797 = vst [vmem:[#allocation49_spill] sm:$0xff] %v4010_v7  ;;  %vm1645_vm15 = vcmp.eq.s32.totalorder %v3981_v38, 1  ;;  %v4096_v49 = vmax.f32 %v3899_v42, %v3958_v5 }
 0x187   : > { %v4013_v20 = vsel %vm1642_vm11, %v3971_v50, -3.4028235e+38  ;;  %v4016_v32 = vsel %vm1718_vm10, %v3971_v50, -3.4028235e+38  ;;  %vm1721_vm3 = vcmp.eq.s32.totalorder %v3981_v38, 2  ;;  %v4021_v18 = vld [vmem:[%s3500_s28 + $0x90] sm:$0xff]  ;;  %v4814_v45 = vmax.f32 %v3731_v57, %v3841_v3 }
 0x188   : > { %4798 = vst [vmem:[#allocation50_spill] sm:$0xff] %v4021_v18  ;;  %v4024_v30 = vsel %vm1794_vm5, %v3971_v50, -3.4028235e+38  ;;  %v4027_v11 = vsel %vm1870_vm12, %v3971_v50, -3.4028235e+38  ;;  %vm1797_vm2 = vcmp.eq.s32.totalorder %v3981_v38, 3  ;;  %v4815_v60 = vmax.f32 %v3764_v33, %v3873_v52 }
 0x189   : > { %4799 = vst [vmem:[#allocation51_spill] sm:$0xff] %v4024_v30  ;;  %4800 = vst [vmem:[#allocation52_spill] sm:$0xff] %v4027_v11  ;;  %vm1873_vm7 = vcmp.eq.s32.totalorder %v3981_v38, 4  ;;  %v4032_v25 = vsel %vm1946_vm14, %v3971_v50, -3.4028235e+38  ;;  %vm1949_vm8 = vcmp.eq.s32.totalorder %v3981_v38, 5  ;;  %v4118_v5 = vmax.f32 %v3929_v27, %v3964_v17  ;;  %v4123_v57 = vpop.permute.xlu1 %1564 }
 0x18a   : > { %4801 = vst [vmem:[#allocation53_spill] sm:$0xff] %v4032_v25  ;;  %v4035_v59 = vsel %vm1569_vm4, %v3992_v46, -3.4028235e+38  ;;  %vm1568_vm13 = vcmp.eq.s32.totalorder %v4010_v7, 0  ;;  %4802 = vst [vmem:[#allocation54_spill] sm:$0xff] %v4039_v8  ;;  %vm1644_vm1 = vcmp.eq.s32.totalorder %v4010_v7, 1  ;;  %v1289_v11 = vmax.f32 %v3772_v34, %v3939_v22 }
 0x18b   : > { %v4042_v12 = vsel %vm1645_vm15, %v3992_v46, -3.4028235e+38  ;;  %v4045_v53 = vsel %vm1721_vm3, %v3992_v46, -3.4028235e+38  ;;  %vm1720_vm0 = vcmp.eq.s32.totalorder %v4010_v7, 2  ;;  %vm1796_vm9 = vcmp.eq.s32.totalorder %v4010_v7, 3 }
 0x18c   : > { %v4050_v50 = vsel %vm1797_vm2, %v3992_v46, -3.4028235e+38  ;;  %v4053_v25 = vsel %vm1873_vm7, %v3992_v46, -3.4028235e+38  ;;  %v4057_v38 = vld [vmem:[%s3500_s28 + $0xa8] sm:$0xff]  ;;  %vm1571_vm11 = vcmp.eq.s32.totalorder %v4039_v8, 0 }
 0x18d   : > { %4803 = vst [vmem:[#allocation55_spill] sm:$0xff] %v4050_v50  ;;  %4804 = vst [vmem:[#allocation56_spill] sm:$0xff] %v4053_v25  ;;  %v4063_v44 = vsel %vm1949_vm8, %v3992_v46, -3.4028235e+38  ;;  %v4066_v61 = vsel %vm1568_vm13, %v4021_v18, -3.4028235e+38  ;;  %v1142_v46 = vmax.f32 %v1139_v4, %v4811_v13  ;;  %v1141_v4 = vmax.f32 %v4815_v60, %v4814_v45 }
 0x18e   : > { %4805 = vst [vmem:[#allocation57_spill] sm:$0xff] %v4057_v38  ;;  %4806 = vst [vmem:[#allocation58_spill] sm:$0xff] %v4063_v44  ;;  %vm1647_vm10 = vcmp.eq.s32.totalorder %v4039_v8, 1  ;;  %v4073_v25 = vsel %vm1644_vm1, %v4021_v18, -3.4028235e+38  ;;  %vm1723_vm5 = vcmp.eq.s32.totalorder %v4039_v8, 2 }
 0x18f   : > { %4807 = vst [vmem:[#allocation59_spill] sm:$0xff] %v4070_v6  ;;  %4808 = vst [vmem:[#allocation60_spill] sm:$0xff] %v4073_v25  ;;  %v4076_v31 = vsel %vm1720_vm0, %v4021_v18, -3.4028235e+38  ;;  %vm1799_vm12 = vcmp.eq.s32.totalorder %v4039_v8, 3  ;;  %vm1872_vm14 = vcmp.eq.s32.totalorder %v4010_v7, 4  ;;  %v4125_v33 = vmax.f32 %v1141_v4, %v1142_v46 }
 0x190   : > { %4809 = vst [vmem:[#allocation61_spill] sm:$0xff] %v4076_v31  ;;  %v4081_v23 = vsel %vm1796_vm9, %v4021_v18, -3.4028235e+38  ;;  %vm1948_vm4 = vcmp.eq.s32.totalorder %v4010_v7, 5  ;;  %v1579_v44 = vsel %vm1571_vm11, %v4057_v38, -3.4028235e+38 }
 0x191   : > { %4810 = vst [vmem:[#allocation62_spill] sm:$0xff] %v4081_v23  ;;  %v1655_v25 = vsel %vm1647_vm10, %v4057_v38, -3.4028235e+38  ;;  %v4091_v31 = vld [vmem:[%s3500_s28 + $0xa0] sm:$0xff]  ;;  %vm1570_vm15 = vcmp.eq.s32.totalorder %v4070_v6, 0  ;;  %vm1646_vm3 = vcmp.eq.s32.totalorder %v4070_v6, 1  ;;  %v1583_v40 = vmax.f32 %v3977_v54, %v1579_v44  ;;  %v4132_v44 = vpop.permute.xlu0 %1561 }
 0x192   : > { %4812 = vst [vmem:[#allocation63_spill] sm:$0xff] %v4091_v31  ;;  %v1731_v23 = vsel %vm1723_vm5, %v4057_v38, -3.4028235e+38  ;;  %v4100_v7 = vsel %vm1799_vm12, %v4057_v38, -3.4028235e+38  ;;  %vm1722_vm2 = vcmp.eq.s32.totalorder %v4070_v6, 2  ;;  %v1659_v52 = vmax.f32 %v3984_v51, %v1655_v25 }
 0x193   : > { %4813 = vst [vmem:[#allocation64_spill] sm:$0xff] %v4100_v7  ;;  %v4110_v13 = vsel %vm1872_vm14, %v4021_v18, -3.4028235e+38  ;;  %v4113_v42 = vsel %vm1948_vm4, %v4021_v18, -3.4028235e+38  ;;  %vm1875_vm7 = vcmp.eq.s32.totalorder %v4039_v8, 4  ;;  %v1735_v45 = vmax.f32 %v3987_v29, %v1731_v23 }
 0x194   : > { %4816 = vst [vmem:[#allocation65_spill] sm:$0xff] %v4113_v42  ;;  %v1578_v3 = vsel %vm1570_vm15, %v4091_v31, -3.4028235e+38  ;;  %v1654_v17 = vsel %vm1646_vm3, %v4091_v31, -3.4028235e+38  ;;  %vm1951_vm8 = vcmp.eq.s32.totalorder %v4039_v8, 5  ;;  %v4826_v8 = vmax.f32 %v3825_v1, %v3947_v35 }
 0x195   : > { %v1730_v54 = vsel %vm1722_vm2, %v4091_v31, -3.4028235e+38  ;;  %vm1798_vm13 = vcmp.eq.s32.totalorder %v4070_v6, 3  ;;  %vm1874_vm1 = vcmp.eq.s32.totalorder %v4070_v6, 4  ;;  %v4139_v25 = vsel %vm1875_vm7, %v4057_v38, -3.4028235e+38 }
 0x196   : > { %4817 = vst [vmem:[#allocation66_spill] sm:$0xff] %v4139_v25  ;;  %v1582_v51 = vmax.f32 %v4006_v28, %v1578_v3  ;;  %v4143_v29 = vld [vmem:[%s3500_s28 + $0xb8] sm:$0xff]  ;;  %vm1573_vm0 = vcmp.eq.s32.totalorder %v4123_v57, 0  ;;  %vm1649_vm9 = vcmp.eq.s32.totalorder %v4123_v57, 1  ;;  %v1658_v46 = vmax.f32 %v4013_v20, %v1654_v17  ;;  %v4151_v23 = vld [vmem:[%s3500_s28 + $0xb0] sm:$0xff] }
 0x197   : > { %vm1725_vm11 = vcmp.eq.s32.totalorder %v4123_v57, 2  ;;  %vm1801_vm10 = vcmp.eq.s32.totalorder %v4123_v57, 3  ;;  %vm1572_vm5 = vcmp.eq.s32.totalorder %v4132_v44, 0  ;;  %v4155_v60 = vsel %vm1951_vm8, %v4057_v38, -3.4028235e+38 }
 0x198   : > { %4818 = vst [vmem:[#allocation67_spill] sm:$0xff] %v4155_v60  ;;  %v1734_v28 = vmax.f32 %v4016_v32, %v1730_v54  ;;  %v4159_v4 = vsel %vm1798_vm13, %v4091_v31, -3.4028235e+38  ;;  %v4162_v3 = vsel %vm1874_vm1, %v4091_v31, -3.4028235e+38  ;;  %vm1950_vm12 = vcmp.eq.s32.totalorder %v4070_v6, 5 }
 0x199   : > { %4819 = vst [vmem:[#allocation68_spill] sm:$0xff] %v4159_v4  ;;  %4820 = vst [vmem:[#allocation69_spill] sm:$0xff] %v4162_v3  ;;  %v4168_v17 = vsel %vm1573_vm0, %v4143_v29, -3.4028235e+38  ;;  %v4171_v27 = vsel %vm1649_vm9, %v4143_v29, -3.4028235e+38  ;;  %v4174_v32 = vmax.f32 %v1582_v51, %v1583_v40  ;;  %v4187_v18 = vmax.f32 %v1658_v46, %v1659_v52 }
 0x19a   : > { %vm1349_vm14 = vcmp.eq.s32.totalorder %v3671_v43, 6  ;;  %v4177_v54 = vsel %vm1725_vm11, %v4143_v29, -3.4028235e+38  ;;  %v4180_v38 = vsel %vm1801_vm10, %v4143_v29, -3.4028235e+38  ;;  %vm1350_vm4 = vcmp.eq.s32.totalorder %v3669_v41, 6 }
 0x19b   : > { %4821 = vst [vmem:[#allocation70_spill] sm:$0xff] %v4180_v38  ;;  %v4183_v20 = vsel %vm1572_vm5, %v4151_v23, -3.4028235e+38  ;;  %vm1351_vm15 = vcmp.eq.s32.totalorder %v3723_v56, 6  ;;  %vm1648_vm3 = vcmp.eq.s32.totalorder %v4132_v44, 1  ;;  %vm1353_vm2 = vcmp.eq.s32.totalorder %v3781_v36, 6 }
 0x19c   : > { %v4195_v51 = vmax.f32 %v1734_v28, %v1735_v45  ;;  %v4200_v60 = vsel %vm1950_vm12, %v4091_v31, -3.4028235e+38  ;;  %vm1352_vm7 = vcmp.eq.s32.totalorder %v3721_v55, 6  ;;  %vm1354_vm8 = vcmp.eq.s32.totalorder %v3779_v24, 6 }
 0x19d   : > { %4822 = vst [vmem:[#allocation71_spill] sm:$0xff] %v4200_v60  ;;  %vm1724_vm13 = vcmp.eq.s32.totalorder %v4132_v44, 2  ;;  %vm1355_vm1 = vcmp.eq.s32.totalorder %v3861_v0, 6  ;;  %v4217_v42 = vsel %vm1648_vm3, %v4151_v23, -3.4028235e+38  ;;  %v916_v46 = vrot.slane %v4060_v37, 4 }
 0x19e   : > { %v992_v52 = vrot.slane %v4096_v49, 4  ;;  %v1068_v31 = vrot.slane %v4118_v5, 4  ;;  %vm1356_vm0 = vcmp.eq.s32.totalorder %v3845_v58, 6  ;;  %v1144_v45 = vrot.slane %v4125_v33, 4 }
 0x19f   : > { %v4823_v40 = vmax.f32 %v3738_v62, %v3857_v63  ;;  %v4824_v28 = vmax.f32 %v3767_v39, %v3902_v48  ;;  %v4825_v6 = vmax.f32 %v3801_v10, %v3924_v19  ;;  %v917_v25 = vmax.f32 %v4060_v37, %v916_v46  ;;  %v4830_v46 = vld [vmem:[#allocation35_spill] sm:$0xff] }
 0x1a0   : > { %v993_v21 = vmax.f32 %v4096_v49, %v992_v52  ;;  %v1069_v63 = vmax.f32 %v4118_v5, %v1068_v31  ;;  %v1290_v62 = vmax.f32 %v3741_v15, %v3882_v2  ;;  %v1145_v39 = vmax.f32 %v4125_v33, %v1144_v45 }
 0x1a1   : > { %v1217_v60 = vmax.f32 %v4824_v28, %v4823_v40  ;;  %v1218_v3 = vmax.f32 %v4826_v8, %v4825_v6  ;;  %v1291_v10 = vmax.f32 %v3864_v9, %v3974_v47  ;;  %v1292_v1 = vmax.f32 %v3806_v26, %v3944_v14  ;;  %v4827_v47 = vld [vmem:[#allocation29_spill] sm:$0xff] }
 0x1a2   : > { %v4251_v8 = vsel %vm1724_vm13, %v4151_v23, -3.4028235e+38  ;;  %v918_v49 = vrot.slane %v917_v25, 2  ;;  %v994_v34 = vrot.slane %v993_v21, 2  ;;  %v1070_v31 = vrot.slane %v1069_v63, 2 }
 0x1a3   : > { %v1219_v48 = vmax.f32 %v1217_v60, %v1218_v3  ;;  %vm1426_vm9 = vcmp.eq.s32.totalorder %v3669_v41, 7  ;;  %vm1428_vm11 = vcmp.eq.s32.totalorder %v3721_v55, 7  ;;  %v1146_v15 = vrot.slane %v1145_v39, 2  ;;  %v4828_v60 = vld [vmem:[#allocation26_spill] sm:$0xff]  ;;  %v4829_v3 = vld [vmem:[#allocation32_spill] sm:$0xff] }
 0x1a4   : > { %v1293_v2 = vmax.f32 %v1289_v11, %v1290_v62  ;;  %v1294_v37 = vmax.f32 %v1291_v10, %v1292_v1  ;;  %vm1430_vm10 = vcmp.eq.s32.totalorder %v3779_v24, 7  ;;  %v919_v9 = vmax.f32 %v917_v25, %v918_v49  ;;  %v4831_v62 = vld [vmem:[#allocation31_spill] sm:$0xff] }
 0x1a5   : > { %v1220_v6 = vrot.slane %v1219_v48, 4  ;;  %v995_v26 = vmax.f32 %v993_v21, %v994_v34  ;;  %v1071_v19 = vmax.f32 %v1069_v63, %v1070_v31  ;;  %v1147_v22 = vmax.f32 %v1145_v39, %v1146_v15  ;;  %v4833_v31 = vld [vmem:[#allocation39_spill] sm:$0xff] }
 0x1a6   : > { %v1295_v35 = vmax.f32 %v1293_v2, %v1294_v37  ;;  %v1357_v5 = vsel %vm1349_vm14, %v4827_v47, -3.4028235e+38  ;;  %vm1432_vm5 = vcmp.eq.s32.totalorder %v3845_v58, 7  ;;  %v920_v33 = vrot.slane %v919_v9, 1 }
 0x1a7   : > { %v1221_v14 = vmax.f32 %v1219_v48, %v1220_v6  ;;  %v1358_v11 = vsel %vm1350_vm4, %v4828_v60, -3.4028235e+38  ;;  %v1359_v25 = vsel %vm1351_vm15, %v4829_v3, -3.4028235e+38  ;;  %v996_v21 = vrot.slane %v995_v26, 1  ;;  %v4832_v48 = vld [vmem:[#allocation34_spill] sm:$0xff] }
 0x1a8   : > { %v1296_v52 = vrot.slane %v1295_v35, 4  ;;  %v1361_v45 = vsel %vm1353_vm2, %v4830_v46, -3.4028235e+38  ;;  %v1072_v28 = vrot.slane %v1071_v19, 1  ;;  %v1148_v63 = vrot.slane %v1147_v22, 1  ;;  %v4834_v6 = vld [vmem:[#allocation38_spill] sm:$0xff] }
 0x1a9   : > { %v1222_v40 = vrot.slane %v1221_v14, 2  ;;  %v1360_v39 = vsel %vm1352_vm7, %v4831_v62, -3.4028235e+38  ;;  %v1362_v10 = vsel %vm1354_vm8, %v4832_v48, -3.4028235e+38  ;;  %vm1877_vm12 = vcmp.eq.s32.totalorder %v4123_v57, 4 }
 0x1aa   : > { %vm1800_vm14 = vcmp.eq.s32.totalorder %v4132_v44, 3  ;;  %v921_v1 = vmax.f32 %v919_v9, %v920_v33  ;;  %v1297_v34 = vmax.f32 %v1295_v35, %v1296_v52  ;;  %v1363_v15 = vsel %vm1355_vm1, %v4833_v31, -3.4028235e+38 }
 0x1ab   : > { %v1223_v49 = vmax.f32 %v1221_v14, %v1222_v40  ;;  %v1364_v2 = vsel %vm1356_vm0, %v4834_v6, -3.4028235e+38  ;;  %v1365_v37 = vmax.f32 %v1357_v5, %v1361_v45  ;;  %v1366_v38 = vmax.f32 %v1358_v11, %v1362_v10  ;;  %v4838_v45 = vld [vmem:[#allocation61_spill] sm:$0xff] }
 0x1ac   : > { %v1367_v50 = vmax.f32 %v1359_v25, %v1363_v15  ;;  %v997_v4 = vmax.f32 %v995_v26, %v996_v21  ;;  %v1298_v30 = vrot.slane %v1297_v34, 2  ;;  %v1368_v7 = vmax.f32 %v1360_v39, %v1364_v2 }
 0x1ad   : > { %vm1425_vm4 = vcmp.eq.s32.totalorder %v3671_v43, 7  ;;  %v1073_v16 = vmax.f32 %v1071_v19, %v1072_v28  ;;  %v1224_v9 = vrot.slane %v1223_v49, 1  ;;  %vm1427_vm15 = vcmp.eq.s32.totalorder %v3723_v56, 7 }
 0x1ae   : > { %vm1429_vm3 = vcmp.eq.s32.totalorder %v3781_v36, 7  ;;  %v1369_v14 = vmax.f32 %v1365_v37, %v1366_v38  ;;  %v1370_v35 = vmax.f32 %v1367_v50, %v1368_v7  ;;  %vm1431_vm2 = vcmp.eq.s32.totalorder %v3861_v0, 7  ;;  %v4846_v37 = vld [vmem:[#allocation33_spill] sm:$0xff] }
 0x1af   : > { %v1433_v33 = vsel %vm1425_vm4, %v4827_v47, -3.4028235e+38  ;;  %v1299_v5 = vmax.f32 %v1297_v34, %v1298_v30  ;;  %v1434_v26 = vsel %vm1426_vm9, %v4828_v60, -3.4028235e+38  ;;  %v1435_v11 = vsel %vm1427_vm15, %v4829_v3, -3.4028235e+38 }
 0x1b0   : > { %v1436_v43 = vsel %vm1428_vm11, %v4831_v62, -3.4028235e+38  ;;  %v1371_v56 = vmax.f32 %v1369_v14, %v1370_v35  ;;  %v1437_v36 = vsel %vm1429_vm3, %v4830_v46, -3.4028235e+38  ;;  %v1438_v7 = vsel %vm1430_vm10, %v4832_v48, -3.4028235e+38 }
 0x1b1   : > { %vm4835_vm7 = vcmask 1040384   ;;  %v1439_v30 = vsel %vm1431_vm2, %v4833_v31, -3.4028235e+38  ;;  %v1440_v41 = vsel %vm1432_vm5, %v4834_v6, -3.4028235e+38  ;;  %v1441_v50 = vmax.f32 %v1433_v33, %v1437_v36  ;;  %v4842_v31 = vld [vmem:[#allocation28_spill] sm:$0xff] }
 0x1b2   : > { %v1501_v0 = vsel %vm4835_vm7, %v921_v1, %v997_v4  ;;  %v1442_v38 = vmax.f32 %v1434_v26, %v1438_v7  ;;  %v1149_v19 = vmax.f32 %v1147_v22, %v1148_v63  ;;  %v1372_v55 = vrot.slane %v1371_v56, 4  ;;  %v4837_v22 = vld [vmem:[#allocation60_spill] sm:$0xff]  ;;  %v4843_v6 = vld [vmem:[#allocation30_spill] sm:$0xff]  ;;  %v4848_v33 = vld [vmem:[#allocation5_spill] sm:$0xff] }
 0x1b3   : > { %v1443_v47 = vmax.f32 %v1435_v11, %v1439_v30  ;;  %v1444_v60 = vmax.f32 %v1436_v43, %v1440_v41  ;;  %vm1876_vm8 = vcmp.eq.s32.totalorder %v4132_v44, 4  ;;  %v1225_v3 = vmax.f32 %v1223_v49, %v1224_v9  ;;  %v4847_v14 = vld [vmem:[#allocation36_spill] sm:$0xff]  ;;  %v4849_v26 = vld [vmem:[#allocation11_spill] sm:$0xff]  ;;  %v4850_v11 = vld [vmem:[#allocation14_spill] sm:$0xff] }
 0x1b4   : > { %v1300_v25 = vrot.slane %v1299_v5, 1  ;;  %vm4836_vm13 = vcmask 1041408   ;;  %v1373_v21 = vmax.f32 %v1371_v56, %v1372_v55  ;;  %v1445_v4 = vmax.f32 %v1441_v50, %v1442_v38  ;;  %v4852_v7 = vld [vmem:[#allocation13_spill] sm:$0xff]  ;;  %v4855_v41 = vld [vmem:[#allocation8_spill] sm:$0xff]  ;;  %v4856_v50 = vld [vmem:[#allocation23_spill] sm:$0xff] }
 0x1b5   : > { %v1502_v24 = vsel %vm4836_vm13, %v1501_v0, %v1073_v16  ;;  %v1446_v40 = vmax.f32 %v1443_v47, %v1444_v60  ;;  %v4310_v58 = vsel %vm1877_vm12, %v4143_v29, -3.4028235e+38  ;;  %v1660_v46 = vmax.f32 %v4837_v22, %v4217_v42  ;;  %v4853_v0 = vld [vmem:[#allocation22_spill] sm:$0xff]  ;;  %v4858_v55 = vld [vmem:[#allocation7_spill] sm:$0xff]  ;;  %v4884_v42 = vld [vmem:[#allocation56_spill] sm:$0xff]  ;;  %v4471_v22 = vpop.permute.xlu0 %846 }
 0x1b6   : > { %v1503_v52 = vsel %vm4715_vm6, %v1502_v24, %v1149_v19  ;;  %v1736_v28 = vmax.f32 %v4838_v45, %v4251_v8  ;;  %v4319_v16 = vsel %vm1800_vm14, %v4151_v23, -3.4028235e+38  ;;  %v4839_v63 = vmax.f32 %v4035_v59, %v4168_v17  ;;  %v4844_v59 = vld [vmem:[#allocation6_spill] sm:$0xff]  ;;  %v4845_v17 = vld [vmem:[#allocation9_spill] sm:$0xff] }
 0x1b7   : > { %v4840_v62 = vmax.f32 %v4066_v61, %v4183_v20  ;;  %v1374_v48 = vrot.slane %v1373_v21, 2  ;;  %v1447_v10 = vmax.f32 %v1445_v4, %v1446_v40  ;;  %vm4841_vm1 = vcmask 1043456   ;;  %v4859_v47 = vld [vmem:[#allocation18_spill] sm:$0xff] }
 0x1b8   : > { %v1504_v1 = vsel %vm4841_vm1, %v1503_v52, %v1225_v3  ;;  %v4333_v49 = vsel %vm1876_vm8, %v4151_v23, -3.4028235e+38  ;;  %v1301_v34 = vmax.f32 %v1299_v5, %v1300_v25  ;;  %v236_v15 = vrot.slane %v4842_v31, 4  ;;  %v4344_v5 = vpop.permute.xlu1 %1518  ;;  %v4861_v52 = vld [vmem:[#allocation37_spill] sm:$0xff] }
 0x1b9   : > { %v4327_v39 = vmax.f32 %v4840_v62, %v4839_v63  ;;  %v313_v2 = vrot.slane %v4843_v6, 4  ;;  %vm670_vm0 = vcmp.eq.s32.totalorder %v4844_v59, 6  ;;  %vm671_vm9 = vcmp.eq.s32.totalorder %v4845_v17, 6  ;;  %v4862_v62 = vld [vmem:[#allocation24_spill] sm:$0xff] }
 0x1ba   : > { %v1375_v61 = vmax.f32 %v1373_v21, %v1374_v48  ;;  %v1448_v20 = vrot.slane %v1447_v10, 4  ;;  %v389_v9 = vrot.slane %v4846_v37, 4  ;;  %v465_v35 = vrot.slane %v4847_v14, 4  ;;  %v4860_v21 = vld [vmem:[#allocation17_spill] sm:$0xff]  ;;  %v4863_v48 = vld [vmem:[#allocation12_spill] sm:$0xff] }
 0x1bb   : > { %vm672_vm11 = vcmp.eq.s32.totalorder %v4848_v33, 6  ;;  %vm675_vm10 = vcmp.eq.s32.totalorder %v4849_v26, 6  ;;  %vm674_vm5 = vcmp.eq.s32.totalorder %v4850_v11, 6  ;;  %vm4851_vm12 = vcmask 1044480  }
 0x1bc   : > { %v1505_v43 = vsel %vm4851_vm12, %v1504_v1, %v1301_v34  ;;  %v237_v56 = vmax.f32 %v4842_v31, %v236_v15  ;;  %v314_v36 = vmax.f32 %v4843_v6, %v313_v2  ;;  %v4854_v30 = vmax.f32 %v4852_v7, %v4853_v0  ;;  %v4864_v15 = vld [vmem:[#allocation19_spill] sm:$0xff]  ;;  %v4865_v6 = vld [vmem:[#allocation16_spill] sm:$0xff] }
 0x1bd   : > { %v4857_v38 = vmax.f32 %v4855_v41, %v4856_v50  ;;  %vm673_vm14 = vcmp.eq.s32.totalorder %v4858_v55, 6  ;;  %vm676_vm4 = vcmp.eq.s32.totalorder %v4859_v47, 6  ;;  %v1376_v60 = vrot.slane %v1375_v61, 1 }
 0x1be   : > { %v1449_v3 = vmax.f32 %v1447_v10, %v1448_v20  ;;  %v390_v25 = vmax.f32 %v4846_v37, %v389_v9  ;;  %v466_v24 = vmax.f32 %v4847_v14, %v465_v35  ;;  %vm677_vm15 = vcmp.eq.s32.totalorder %v4860_v21, 6  ;;  %v4866_v14 = vld [vmem:[#allocation27_spill] sm:$0xff]  ;;  %v4867_v35 = vld [vmem:[#allocation10_spill] sm:$0xff] }
 0x1bf   : > { %v539_v19 = vmax.f32 %v4857_v38, %v4854_v30  ;;  %v238_v4 = vrot.slane %v237_v56, 2  ;;  %v315_v40 = vrot.slane %v314_v36, 2  ;;  %v610_v1 = vmax.f32 %v4863_v48, %v4862_v62 }
 0x1c0   : > { %v1450_v34 = vrot.slane %v1449_v3, 2  ;;  %vm1520_vm3 = vcmp.eq.s32.totalorder %v4344_v5, 1  ;;  %vm746_vm2 = vcmp.eq.s32.totalorder %v4844_v59, 7  ;;  %v391_v10 = vrot.slane %v390_v25, 2  ;;  %v2400_v59 = vld [vmem:[%s3500_s28 + $0x30] sm:$0xff] }
 0x1c1   : > { %v540_v63 = vmax.f32 %v4861_v52, %v539_v19  ;;  %v467_v31 = vrot.slane %v466_v24, 2  ;;  %v611_v2 = vmax.f32 %v4865_v6, %v4864_v15  ;;  %vm747_vm7 = vcmp.eq.s32.totalorder %v4845_v17, 7  ;;  %v4868_v19 = vld [vmem:[#allocation25_spill] sm:$0xff]  ;;  %v2394_v6 = vld [vmem:[%s3500_s28] sm:$0xff]  ;;  %v2401_v17 = vld [vmem:[%s3500_s28 + $0x38] sm:$0xff] }
 0x1c2   : > { %vm748_vm8 = vcmp.eq.s32.totalorder %v4848_v33, 7  ;;  %v239_v20 = vmax.f32 %v237_v56, %v238_v4  ;;  %v316_v37 = vmax.f32 %v314_v36, %v315_v40  ;;  %v612_v7 = vmax.f32 %v4867_v35, %v4866_v14  ;;  %v4869_v4 = vld [vmem:[#allocation15_spill] sm:$0xff] }
 0x1c3   : > { %v541_v9 = vrot.slane %v540_v63, 4  ;;  %v1377_v0 = vmax.f32 %v1375_v61, %v1376_v60  ;;  %v1451_v30 = vmax.f32 %v1449_v3, %v1450_v34  ;;  %vm750_vm1 = vcmp.eq.s32.totalorder %v4850_v11, 7 }
 0x1c4   : > { %v392_v41 = vmax.f32 %v390_v25, %v391_v10  ;;  %v4375_v50 = vmax.f32 %v466_v24, %v467_v31  ;;  %vm752_vm6 = vcmp.eq.s32.totalorder %v4859_v47, 7  ;;  %v240_v56 = vrot.slane %v239_v20, 1 }
 0x1c5   : > { %v317_v36 = vrot.slane %v316_v37, 1  ;;  %v542_v38 = vmax.f32 %v540_v63, %v541_v9  ;;  %v613_v61 = vmax.f32 %v4869_v4, %v4868_v19  ;;  %v1452_v60 = vrot.slane %v1451_v30, 1  ;;  %v2395_v9 = vld [vmem:[%s3500_s28 + $0x8] sm:$0xff] }
 0x1c6   : > { %vm4870_vm13 = vcmask 1045504   ;;  %v393_v25 = vrot.slane %v392_v41, 1  ;;  %v469_v24 = vrot.slane %v4375_v50, 1  ;;  %v614_v52 = vmax.f32 %v610_v1, %v611_v2  ;;  %v2396_v2 = vld [vmem:[%s3500_s28 + $0x10] sm:$0xff]  ;;  %v4873_v4 = vld [vmem:[#allocation20_spill] sm:$0xff] }
 0x1c7   : > { %v1506_v3 = vsel %vm4870_vm13, %v1505_v43, %v1377_v0  ;;  %v543_v40 = vrot.slane %v542_v38, 2  ;;  %v615_v62 = vmax.f32 %v612_v7, %v613_v61  ;;  %v1453_v63 = vmax.f32 %v1451_v30, %v1452_v60  ;;  %v2398_v7 = vld [vmem:[%s3500_s28 + $0x28] sm:$0xff] }
 0x1c8   : > { %v241_v48 = vmax.f32 %v239_v20, %v240_v56  ;;  %v318_v34 = vmax.f32 %v316_v37, %v317_v36  ;;  %v394_v10 = vmax.f32 %v392_v41, %v393_v25  ;;  %v678_v43 = vsel %vm670_vm0, %v2394_v6, -3.4028235e+38  ;;  %v2397_v37 = vld [vmem:[%s3500_s28 + $0x20] sm:$0xff]  ;;  %v2399_v56 = vld [vmem:[%s3500_s28 + $0x18] sm:$0xff] }
 0x1c9   : > { %v544_v31 = vmax.f32 %v542_v38, %v543_v40  ;;  %v616_v15 = vmax.f32 %v614_v52, %v615_v62  ;;  %v679_v14 = vsel %vm671_vm9, %v2395_v9, -3.4028235e+38  ;;  %vm4871_vm13 = vcmask 1046528   ;;  %v4872_v38 = vld [vmem:[#allocation21_spill] sm:$0xff] }
 0x1ca   : > { %v1507_v1 = vsel %vm4871_vm13, %v1506_v3, %v1453_v63  ;;  %v680_v20 = vsel %vm672_vm11, %v2396_v2, -3.4028235e+38  ;;  %v682_v35 = vsel %vm674_vm5, %v2397_v37, -3.4028235e+38  ;;  %v683_v0 = vsel %vm675_vm10, %v2398_v7, -3.4028235e+38 }
 0x1cb   : > { %vm1953_vm0 = vcmp.eq.s32.totalorder %v4123_v57, 5  ;;  %vm1952_vm12 = vcmp.eq.s32.totalorder %v4132_v44, 5  ;;  %v1521_v30 = vsel %vm1520_vm3, %v1507_v1, 0.0  ;;  %v617_v41 = vrot.slane %v616_v15, 4 }
 0x1cc   : > { %v681_v36 = vsel %vm673_vm14, %v2399_v56, -3.4028235e+38  ;;  %v684_v19 = vsel %vm676_vm4, %v4872_v38, -3.4028235e+38  ;;  %2309 = vst [vmem:[%s4414_s3 + $0x8] sm:$0xff] %v1521_v30  ;;  %v686_v5 = vmax.f32 %v678_v43, %v682_v35  ;;  %v687_v60 = vmax.f32 %v679_v14, %v683_v0 }
 0x1cd   : > { %v685_v61 = vsel %vm677_vm15, %v4873_v4, -3.4028235e+38  ;;  %v688_v3 = vmax.f32 %v680_v20, %v684_v19  ;;  %v545_v25 = vrot.slane %v544_v31, 1  ;;  %v618_v40 = vmax.f32 %v616_v15, %v617_v41 }
 0x1ce   : > { %v689_v52 = vmax.f32 %v681_v36, %v685_v61  ;;  %v754_v62 = vsel %vm746_vm2, %v2394_v6, -3.4028235e+38  ;;  %v690_v63 = vmax.f32 %v686_v5, %v687_v60  ;;  %v755_v1 = vsel %vm747_vm7, %v2395_v9, -3.4028235e+38 }
 0x1cf   : > { %v756_v30 = vsel %vm748_vm8, %v2396_v2, -3.4028235e+38  ;;  %vm4874_vm9 = vcmp.eq.s32.totalorder %v4858_v55, 7  ;;  %v619_v43 = vrot.slane %v618_v40, 2  ;;  %v758_v20 = vsel %vm750_vm1, %v2397_v37, -3.4028235e+38 }
 0x1d0   : > { %v757_v38 = vsel %vm4874_vm9, %v2399_v56, -3.4028235e+38  ;;  %v691_v14 = vmax.f32 %v688_v3, %v689_v52  ;;  %vm4875_vm11 = vcmp.eq.s32.totalorder %v4849_v26, 7  ;;  %v760_v6 = vsel %vm752_vm6, %v2400_v59, -3.4028235e+38  ;;  %v4886_v3 = vld [vmem:[#allocation46_spill] sm:$0xff] }
 0x1d1   : > { %v759_v15 = vsel %vm4875_vm11, %v2398_v7, -3.4028235e+38  ;;  %vm4876_vm10 = vcmp.eq.s32.totalorder %v4860_v21, 7  ;;  %v762_v9 = vmax.f32 %v754_v62, %v758_v20  ;;  %v620_v55 = vmax.f32 %v618_v40, %v619_v43  ;;  %v4890_v40 = vld [vmem:[#allocation68_spill] sm:$0xff] }
 0x1d2   : > { %v761_v33 = vsel %vm4876_vm10, %v2401_v17, -3.4028235e+38  ;;  %v763_v2 = vmax.f32 %v755_v1, %v759_v15  ;;  %v692_v35 = vmax.f32 %v690_v63, %v691_v14  ;;  %v764_v0 = vmax.f32 %v756_v30, %v760_v6  ;;  %v4892_v63 = vld [vmem:[#allocation55_spill] sm:$0xff]  ;;  %v4893_v1 = vld [vmem:[#allocation70_spill] sm:$0xff]  ;;  %v4899_v15 = vld [vmem:[#allocation69_spill] sm:$0xff] }
 0x1d3   : > { %v765_v41 = vmax.f32 %v757_v38, %v761_v33  ;;  %v470_v11 = vmax.f32 %v4375_v50, %v469_v24  ;;  %v546_v37 = vmax.f32 %v544_v31, %v545_v25  ;;  %vm4877_vm5 = vcmask 1040384   ;;  %v4881_v24 = vld [vmem:[#allocation62_spill] sm:$0xff]  ;;  %v4889_v25 = vld [vmem:[#allocation51_spill] sm:$0xff]  ;;  %v4901_v17 = vld [vmem:[#allocation40_spill] sm:$0xff] }
 0x1d4   : > { %v766_v56 = vmax.f32 %v762_v9, %v763_v2  ;;  %v823_v26 = vsel %vm4877_vm5, %v241_v48, %v318_v34  ;;  %v621_v7 = vrot.slane %v620_v55, 1  ;;  %v693_v36 = vrot.slane %v692_v35, 4  ;;  %v4902_v33 = vld [vmem:[#allocation42_spill] sm:$0xff]  ;;  %v4903_v9 = vld [vmem:[#allocation49_spill] sm:$0xff] }
 0x1d5   : > { %v767_v47 = vmax.f32 %v764_v0, %v765_v41  ;;  %vm4878_vm6 = vcmask 1041408   ;;  %v4879_v21 = vmax.f32 %v4042_v12, %v4171_v27  ;;  %v4880_v61 = vmax.f32 %v4045_v53, %v4177_v54  ;;  %v4904_v41 = vld [vmem:[#allocation44_spill] sm:$0xff] }
 0x1d6   : > { %v825_v19 = vsel %vm4878_vm6, %v823_v26, %v394_v10  ;;  %v1812_v48 = vmax.f32 %v4881_v24, %v4319_v16  ;;  %vm4882_vm14 = vcmask 1042432   ;;  %v622_v10 = vmax.f32 %v620_v55, %v621_v7 }
 0x1d7   : > { %v1663_v4 = vmax.f32 %v1660_v46, %v4879_v21  ;;  %v1739_v50 = vmax.f32 %v1736_v28, %v4880_v61  ;;  %v827_v34 = vsel %vm4882_vm14, %v825_v19, %v470_v11  ;;  %v694_v31 = vmax.f32 %v692_v35, %v693_v36  ;;  %v4905_v11 = vld [vmem:[#allocation54_spill] sm:$0xff]  ;;  %v4907_v36 = vld [vmem:[#allocation71_spill] sm:$0xff] }
 0x1d8   : > { %v768_v5 = vmax.f32 %v766_v56, %v767_v47  ;;  %vm4883_vm4 = vcmask 1043456   ;;  %v1889_v27 = vmax.f32 %v4884_v42, %v4310_v58  ;;  %v4462_v53 = vsel %vm1953_vm0, %v4143_v29, -3.4028235e+38  ;;  %v4908_v47 = vld [vmem:[#allocation53_spill] sm:$0xff] }
 0x1d9   : > { %v829_v12 = vsel %vm4883_vm4, %v827_v34, %v546_v37  ;;  %v1888_v54 = vmax.f32 %v4110_v13, %v4333_v49  ;;  %v4469_v8 = vsel %vm1952_vm12, %v4151_v23, -3.4028235e+38  ;;  %v695_v46 = vrot.slane %v694_v31, 2  ;;  %v4887_v13 = vld [vmem:[#allocation64_spill] sm:$0xff]  ;;  %v4906_v37 = vld [vmem:[#allocation59_spill] sm:$0xff] }
 0x1da   : > { %v769_v45 = vrot.slane %v768_v5, 4  ;;  %vm4885_vm15 = vcmask 1044480   ;;  %v1588_v58 = vmax.f32 %v4174_v32, %v4327_v39  ;;  %v1664_v16 = vmax.f32 %v4187_v18, %v1663_v4  ;;  %v4895_v39 = vld [vmem:[#allocation47_spill] sm:$0xff]  ;;  %v4896_v18 = vld [vmem:[#allocation66_spill] sm:$0xff] }
 0x1db   : > { %v831_v28 = vsel %vm4885_vm15, %v829_v12, %v622_v10  ;;  %v1740_v60 = vmax.f32 %v4195_v51, %v1739_v50  ;;  %v4888_v49 = vmax.f32 %v4886_v3, %v4887_v13  ;;  %v4891_v52 = vmax.f32 %v4889_v25, %v4890_v40  ;;  %v4898_v51 = vld [vmem:[#allocation52_spill] sm:$0xff]  ;;  %v4909_v10 = vld [vmem:[#allocation67_spill] sm:$0xff] }
 0x1dc   : > { %v4894_v30 = vmax.f32 %v4892_v63, %v4893_v1  ;;  %v696_v43 = vmax.f32 %v694_v31, %v695_v46  ;;  %v770_v14 = vmax.f32 %v768_v5, %v769_v45  ;;  %vm848_vm3 = vcmp.eq.s32.totalorder %v4471_v22, 1  ;;  %v4910_v31 = vld [vmem:[#allocation48_spill] sm:$0xff]  ;;  %v4918_v22 = vld [vmem:[#allocation45_spill] sm:$0xff] }
 0x1dd   : > { %v1814_v62 = vmax.f32 %v4891_v52, %v4888_v49  ;;  %v1589_v32 = vrot.slane %v1588_v58, 4  ;;  %v4897_v20 = vmax.f32 %v4895_v39, %v4896_v18  ;;  %v4900_v59 = vmax.f32 %v4898_v51, %v4899_v15  ;;  %v4915_v18 = vld [vmem:[#allocation43_spill] sm:$0xff]  ;;  %v4916_v51 = vld [vmem:[#allocation41_spill] sm:$0xff] }
 0x1de   : > { %v1815_v38 = vmax.f32 %v1812_v48, %v4894_v30  ;;  %vm2023_vm2 = vcmp.eq.s32.totalorder %v4901_v17, 6  ;;  %vm2022_vm7 = vcmp.eq.s32.totalorder %v4902_v33, 6  ;;  %vm2024_vm8 = vcmp.eq.s32.totalorder %v4903_v9, 6 }
 0x1df   : > { %v1890_v6 = vmax.f32 %v4900_v59, %v4897_v20  ;;  %v1665_v2 = vrot.slane %v1664_v16, 4  ;;  %v1741_v55 = vrot.slane %v1740_v60, 4  ;;  %v1891_v0 = vmax.f32 %v1888_v54, %v1889_v27  ;;  %v4917_v59 = vld [vmem:[#allocation50_spill] sm:$0xff] }
 0x1e0   : > { %v1816_v35 = vmax.f32 %v1814_v62, %v1815_v38  ;;  %vm2025_vm1 = vcmp.eq.s32.totalorder %v4904_v41, 6  ;;  %vm2027_vm12 = vcmp.eq.s32.totalorder %v4905_v11, 6  ;;  %vm2026_vm13 = vcmp.eq.s32.totalorder %v4906_v37, 6  ;;  %v4913_v62 = vld [vmem:[#allocation58_spill] sm:$0xff] }
 0x1e1   : > { %v697_v56 = vrot.slane %v696_v43, 1  ;;  %v771_v26 = vrot.slane %v770_v14, 2  ;;  %v1590_v7 = vmax.f32 %v1588_v58, %v1589_v32  ;;  %v1962_v19 = vmax.f32 %v4908_v47, %v4907_v36 }
 0x1e2   : > { %vm2029_vm0 = vcmp.eq.s32.totalorder %v4123_v57, 6  ;;  %vm2028_vm9 = vcmp.eq.s32.totalorder %v4132_v44, 6  ;;  %v1666_v21 = vmax.f32 %v1664_v16, %v1665_v2  ;;  %v1742_v4 = vmax.f32 %v1740_v60, %v1741_v55  ;;  %v4912_v16 = vld [vmem:[#allocation65_spill] sm:$0xff] }
 0x1e3   : > { %v1817_v61 = vrot.slane %v1816_v35, 4  ;;  %v1892_v50 = vmax.f32 %v1890_v6, %v1891_v0  ;;  %v698_v24 = vmax.f32 %v696_v43, %v697_v56  ;;  %v772_v48 = vmax.f32 %v770_v14, %v771_v26  ;;  %v4920_v56 = vld [vmem:[#allocation57_spill] sm:$0xff] }
 0x1e4   : > { %v1591_v34 = vrot.slane %v1590_v7, 2  ;;  %v1963_v5 = vmax.f32 %v4910_v31, %v4909_v10  ;;  %vm2098_vm11 = vcmp.eq.s32.totalorder %v4902_v33, 7  ;;  %vm2099_vm10 = vcmp.eq.s32.totalorder %v4901_v17, 7 }
 0x1e5   : > { %v1667_v12 = vrot.slane %v1666_v21, 2  ;;  %v1743_v42 = vrot.slane %v1742_v4, 2  ;;  %v1818_v27 = vmax.f32 %v1816_v35, %v1817_v61  ;;  %v1893_v54 = vrot.slane %v1892_v50, 4  ;;  %v4919_v35 = vld [vmem:[#allocation63_spill] sm:$0xff] }
 0x1e6   : > { %v773_v46 = vrot.slane %v772_v48, 1  ;;  %vm4911_vm5 = vcmask 1045504   ;;  %v1592_v58 = vmax.f32 %v1590_v7, %v1591_v34  ;;  %v1964_v60 = vmax.f32 %v4912_v16, %v4469_v8 }
 0x1e7   : > { %v833_v45 = vsel %vm4911_vm5, %v831_v28, %v698_v24  ;;  %v1668_v3 = vmax.f32 %v1666_v21, %v1667_v12  ;;  %v1744_v13 = vmax.f32 %v1742_v4, %v1743_v42  ;;  %v1819_v49 = vrot.slane %v1818_v27, 2 }
 0x1e8   : > { %v1894_v25 = vmax.f32 %v1892_v50, %v1893_v54  ;;  %v774_v40 = vmax.f32 %v772_v48, %v773_v46  ;;  %vm2102_vm4 = vcmp.eq.s32.totalorder %v4906_v37, 7  ;;  %v1593_v52 = vrot.slane %v1592_v58, 1 }
 0x1e9   : > { %v1965_v28 = vmax.f32 %v4913_v62, %v4462_v53  ;;  %vm2103_vm15 = vcmp.eq.s32.totalorder %v4905_v11, 7  ;;  %vm2104_vm5 = vcmp.eq.s32.totalorder %v4132_v44, 7  ;;  %vm2105_vm14 = vcmp.eq.s32.totalorder %v4123_v57, 7 }
 0x1ea   : > { %v1669_v63 = vrot.slane %v1668_v3, 1  ;;  %vm4914_vm6 = vcmask 1046528   ;;  %v1745_v1 = vrot.slane %v1744_v13, 1  ;;  %v1966_v30 = vmax.f32 %v1962_v19, %v1963_v5 }
 0x1eb   : > { %v835_v8 = vsel %vm4914_vm6, %v833_v45, %v774_v40  ;;  %v1967_v38 = vmax.f32 %v1964_v60, %v1965_v28  ;;  %v1594_v14 = vmax.f32 %v1592_v58, %v1593_v52  ;;  %v1820_v32 = vmax.f32 %v1818_v27, %v1819_v49 }
 0x1ec   : > { %v849_v43 = vsel %vm848_vm3, %v835_v8, 0.0  ;;  %v1895_v39 = vrot.slane %v1894_v25, 2  ;;  %v2030_v20 = vsel %vm2022_vm7, %v4915_v18, -3.4028235e+38  ;;  %v2031_v15 = vsel %vm2023_vm2, %v4916_v51, -3.4028235e+38 }
 0x1ed   : > { %850 = vst [vmem:[%s4414_s3] sm:$0xff] %v849_v43  ;;  %v1968_v53 = vmax.f32 %v1966_v30, %v1967_v38  ;;  %v2032_v6 = vsel %vm2024_vm8, %v4917_v59, -3.4028235e+38  ;;  %v1670_v2 = vmax.f32 %v1668_v3, %v1669_v63  ;;  %v2033_v55 = vsel %vm2025_vm1, %v4918_v22, -3.4028235e+38 }
 0x1ee   : > { %v2034_v0 = vsel %vm2026_vm13, %v4919_v35, -3.4028235e+38  ;;  %v2035_v26 = vsel %vm2027_vm12, %v4920_v56, -3.4028235e+38  ;;  %v1746_v7 = vmax.f32 %v1744_v13, %v1745_v1  ;;  %v2036_v47 = vsel %vm2028_vm9, %v4151_v23, -3.4028235e+38  ;;  %vm4929_vm9 = vmmov %vm4914_vm6 }
 0x1ef   : > { %v1969_v36 = vrot.slane %v1968_v53, 4  ;;  %v2037_v19 = vsel %vm2029_vm0, %v4143_v29, -3.4028235e+38  ;;  %v2038_v21 = vmax.f32 %v2030_v20, %v2034_v0  ;;  %v2039_v4 = vmax.f32 %v2031_v15, %v2035_v26  ;;  %v2192_v20 = vpop.permute.xlu0 %2191 }
 0x1f0   : > { %v2040_v61 = vmax.f32 %v2032_v6, %v2036_v47  ;;  %v2041_v50 = vmax.f32 %v2033_v55, %v2037_v19  ;;  %v1821_v24 = vrot.slane %v1820_v32, 1  ;;  %v2106_v34 = vsel %vm2098_vm11, %v4915_v18, -3.4028235e+38 }
 0x1f1   : > { %v1970_v48 = vmax.f32 %v1968_v53, %v1969_v36  ;;  %v2107_v10 = vsel %vm2099_vm10, %v4916_v51, -3.4028235e+38  ;;  %v2042_v31 = vmax.f32 %v2038_v21, %v2039_v4  ;;  %vm4921_vm3 = vcmp.eq.s32.totalorder %v4903_v9, 7 }
 0x1f2   : > { %v2043_v5 = vmax.f32 %v2040_v61, %v2041_v50  ;;  %v2108_v12 = vsel %vm4921_vm3, %v4917_v59, -3.4028235e+38  ;;  %vm4922_vm2 = vcmp.eq.s32.totalorder %v4904_v41, 7  ;;  %v1896_v27 = vmax.f32 %v1894_v25, %v1895_v39 }
 0x1f3   : > { %v2109_v42 = vsel %vm4922_vm2, %v4918_v22, -3.4028235e+38  ;;  %v1971_v54 = vrot.slane %v1970_v48, 2  ;;  %v2110_v33 = vsel %vm2102_vm4, %v4919_v35, -3.4028235e+38  ;;  %vm4923_vm7 = vcmask 1040384  }
 0x1f4   : > { %v2111_v17 = vsel %vm2103_vm15, %v4920_v56, -3.4028235e+38  ;;  %v2044_v46 = vmax.f32 %v2042_v31, %v2043_v5  ;;  %v2112_v9 = vsel %vm2104_vm5, %v4151_v23, -3.4028235e+38  ;;  %v2113_v41 = vsel %vm2105_vm14, %v4143_v29, -3.4028235e+38 }
 0x1f5   : > { %v2114_v45 = vmax.f32 %v2106_v34, %v2110_v33  ;;  %v2115_v58 = vmax.f32 %v2107_v10, %v2111_v17  ;;  %v2116_v16 = vmax.f32 %v2108_v12, %v2112_v9  ;;  %v2117_v60 = vmax.f32 %v2109_v42, %v2113_v41 }
 0x1f6   : > { %v2174_v37 = vsel %vm4923_vm7, %v1594_v14, %v1670_v2  ;;  %v2045_v3 = vrot.slane %v2044_v46, 4  ;;  %v1972_v13 = vmax.f32 %v1970_v48, %v1971_v54  ;;  %v1897_v25 = vrot.slane %v1896_v27, 1 }
 0x1f7   : > { %v2118_v49 = vmax.f32 %v2114_v45, %v2115_v58  ;;  %v2119_v11 = vmax.f32 %v2116_v16, %v2117_v60  ;;  %vm4924_vm8 = vcmask 1041408   ;;  %v1822_v44 = vmax.f32 %v1820_v32, %v1821_v24 }
 0x1f8   : > { %v2046_v40 = vmax.f32 %v2044_v46, %v2045_v3  ;;  %v2175_v52 = vsel %vm4924_vm8, %v2174_v37, %v1746_v7  ;;  %v1973_v57 = vrot.slane %v1972_v13, 1  ;;  %vm4925_vm1 = vcmask 1042432  }
 0x1f9   : > { %v2120_v23 = vmax.f32 %v2118_v49, %v2119_v11  ;;  %v2176_v28 = vsel %vm4925_vm1, %v2175_v52, %v1822_v44  ;;  %v1898_v63 = vmax.f32 %v1896_v27, %v1897_v25  ;;  %vm4926_vm12 = vcmask 1043456  }
 0x1fa   : > { %v2047_v62 = vrot.slane %v2046_v40, 2  ;;  %v1974_v43 = vmax.f32 %v1972_v13, %v1973_v57  ;;  %vm4927_vm13 = vcmask 1044480   ;;  %vm4928_vm0 = vcmask 1045504  }
 0x1fb   : > { %v2121_v29 = vrot.slane %v2120_v23, 4  ;;  %v2177_v38 = vsel %vm4926_vm12, %v2176_v28, %v1898_v63  ;;  %vm2193_vm11 = vcmp.eq.s32.totalorder %v2192_v20, 1 }
 0x1fc   : > { %v2048_v8 = vmax.f32 %v2046_v40, %v2047_v62  ;;  %v2178_v32 = vsel %vm4927_vm13, %v2177_v38, %v1974_v43 }
 0x1fd   : > { %v2122_v1 = vmax.f32 %v2120_v23, %v2121_v29 }
 0x1fe   : > { %v2049_v30 = vrot.slane %v2048_v8, 1 }
 0x1ff   : > { %v2123_v14 = vrot.slane %v2122_v1, 2 }
 0x200   : > { %v2050_v53 = vmax.f32 %v2048_v8, %v2049_v30 }
 0x201   : > { %v2124_v39 = vmax.f32 %v2122_v1, %v2123_v14 }
 0x202   : > { %v2179_v51 = vsel %vm4928_vm0, %v2178_v32, %v2050_v53 }
 0x203   : > { %v2125_v18 = vrot.slane %v2124_v39, 1 }
 0x205   : > { %v2126_v15 = vmax.f32 %v2124_v39, %v2125_v18 }
 0x207   : > { %v2180_v59 = vsel %vm4929_vm9, %v2179_v51, %v2126_v15 }
 0x208   : > { %v2194_v6 = vsel %vm2193_vm11, %v2180_v59, 0.0 }
 0x209   : > { %2326 = vst [vmem:[%s4414_s3 + $0x10] sm:$0xff] %v2194_v6 }
 0x20a   : > { %2415 = shalt.err (!%p2412_p3)
}
 0x20b   : > { %s2416_s22 = scalar_lea.hbm %s4585_s8, 384  ;;  %s2420_s25 = scalar_lea.hbm %s4633_s2, 768 }
 0x20c   : > { %p2417_p4 = scmp.ne.s32.totalorder %s4585_s8, %s2416_s22  ;;  %p2421_p9 = scmp.lt.u32.totalorder %s4585_s8, %s4633_s2 }
 0x20d   : > { %p2422_p10 = scmp.lt.u32.totalorder %s2420_s25, %s2416_s22  ;;  %p2424_p12 = scmp.lt.u32.totalorder %s2416_s22, %s4585_s8 }
 0x20e   : > { %p2418_p7 = pnand %p2417_p4, %p2523_p5 }
 0x20f   : > { %p2423_p11 = por %p2422_p10, %p2421_p9 }
 0x210   : > { %p2419_p8 = pneg %p2418_p7 }
 0x211   : > { %p2425_p13 = por %p2424_p12, %p2423_p11 }
 0x213   : > { %p2426_p0 = pnand %p2425_p13, %p2419_p8 }
 0x215   : > { %2429 = shalt.err (!%p2426_p0)
}
 0x216   : > { %s2468_s28 = smov 128   ;;  %s2469_s29 = smov 8  }
 0x217   : > { %2334 = dma.vmem_to_hbm [thread:$0]  (%p2523_p5), %s4579_s4, 384, %s4585_s8, %s4590_s13, %s2468_s28, %s2468_s28, %s2469_s29  }
 0x218 PF: > { %p2340_p1 = scmp.ge.s32.totalorder %s2464_s12, 2  ;;  %s2226_s30 = sand.u32 1, %s2452_s9  }
 0x219   : > { %s2227_s3 = scalar_lea.sflag [#allocation3], %s2226_s30 }
 0x21a   : > { %p2337_p2 = pnand %p2340_p1, %p2527_p6 }
 0x21c   : > { %2447 = dma.done.wait (!%p2337_p2), %s2227_s3, 384  }
 0x21d   : > { %2449 = vsyncadd (!%p2337_p2), %s2227_s3, 4294966912  ;;  %p12_p3 = scmp.ge.s32.totalorder %s2510_s15, 4   ;;  %s4930_s9 = smov %s2456_s10 }
 0x21e   : > { %s4931_s10 = smov %s2460_s11  ;;  %s4932_s11 = smov %s2521_s18 }
 0x21f   : > { %s4933_s12 = smov %s2510_s15  ;;  %14 = sbr.rel (!%p12_p3) target bundleno = 3 (0x3), region = 72 }
 0x226   :  { %2232 = vsyncpa [#allocation3], 1 }
 0x227   :  { %2234 = vsyncpa [#allocation3 + $0x1], 1 }

</bundles_post_ra>
